<compile_context>
chip_gen: v5e
topology: v5e:2x2
jax: 0.10.0
libtpu: 0.0.40
codegen_flags: <defaults>
</compile_context>

<pallas_src>
import functools

import jax
import jax.numpy as jnp
from jax.experimental import pallas as pl
from jax.experimental.pallas import tpu as pltpu


# ----------------------------------------------------------------------------
# Fused FFN kernel: LayerNorm (affine folded) -> Linear1 -> SiLU -> Linear2
# ----------------------------------------------------------------------------
def _ffn_kernel(x_ref, w1_ref, b1_ref, w2_ref, b2_ref, o_ref, *, eps):
    # ---- LayerNorm statistics in a single pass (f32 math) ----------------
    x = x_ref[...].astype(jnp.float32)                       # (tm, D)
    mu = jnp.mean(x, axis=-1, keepdims=True)
    var = jnp.maximum(jnp.mean(x * x, axis=-1, keepdims=True) - mu * mu, 0.0)
    inv = jax.lax.rsqrt(var + eps)                           # EUP
    # gamma/beta were folded into W1/b1 by the wrapper (eval-mode fold).
    xn = ((x - mu) * inv).astype(jnp.bfloat16)               # (tm, D) bf16

    # ---- Linear1 (bf16 MXU operands, f32 accumulation) + SiLU ------------
    h = jnp.dot(xn, w1_ref[...], preferred_element_type=jnp.float32)  # (tm, 4D)
    h = (h + b1_ref[...]).astype(jnp.bfloat16)               # bias add, drop to bf16
    h = h * jax.nn.sigmoid(h)                                # SiLU in bf16 (VPU/EUP)
    # TODO(synk): dropout implemented as identity (eval-mode forward); a
    # training-mode version would use pltpu.prng_seed + pltpu.stateful_bernoulli.

    # ---- Linear2 ----------------------------------------------------------
    y = jnp.dot(h, w2_ref[...], preferred_element_type=jnp.float32)   # (tm, D)
    o_ref[...] = (y + b2_ref[...]).astype(o_ref.dtype)


# ----------------------------------------------------------------------------
# Parameter prep: fold LayerNorm affine into Linear1 (eval-mode, done once)
# ----------------------------------------------------------------------------
def fold_layernorm_affine(params):
    """gamma -> scale W1 rows; beta @ W1 -> add to b1.  Fold done in f32."""
    w1_f32 = params["w1"].astype(jnp.float32)                 # (D, Dh)
    gamma = params["gamma"].astype(jnp.float32).reshape(-1, 1)  # (D, 1)
    beta = params["beta"].astype(jnp.float32).reshape(1, -1)    # (1, D)
    return {
        "w1": (gamma * w1_f32).astype(jnp.bfloat16),
        "b1": params["b1"].astype(jnp.float32) + beta @ w1_f32,
        "w2": params["w2"].astype(jnp.bfloat16),
        "b2": params["b2"].astype(jnp.float32),
    }


def _choose_row_tile(n_rows, tm_max):
    """Largest multiple of 16 that divides n_rows and is <= tm_max.  Halved
    once if that would leave a single grid step, so the 'parallel' row axis
    can shard across both v7x TensorCores.  Returns None if no divisor exists
    (caller falls back to padding)."""
    upper = min(tm_max, n_rows)
    upper -= upper % 16
    for cand in range(upper, 0, -16):
        if n_rows % cand == 0:
            if n_rows // cand < 2 and cand % 32 == 0:
                cand //= 2                       # keep >= 2 grid steps
            return cand
    return None


# ----------------------------------------------------------------------------
# Wrapper
# ----------------------------------------------------------------------------
def feed_forward(x, folded_params, *, eps=1e-5, tm=256):
    """x: (B, S, D) -> (B, S, D).  `folded_params` from fold_layernorm_affine.
    Kernel I/O dtype follows x.dtype (use bf16 on v6e/v7x for best bandwidth)."""
    B, S, D = x.shape
    Dh = folded_params["w1"].shape[1]
    N = B * S
    x2d = x.reshape(N, D)

    tile = _choose_row_tile(N, tm)
    n_pad = 0
    if tile is None:
        # Awkward row count: pad.  TODO(synk): replace with a masked final-tile
        # store to avoid the extra pad/slice HBM pass.
        tile = min(tm, 16 * pl.cdiv(N, 16))
        n_pad = (-N) % tile
        x2d = jnp.pad(x2d, ((0, n_pad), (0, 0)))
    Np = N + n_pad

    row_in_spec = pl.BlockSpec((tile, D), lambda i: (i, 0))
    row_out_spec = pl.BlockSpec((tile, D), lambda i: (i, 0))
    # Resident operands (constant index_map -> fetched once, stay in VMEM).
    # At production encoder dims, add pipeline_mode=pl.Buffered(1) here to
    # halve resident-weight VMEM; negligible at D=128 so omitted.
    resident = lambda shape: pl.BlockSpec(shape, lambda i: (0, 0))

    in_bytes = x2d.dtype.itemsize
    out_bytes = jnp.dtype(x.dtype).itemsize
    weight_bytes = 2 * (D * Dh + Dh * D)                 # bf16 W1 + W2
    bias_bytes = 4 * (Dh + D)
    # Rough per-core working set: double-buffered row tiles + (double-buffered)
    # resident weights + hidden-activation scratch headroom.
    vmem_est = (
        2 * tile * D * (in_bytes + out_bytes)
        + 2 * weight_bytes
        + 2 * bias_bytes
        + tile * Dh * 8
    )
    vmem_limit = int(min(max(2 * vmem_est, 32 << 20), 48 << 20))

    cost = pl.CostEstimate(
        flops=4 * Np * D * Dh,                           # two matmuls
        transcendentals=Np * Dh,                         # sigmoid
        bytes_accessed=Np * D * (in_bytes + out_bytes) + weight_bytes + bias_bytes,
    )

    out2d = pl.pallas_call(
        functools.partial(_ffn_kernel, eps=eps),
        out_shape=jax.ShapeDtypeStruct((Np, D), x.dtype),
        grid=(Np // tile,),
        in_specs=[
            row_in_spec,                # x rows      (tile, D)
            resident((D, Dh)),          # W1 (bf16, gamma folded in)
            resident((1, Dh)),          # b1 (f32, beta@W1 folded in)
            resident((Dh, D)),          # W2 (bf16)
            resident((1, D)),           # b2 (f32)
        ],
        out_specs=row_out_spec,
        compiler_params=pltpu.CompilerParams(
            dimension_semantics=("parallel",),
            vmem_limit_bytes=vmem_limit,
        ),
        cost_estimate=cost,
    )(x2d, folded_params["w1"], folded_params["b1"],
      folded_params["w2"], folded_params["b2"])

    if n_pad:
        out2d = out2d[:N]
    return out2d.reshape(B, S, D)


# ----------------------------------------------------------------------------
# Pure-JAX reference (f32 math, unfolded params) for correctness checking
# ----------------------------------------------------------------------------
def reference_forward(x, params, eps=1e-5):
    xf = x.astype(jnp.float32)
    mu = jnp.mean(xf, axis=-1, keepdims=True)
    xc = xf - mu
    var = jnp.mean(xc * xc, axis=-1, keepdims=True)
    xn = (xc * jax.lax.rsqrt(var + eps)
          * params["gamma"].astype(jnp.float32)[0]
          + params["beta"].astype(jnp.float32)[0])
    h = xn @ params["w1"].astype(jnp.float32) + params["b1"][0]
    h = h * jax.nn.sigmoid(h)                      # SiLU
    y = h @ params["w2"].astype(jnp.float32) + params["b2"][0]
    return y.astype(x.dtype)


if __name__ == "__main__":
    # Small, (8,128)-aligned shapes consistent with the module:
    #   batch=4, seq=128, encoder_dim=128, expansion_factor=4 -> hidden=512
    # N = 512 rows, tm=256 -> 2 grid steps (keeps both v7x TCs busy).
    B, S, D, expansion = 4, 128, 128, 4
    Dh = D * expansion

    key = jax.random.PRNGKey(0)
    kx, kg, kb, k1, kb1, k2, kb2 = jax.random.split(key, 7)
    # bf16 activations in/out (recommended on v6e/v7x — kernel is HBM-bound).
    x = jax.random.normal(kx, (B, S, D), jnp.float32).astype(jnp.bfloat16)
    params = {
        "gamma": 1.0 + 0.1 * jax.random.normal(kg, (1, D), jnp.float32),
        "beta":  0.1 * jax.random.normal(kb, (1, D), jnp.float32),
        "w1":   (0.05 * jax.random.normal(k1, (D, Dh), jnp.float32)
                 ).astype(jnp.bfloat16),
        "b1":    0.05 * jax.random.normal(kb1, (1, Dh), jnp.float32),
        "w2":   (0.05 * jax.random.normal(k2, (Dh, D), jnp.float32)
                 ).astype(jnp.bfloat16),
        "b2":    0.05 * jax.random.normal(kb2, (1, D), jnp.float32),
    }

    folded = fold_layernorm_affine(params)          # once, eval-mode fold
    y = feed_forward(x, folded, tm=256)
    y = jax.block_until_ready(y)

    y_ref = reference_forward(x, params)
    assert y.shape == (B, S, D)
    yf, rf = y.astype(jnp.float32), y_ref.astype(jnp.float32)
    max_err = float(jnp.max(jnp.abs(yf - rf)))
    # bf16 end-to-end (I/O, LN output, SiLU, hidden) vs f32 reference.
    assert jnp.allclose(yf, rf, atol=7e-2, rtol=7e-2), \
        f"mismatch vs reference (max abs err {max_err})"

    print("KERNEL_OK")
</pallas_src>

<mosaic_0001>
module attributes {stable_mosaic.version = 11 : i64} {
  func.func @_ffn_kernel(%arg0: i32, %arg1: memref<256x128xbf16, #tpu.memory_space<vmem>>, %arg2: memref<128x512xbf16, #tpu.memory_space<vmem>>, %arg3: memref<1x512xf32, #tpu.memory_space<vmem>>, %arg4: memref<512x128xbf16, #tpu.memory_space<vmem>>, %arg5: memref<1x128xf32, #tpu.memory_space<vmem>>, %arg6: memref<256x128xbf16, #tpu.memory_space<vmem>>) attributes {dimension_semantics = [#tpu.dimension_semantics<parallel>], iteration_bounds = array<i64: 2>, scalar_prefetch = 0 : i64, scratch_operands = 0 : i64, tpu.core_type = #tpu.core_type<tc>, window_params = [{transform_indices = @transform_0, window_bounds = array<i64: 256, 128>}, {pipeline_mode = #tpu.pipeline_mode<synchronous>, transform_indices = @transform_1, window_bounds = array<i64: 128, 512>}, {pipeline_mode = #tpu.pipeline_mode<synchronous>, transform_indices = @transform_2, window_bounds = array<i64: 1, 512>}, {pipeline_mode = #tpu.pipeline_mode<synchronous>, transform_indices = @transform_3, window_bounds = array<i64: 512, 128>}, {pipeline_mode = #tpu.pipeline_mode<synchronous>, transform_indices = @transform_4, window_bounds = array<i64: 1, 128>}, {transform_indices = @transform_5, window_bounds = array<i64: 256, 128>}]} {
    %c0 = arith.constant 0 : index
    %c0_0 = arith.constant 0 : index
    %0 = vector.load %arg1[%c0, %c0_0] : memref<256x128xbf16, #tpu.memory_space<vmem>>, vector<256x128xbf16>
    %1 = arith.extf %0 : vector<256x128xbf16> to vector<256x128xf32>
    %cst = arith.constant dense<0.000000e+00> : vector<256xf32>
    %2 = vector.multi_reduction <add>, %1, %cst [1] : vector<256x128xf32> to vector<256xf32>
    %3 = vector.shape_cast %2 : vector<256xf32> to vector<256x1xf32>
    %cst_1 = arith.constant 1.280000e+02 : f32
    %4 = vector.broadcast %cst_1 : f32 to vector<256x1xf32>
    %5 = arith.divf %3, %4 : vector<256x1xf32>
    %6 = arith.mulf %1, %1 : vector<256x128xf32>
    %cst_2 = arith.constant dense<0.000000e+00> : vector<256xf32>
    %7 = vector.multi_reduction <add>, %6, %cst_2 [1] : vector<256x128xf32> to vector<256xf32>
    %8 = vector.shape_cast %7 : vector<256xf32> to vector<256x1xf32>
    %cst_3 = arith.constant 1.280000e+02 : f32
    %9 = vector.broadcast %cst_3 : f32 to vector<256x1xf32>
    %10 = arith.divf %8, %9 : vector<256x1xf32>
    %11 = arith.mulf %5, %5 : vector<256x1xf32>
    %12 = arith.subf %10, %11 : vector<256x1xf32>
    %cst_4 = arith.constant 0.000000e+00 : f32
    %13 = vector.broadcast %cst_4 : f32 to vector<256x1xf32>
    %14 = arith.maximumf %12, %13 : vector<256x1xf32>
    %cst_5 = arith.constant 9.99999974E-6 : f32
    %15 = vector.broadcast %cst_5 : f32 to vector<256x1xf32>
    %16 = arith.addf %14, %15 : vector<256x1xf32>
    %17 = math.rsqrt %16 : vector<256x1xf32>
    %18 = vector.broadcast %5 : vector<256x1xf32> to vector<256x128xf32>
    %19 = arith.subf %1, %18 : vector<256x128xf32>
    %20 = vector.broadcast %17 : vector<256x1xf32> to vector<256x128xf32>
    %21 = arith.mulf %19, %20 : vector<256x128xf32>
    %22 = arith.truncf %21 : vector<256x128xf32> to vector<256x128xbf16>
    %c0_6 = arith.constant 0 : index
    %c0_7 = arith.constant 0 : index
    %23 = vector.load %arg2[%c0_6, %c0_7] : memref<128x512xbf16, #tpu.memory_space<vmem>>, vector<128x512xbf16>
    %cst_8 = arith.constant dense<0.000000e+00> : vector<256x512xf32>
    %24 = tpu.matmul %22, %23, %cst_8 {dimension_numbers = #tpu.dot_dimension_numbers<[1], [0], [0], [1], [0, 0, 1, 1], [], []>} : vector<256x128xbf16>, vector<128x512xbf16>, vector<256x512xf32> -> vector<256x512xf32>
    %c0_9 = arith.constant 0 : index
    %c0_10 = arith.constant 0 : index
    %25 = vector.load %arg3[%c0_9, %c0_10] : memref<1x512xf32, #tpu.memory_space<vmem>>, vector<1x512xf32>
    %26 = vector.broadcast %25 : vector<1x512xf32> to vector<256x512xf32>
    %27 = arith.addf %24, %26 : vector<256x512xf32>
    %28 = arith.truncf %27 : vector<256x512xf32> to vector<256x512xbf16>
    %29 = arith.negf %28 : vector<256x512xbf16>
    %30 = math.exp %29 : vector<256x512xbf16>
    %cst_11 = arith.constant 1.000000e+00 : bf16
    %31 = vector.broadcast %cst_11 : bf16 to vector<256x512xbf16>
    %32 = arith.addf %31, %30 : vector<256x512xbf16>
    %33 = arith.divf %31, %32 : vector<256x512xbf16>
    %34 = arith.mulf %28, %33 : vector<256x512xbf16>
    %c0_12 = arith.constant 0 : index
    %c0_13 = arith.constant 0 : index
    %35 = vector.load %arg4[%c0_12, %c0_13] : memref<512x128xbf16, #tpu.memory_space<vmem>>, vector<512x128xbf16>
    %cst_14 = arith.constant dense<0.000000e+00> : vector<256x128xf32>
    %36 = tpu.matmul %34, %35, %cst_14 {dimension_numbers = #tpu.dot_dimension_numbers<[1], [0], [0], [1], [0, 0, 1, 1], [], []>} : vector<256x512xbf16>, vector<512x128xbf16>, vector<256x128xf32> -> vector<256x128xf32>
    %c0_15 = arith.constant 0 : index
    %c0_16 = arith.constant 0 : index
    %37 = vector.load %arg5[%c0_15, %c0_16] : memref<1x128xf32, #tpu.memory_space<vmem>>, vector<1x128xf32>
    %38 = vector.broadcast %37 : vector<1x128xf32> to vector<256x128xf32>
    %39 = arith.addf %36, %38 : vector<256x128xf32>
    %40 = arith.truncf %39 : vector<256x128xf32> to vector<256x128xbf16>
    %c0_17 = arith.constant 0 : index
    %c0_18 = arith.constant 0 : index
    %41 = vector.load %arg6[%c0_17, %c0_18] : memref<256x128xbf16, #tpu.memory_space<vmem>>, vector<256x128xbf16>
    tpu.vector_store %arg6[%c0_17, %c0_18], %40 {strides = array<i32>} : memref<256x128xbf16, #tpu.memory_space<vmem>>, vector<256x128xbf16>,
    return
  }
  func.func @transform_0(%arg0: i32) -> (i32, i32) {
    %c0_i32 = arith.constant 0 : i32
    %c0_i32_0 = arith.constant 0 : i32
    return %arg0, %c0_i32 : i32, i32
  }
  func.func @transform_1(%arg0: i32) -> (i32, i32) {
    %c0_i32 = arith.constant 0 : i32
    %c0_i32_0 = arith.constant 0 : i32
    %c0_i32_1 = arith.constant 0 : i32
    return %c0_i32, %c0_i32_0 : i32, i32
  }
  func.func @transform_2(%arg0: i32) -> (i32, i32) {
    %c0_i32 = arith.constant 0 : i32
    %c0_i32_0 = arith.constant 0 : i32
    %c0_i32_1 = arith.constant 0 : i32
    return %c0_i32, %c0_i32_0 : i32, i32
  }
  func.func @transform_3(%arg0: i32) -> (i32, i32) {
    %c0_i32 = arith.constant 0 : i32
    %c0_i32_0 = arith.constant 0 : i32
    %c0_i32_1 = arith.constant 0 : i32
    return %c0_i32, %c0_i32_0 : i32, i32
  }
  func.func @transform_4(%arg0: i32) -> (i32, i32) {
    %c0_i32 = arith.constant 0 : i32
    %c0_i32_0 = arith.constant 0 : i32
    %c0_i32_1 = arith.constant 0 : i32
    return %c0_i32, %c0_i32_0 : i32, i32
  }
  func.func @transform_5(%arg0: i32) -> (i32, i32) {
    %c0_i32 = arith.constant 0 : i32
    %c0_i32_0 = arith.constant 0 : i32
    return %arg0, %c0_i32 : i32, i32
  }
}

</mosaic_0001>

<bundles_post_ra>
// kernel: tpu_custom_call.1
= control target key start
LH: loop header
LB: loop body
LE: loop exit
PB: predicated region body
PF: predicated region fallthrough
CT: control target
= control target key end

     0   :  { %10 = vsyncpa [#allocation3], 0  ;;  %s8464_s0 = inlined_call_operand.hbm [shape: bf16[512,128], index: 0, kind: input, shape index: {}]   ;;  %s8465_s1 = inlined_call_operand.hbm [shape: bf16[128,512], index: 1, kind: input, shape index: {}]   ;;  %s8466_s2 = inlined_call_operand.hbm [shape: f32[1,512], index: 2, kind: input, shape index: {}]   ;;  %s8467_s3 = inlined_call_operand.hbm [shape: bf16[512,128], index: 3, kind: input, shape index: {}]   ;;  %s8468_s4 = inlined_call_operand.vmem [shape: f32[1,128], index: 4, kind: input, shape index: {}]   ;;  %s8469_s5 = inlined_call_operand.hbm [shape: bf16[512,128], index: 5, kind: output, shape index: {}]  }
   0x1   :  { %12 = vsyncpa [#allocation3 + $0x1], 0 }
   0x2   :  { %13 = vsyncpa [#allocation6], 0 }
   0x3   :  { %14 = vsyncpa [#allocation9], 0 }
   0x4   :  { %15 = vsyncpa [#allocation4], 0 }
   0x5   :  { %17 = vsyncpa [#allocation4 + $0x1], 0  ;;  %s5687_s18 = smov 0   ;;  %s5689_s19 = smov 0  }
   0x6   :  { %s5691_s20 = smov 0   ;;  %s5693_s21 = smov 0  }
   0x7 LB: > { %s5708_s22 = sadd.s32 4294967295, %s5644_s21   ;;  %s4269_s23 = sadd.s32 4294967294, %s5644_s21   ;;  %s5644_s21 = sphi %s5693_s21, %s9083_s21   ;;  %s5640_s20 = sphi %s5691_s20, %s9082_s20   ;;  %s5636_s19 = sphi %s5689_s19, %s9081_s19   ;;  %s5632_s18 = sphi %s5687_s18, %s9080_s18  }
   0x8   : > { %p43_p0 = scmp.ne.s32.totalorder %s5636_s19, %s5632_s18  ;;  %p44_p1 = scmp.eq.s32.totalorder %s5708_s22, 0 }
   0x9   : > { %p151_p2 = scmp.eq.s32.totalorder %s5708_s22, 1  ;;  %p157_p3 = scmp.eq.s32.totalorder %s4269_s23, 1 }
   0xa   : > { %p5717_p4 = por %p44_p1, %p43_p0  ;;  %p4270_p5 = scmp.ge.s32.totalorder %s5644_s21, 1 }
   0xb   : > { %p5722_p6 = por %p157_p3, %p43_p0  ;;  %p164_p7 = scmp.lt.s32.totalorder %s5644_s21, 3 }
   0xc   : > { %s175_s28 = sshll.u32 %s8465_s1, 4  ;;  %s5646_s30 = smov [#allocation5]   ;;  %s176_s28 = int_to_ptr.hbm [resolvable:$true] %s175_s28 }
   0xd   : > { %p5730_p8 = pnand %p4270_p5, %p164_p7  ;;  %s177_s6 = sshll.u32 %s5646_s30, 4  ;;  %s178_s6 = int_to_ptr.vmem [resolvable:$true] %s177_s6 }
   0xe   : > { %s190_s10 = sshll.u32 %s8466_s2, 4  ;;  %s5647_s11 = smov 256   ;;  %s191_s10 = int_to_ptr.hbm [resolvable:$true] %s190_s10 }
   0xf   : > { %p4801_p9 = pneg %p5730_p8  ;;  %s5648_s12 = smov 16  }
  0x10   : > { %s5649_s13 = smov [#allocation7]   ;;  %s201_s17 = sshll.u32 %s8467_s3, 4  ;;  %s202_s17 = int_to_ptr.hbm [resolvable:$true] %s201_s17 }
  0x11   : > { %p5738_p10 = pnand %p4801_p9, %p44_p1  ;;  %s192_s14 = sshll.u32 %s5649_s13, 4  ;;  %s193_s14 = int_to_ptr.vmem [resolvable:$true] %s192_s14 }
  0x12   : > { %s5650_s23 = smov [#allocation8]   ;;  %s8470_s27 = smov 64  }
  0x13   : > { %4804 = dma.hbm_to_vmem [thread:$0]  (!%p5738_p10), %s176_s28, 4096, %s178_s6, [#allocation6], %s5647_s11, %s5647_s11, %s5648_s12  }
  0x14   : > { %4807 = dma.hbm_to_vmem [thread:$0]  (!%p5738_p10), %s191_s10, 64, %s193_s14, [#allocation6]  }
  0x15   : > { %s203_s26 = sshll.u32 %s5650_s23, 4  ;;  %s5652_s28 = smov 4   ;;  %s204_s26 = int_to_ptr.vmem [resolvable:$true] %s203_s26 }
  0x16   : > { %4810 = dma.hbm_to_vmem [thread:$0]  (!%p5738_p10), %s202_s17, 4096, %s204_s26, [#allocation9], %s8470_s27, %s8470_s27, %s5652_s28  }
  0x17   : > { %s5759_s30 = sadd.s32 1, %s5644_s21   ;;  %s30_s8 = sadd.s32 1, %s5640_s20 }
  0x18   : > { %s27_s6 = ssub.s32 %s5644_s21, %s5759_s30  ;;  %p37_p13 = scmp.ne.s32.totalorder %s5640_s20, %s5636_s19 }
  0x19   : > { %p28_p12 = scmp.eq.s32.totalorder %s27_s6, 0  ;;  %p38_p0 = scmp.eq.s32.totalorder %s5644_s21, 0 }
  0x1a   : > { %p5772_p3 = por %p151_p2, %p37_p13  ;;  %p4822_p5 = scmp.lt.s32.totalorder %s5644_s21, 2 }
  0x1b   : > { %s5768_s9 = scalar_select %p28_p12, %s5640_s20, %s30_s8  }
  0x1c   : > { %s220_s7 = sand.u32 1, %s5640_s20   ;;  %s4545_s11 = sshll.u32 %s5644_s21, 7 }
  0x1d   : > { %p39_p7 = por %p38_p0, %p37_p13  ;;  %s4275_s12 = sshll.u32 %s220_s7, 7 }
  0x1e   : > { %s229_s15 = scalar_lea.hbm %s8464_s0, %s4545_s11  ;;  %s224_s17 = scalar_lea.vmem [#allocation2], %s4275_s12 }
  0x1f   : > { %s230_s16 = sshll.u32 %s229_s15, 4  ;;  %s232_s23 = sshll.u32 %s224_s17, 4  ;;  %s231_s16 = int_to_ptr.hbm [resolvable:$true] %s230_s16  ;;  %s233_s23 = int_to_ptr.vmem [resolvable:$true] %s232_s23 }
  0x20   : > { %p5782_p9 = pnand %p4822_p5, %p39_p7  ;;  %s221_s6 = scalar_lea.sflag [#allocation3], %s220_s7 }
  0x21   : > { %s5540_s8 = sshra.s32 %s231_s16, 4  ;;  %s5547_s12 = scalar_lea.hbm %s8464_s0, 256  ;;  %s5541_s8 = int_to_ptr.hbm [resolvable:$true] %s5540_s8 }
  0x22   : > { %s5542_s27 = scalar_lea.hbm %s5541_s8, 128  ;;  %p5544_p10 = pneg %p5782_p9 }
  0x23   : > { %p5543_p2 = scmp.ne.s32.totalorder %s5541_s8, %s5542_s27  ;;  %p5548_p0 = scmp.lt.s32.totalorder %s5541_s8, %s8464_s0 }
  0x24   : > { %p5549_p5 = scmp.lt.s32.totalorder %s5547_s12, %s5542_s27 }
  0x25   : > { %p5545_p12 = pnand %p5544_p10, %p5543_p2 }
  0x26   : > { %p5550_p7 = por %p5549_p5, %p5548_p0 }
  0x27   : > { %p5546_p13 = pneg %p5545_p12 }
  0x29   : > { %p5551_p11 = pnand %p5550_p7, %p5546_p13 }
  0x2b   : > { %5554 = shalt.err (!%p5551_p11)
}
  0x2c   : > { %s8620_s7 = smov 64   ;;  %244 = sbr.rel (%p5730_p8) target bundleno = 1034 (0x40a), region = 40 }
  0x2d   : > { %4814 = dma.hbm_to_vmem [thread:$0]  (!%p5782_p9), %s231_s16, 2048, %s233_s23, %s221_s6, %s8620_s7, %s8620_s7, %s5652_s28  }
  0x31   : > { %s5802_s17 = sand.u32 1, %s5636_s19  }
  0x32   : > { %s4279_s27 = sshll.u32 %s5802_s17, 7  ;;  %s247_s8 = scalar_lea.sflag [#allocation3], %s5802_s17 }
  0x33   : > { %s5808_s11 = scalar_lea.vmem [#allocation2], %s4279_s27 }
  0x34   : > { %5615 = dma.done.wait (%p5717_p4), %s247_s8, 2048  }
  0x35   : > { %5617 = vsyncadd (%p5717_p4), %s247_s8, 4294965248 }
  0x36   : > { %5619 = dma.done.wait (%p44_p1), [#allocation6], 4160  }
  0x37   : > { %5621 = vsyncadd (%p44_p1), [#allocation6], 4294963136 }
  0x38   : > { %5623 = dma.done.wait (%p44_p1), [#allocation9], 4096  }
  0x39   : > { %5625 = vsyncadd (%p44_p1), [#allocation9], 4294963200  ;;  %v4612_v0 = vld [vmem:[%s5808_s11] sm:$0xff]   ;;  %v4755_v1 = vld [vmem:[%s5808_s11 + $0x8] sm:$0xff]   ;;  %v5653_v46 = vmov 128.0   ;;  %s8115_s28 = scalar_lea.vmem [#allocation10], %s4279_s27 }
  0x3a   : > { %v5824_v2 = vunpack.c.l.bf16 %v4612_v0  ;;  %v5826_v3 = vunpack.c.l.bf16 %v4755_v1  ;;  %v5832_v5 = vunpack.c.h.bf16 %v4612_v0  ;;  %v5834_v6 = vunpack.c.h.bf16 %v4755_v1  ;;  %v4756_v8 = vld [vmem:[%s5808_s11 + $0x10] sm:$0xff]   ;;  %v4757_v14 = vld [vmem:[%s5808_s11 + $0x18] sm:$0xff]   ;;  %v4758_v19 = vld [vmem:[%s5808_s11 + $0x20] sm:$0xff]   ;;  %s4610_s26 = sshll.u32 %s5708_s22, 7  ;;  %s4164_s14 = sshll.u32 %s8115_s28, 4  ;;  %s4165_s14 = int_to_ptr.vmem [resolvable:$true] %s4164_s14 }
  0x3b   : > { %v5843_v10 = vunpack.c.l.bf16 %v4756_v8  ;;  %v5848_v12 = vunpack.c.h.bf16 %v4756_v8  ;;  %v5856_v16 = vunpack.c.l.bf16 %v4757_v14  ;;  %v5860_v18 = vunpack.c.h.bf16 %v4757_v14  ;;  %v4759_v23 = vld [vmem:[%s5808_s11 + $0x28] sm:$0xff]   ;;  %v4760_v30 = vld [vmem:[%s5808_s11 + $0x30] sm:$0xff]   ;;  %v4761_v34 = vld [vmem:[%s5808_s11 + $0x38] sm:$0xff]   ;;  %s4163_s12 = scalar_lea.hbm %s8469_s5, %s4610_s26  ;;  %s4152_s22 = scalar_lea.sflag [#allocation4], %s5802_s17 }
  0x3c   : > { %360 = vadd.xlane.f32.xlu0 %v5824_v2  ;;  %364 = vadd.xlane.f32.xlu2 %v5826_v3  ;;  %v463_v4 = vmul.f32 %v5824_v2, %v5824_v2  ;;  %v464_v7 = vmul.f32 %v5832_v5, %v5832_v5  ;;  %v465_v9 = vmul.f32 %v5826_v3, %v5826_v3  ;;  %v5867_v21 = vunpack.c.h.bf16 %v4758_v19  ;;  %v4762_v38 = vld [vmem:[%s5808_s11 + $0x40] sm:$0xff]   ;;  %v4763_v45 = vld [vmem:[%s5808_s11 + $0x48] sm:$0xff]   ;;  %v4576_v49 = vld [vmem:[#allocation5 + $0xec] sm:$0xf0]  ;;  %s4166_s15 = sshll.u32 %s4163_s12, 4  ;;  %s5590_s24 = scalar_lea.hbm %s8469_s5, 256  ;;  %s4167_s15 = int_to_ptr.hbm [resolvable:$true] %s4166_s15 }
  0x3d   : > { %v466_v11 = vmul.f32 %v5834_v6, %v5834_v6  ;;  %v468_v13 = vmul.f32 %v5848_v12, %v5848_v12  ;;  %v467_v15 = vmul.f32 %v5843_v10, %v5843_v10  ;;  %v469_v17 = vmul.f32 %v5856_v16, %v5856_v16  ;;  %v4398_v48 = vld [vmem:[#allocation5 + $0xe0] sm:$0xf]  ;;  %v4574_v50 = vld [vmem:[#allocation5 + $0xe4] sm:$0xf]  ;;  %v4400_v53 = vld [vmem:[#allocation5 + $0xf0] sm:$0xf0] }
  0x3e   : > { %495 = vadd.xlane.f32.xlu1 %v463_v4  ;;  %v470_v20 = vmul.f32 %v5860_v18, %v5860_v18  ;;  %v5869_v22 = vunpack.c.l.bf16 %v4758_v19  ;;  %v5876_v25 = vunpack.c.l.bf16 %v4759_v23  ;;  %v472_v26 = vmul.f32 %v5867_v21, %v5867_v21  ;;  %v4406_v54 = vld [vmem:[#allocation5 + $0xe8] sm:$0xf]  ;;  %v4577_v55 = vld [vmem:[#allocation5 + $0xf4] sm:$0xf0]  ;;  %v4575_v58 = vld [vmem:[#allocation5 + $0xec] sm:$0xf] }
  0x3f   : > { %v5881_v27 = vunpack.c.h.bf16 %v4759_v23  ;;  %v5889_v31 = vunpack.c.l.bf16 %v4760_v30  ;;  %v5893_v33 = vunpack.c.h.bf16 %v4760_v30  ;;  %v5900_v36 = vunpack.c.h.bf16 %v4761_v34  ;;  %v4408_v59 = vld [vmem:[#allocation5 + $0xf8] sm:$0xf0]  ;;  %v4382_v63 = vld [vmem:[#allocation5 + $0xc0] sm:$0xf]  ;;  %v4572_v0 = vld [vmem:[#allocation5 + $0xcc] sm:$0xf0] }
  0x40   : > { %v471_v24 = vmul.f32 %v5869_v22, %v5869_v22  ;;  %v473_v29 = vmul.f32 %v5876_v25, %v5876_v25  ;;  %v5902_v37 = vunpack.c.l.bf16 %v4761_v34  ;;  %v5909_v40 = vunpack.c.l.bf16 %v4762_v38  ;;  %v4570_v1 = vld [vmem:[#allocation5 + $0xc4] sm:$0xf]  ;;  %v4390_v8 = vld [vmem:[#allocation5 + $0xc8] sm:$0xf]  ;;  %v4366_v23 = vld [vmem:[#allocation5 + $0xa0] sm:$0xf] }
  0x41   : > { %v474_v28 = vmul.f32 %v5881_v27, %v5881_v27  ;;  %v475_v32 = vmul.f32 %v5889_v31, %v5889_v31  ;;  %v476_v35 = vmul.f32 %v5893_v33, %v5893_v33  ;;  %v478_v41 = vmul.f32 %v5900_v36, %v5900_v36  ;;  %v4368_v30 = vld [vmem:[#allocation5 + $0xb0] sm:$0xf0]  ;;  %v4569_v34 = vld [vmem:[#allocation5 + $0xb4] sm:$0xf0]  ;;  %s5584_s7 = sshra.s32 %s4167_s15, 4  ;;  %s5585_s7 = int_to_ptr.hbm [resolvable:$true] %s5584_s7 }
  0x42   : > { %v477_v39 = vmul.f32 %v5902_v37, %v5902_v37  ;;  %v5914_v42 = vunpack.c.h.bf16 %v4762_v38  ;;  %v479_v44 = vmul.f32 %v5909_v40, %v5909_v40  ;;  %4871 = vrcp.f32 %v5653_v46  ;;  %v4350_v46 = vld [vmem:[#allocation5 + $0x80] sm:$0xf]  ;;  %s5586_s27 = scalar_lea.hbm %s5585_s7, 128  ;;  %p5591_p11 = scmp.lt.s32.totalorder %s5585_s7, %s8469_s5 }
  0x43   : > { %v5922_v47 = vunpack.c.l.bf16 %v4763_v45  ;;  %v4399_v52 = vor.u32 %v4576_v49, %v4398_v48  ;;  %v4403_v56 = vor.u32 %v4574_v50, %v4400_v53  ;;  %v4407_v57 = vor.u32 %v4577_v55, %v4406_v54  ;;  %v4564_v48 = vld [vmem:[#allocation5 + $0x8c] sm:$0xf0]  ;;  %v4562_v49 = vld [vmem:[#allocation5 + $0x84] sm:$0xf]  ;;  %v4565_v53 = vld [vmem:[#allocation5 + $0x94] sm:$0xf0]  ;;  %p5587_p1 = scmp.ne.s32.totalorder %s5585_s7, %s5586_s27  ;;  %p5592_p9 = scmp.lt.s32.totalorder %s5590_s24, %s5586_s27 }
  0x44   : > { %362 = vadd.xlane.f32.xlu0 %v5832_v5  ;;  %366 = vadd.xlane.f32.xlu2 %v5834_v6  ;;  %v480_v43 = vmul.f32 %v5914_v42, %v5914_v42  ;;  %v5928_v61 = vunpack.c.h.bf16 %v4763_v45  ;;  %v4411_v62 = vor.u32 %v4575_v58, %v4408_v59  ;;  %v4383_v4 = vor.u32 %v4572_v0, %v4382_v63  ;;  %v4360_v58 = vld [vmem:[#allocation5 + $0x98] sm:$0xf0]  ;;  %v4334_v63 = vld [vmem:[#allocation5 + $0x60] sm:$0xf]  ;;  %v4560_v0 = vld [vmem:[#allocation5 + $0x6c] sm:$0xf0] }
  0x45   : > { %v481_v51 = vmul.f32 %v5922_v47, %v5922_v47  ;;  %1321 = vmatpush.bf16.msra.mxu0 %v4399_v52  ;;  %1410 = vmatpush.bf16.msra.mxu1 %v4403_v56  ;;  %v4351_v50 = vor.u32 %v4564_v48, %v4350_v46  ;;  %v4358_v52 = vld [vmem:[#allocation5 + $0x88] sm:$0xf]  ;;  %p5588_p4 = pnand %p5587_p1, %p5772_p3  ;;  %p5593_p2 = por %p5592_p9, %p5591_p11 }
  0x46   : > { %497 = vadd.xlane.f32.xlu1 %v464_v7  ;;  %1499 = vmatpush.bf16.msra.mxu2 %v4407_v57  ;;  %v4384_v7 = vld [vmem:[#allocation5 + $0xd0] sm:$0xf0]  ;;  %v4359_v56 = vor.u32 %v4565_v53, %v4358_v52  ;;  %v4563_v57 = vld [vmem:[#allocation5 + $0x8c] sm:$0xf]  ;;  %v4552_v52 = vld [vmem:[#allocation5 + $0x2c] sm:$0xf0] }
  0x47   : > { %1588 = vmatpush.bf16.msra.mxu3 %v4411_v62  ;;  %v4363_v62 = vor.u32 %v4563_v57, %v4360_v58  ;;  %v4550_v53 = vld [vmem:[#allocation5 + $0x24] sm:$0xf]  ;;  %v4310_v57 = vld [vmem:[#allocation5 + $0x28] sm:$0xf]  ;;  %v4553_v58 = vld [vmem:[#allocation5 + $0x34] sm:$0xf0]  ;;  %p5589_p8 = pneg %p5588_p4 }
  0x48   : > { %v5926_v60 = vpop.eup %4871 }
  0x49   : > { %1322 = vmatpush.bf16.msra.mxu0 %v4383_v4  ;;  %vm429_vm0 = vweird.f32 %v5926_v60  ;;  %p5594_p10 = pnand %p5593_p2, %p5589_p8 }
  0x4c   : > { %499 = vadd.xlane.f32.xlu0 %v465_v9  ;;  %368 = vadd.xlane.f32.xlu2 %v5843_v10  ;;  %v4573_v9 = vld [vmem:[#allocation5 + $0xd4] sm:$0xf0] }
  0x4d   : > { %v4391_v14 = vor.u32 %v4573_v9, %v4390_v8  ;;  %v4336_v8 = vld [vmem:[#allocation5 + $0x70] sm:$0xf0]  ;;  %v4342_v9 = vld [vmem:[#allocation5 + $0x68] sm:$0xf] }
  0x4e   : > { %501 = vadd.xlane.f32.xlu1 %v466_v11  ;;  %v425_v11 = vmul.f32 128.0, %v5926_v60 }
  0x4f   : > { %1500 = vmatpush.bf16.msra.mxu2 %v4391_v14 }
  0x54   : > { %370 = vadd.xlane.f32.xlu0 %v5848_v12  ;;  %505 = vadd.xlane.f32.xlu2 %v468_v13  ;;  %v4387_v13 = vor.u32 %v4570_v1, %v4384_v7  ;;  %v4558_v1 = vld [vmem:[#allocation5 + $0x64] sm:$0xf]  ;;  %v4335_v7 = vor.u32 %v4560_v0, %v4334_v63  ;;  %v4551_v63 = vld [vmem:[#allocation5 + $0x2c] sm:$0xf]  ;;  %v4312_v0 = vld [vmem:[#allocation5 + $0x38] sm:$0xf0] }
  0x55   : > { %v4339_v14 = vor.u32 %v4558_v1, %v4336_v8  ;;  %v4315_v8 = vor.u32 %v4551_v63, %v4312_v0 }
  0x56   : > { %503 = vadd.xlane.f32.xlu1 %v467_v15  ;;  %v4571_v15 = vld [vmem:[#allocation5 + $0xcc] sm:$0xf]  ;;  %1411 = vmatpush.bf16.msra.mxu1 %v4387_v13 }
  0x5c   : > { %372 = vadd.xlane.f32.xlu0 %v5856_v16  ;;  %507 = vadd.xlane.f32.xlu2 %v469_v17  ;;  %v4392_v17 = vld [vmem:[#allocation5 + $0xd8] sm:$0xf0] }
  0x5d   : > { %v4395_v19 = vor.u32 %v4571_v15, %v4392_v17  ;;  %v4559_v17 = vld [vmem:[#allocation5 + $0x6c] sm:$0xf] }
  0x5e   : > { %374 = vadd.xlane.f32.xlu1 %v5860_v18 }
  0x5f   : > { %1589 = vmatpush.bf16.msra.mxu3 %v4395_v19  ;;  %v4344_v19 = vld [vmem:[#allocation5 + $0x78] sm:$0xf0] }
  0x64   : > { %509 = vadd.xlane.f32.xlu0 %v470_v20  ;;  %378 = vadd.xlane.f32.xlu2 %v5867_v21  ;;  %v4764_v20 = vld [vmem:[%s5808_s11 + $0x50] sm:$0xff]  }
  0x65   : > { %v5939_v59 = vunpack.c.h.bf16 %v4764_v20 }
  0x66   : > { %376 = vadd.xlane.f32.xlu1 %v5869_v22 }
  0x6c   : > { %511 = vadd.xlane.f32.xlu0 %v471_v24  ;;  %380 = vadd.xlane.f32.xlu2 %v5876_v25  ;;  %v4568_v24 = vld [vmem:[#allocation5 + $0xac] sm:$0xf0] }
  0x6e   : > { %513 = vadd.xlane.f32.xlu1 %v472_v26  ;;  %v4566_v26 = vld [vmem:[#allocation5 + $0xa4] sm:$0xf] }
  0x6f   : > { %v4371_v38 = vor.u32 %v4566_v26, %v4368_v30  ;;  %v4556_v26 = vld [vmem:[#allocation5 + $0x4c] sm:$0xf0]  ;;  %v4320_v30 = vld [vmem:[#allocation5 + $0x50] sm:$0xf0] }
  0x71   : > { %1412 = vmatpush.bf16.msra.mxu1 %v4371_v38 }
  0x74   : > { %382 = vadd.xlane.f32.xlu0 %v5881_v27  ;;  %517 = vadd.xlane.f32.xlu2 %v474_v28  ;;  %v482_v28 = vmul.f32 %v5928_v61, %v5928_v61 }
  0x76   : > { %515 = vadd.xlane.f32.xlu1 %v473_v29  ;;  %v4367_v29 = vor.u32 %v4568_v24, %v4366_v23  ;;  %v4347_v23 = vor.u32 %v4559_v17, %v4344_v19  ;;  %v4318_v24 = vld [vmem:[#allocation5 + $0x40] sm:$0xf]  ;;  %v4288_v17 = vld [vmem:[#allocation5 + $0x10] sm:$0xf0]  ;;  %v4294_v19 = vld [vmem:[#allocation5 + $0x8] sm:$0xf] }
  0x78   : > { %1323 = vmatpush.bf16.msra.mxu0 %v4367_v29  ;;  %v4319_v29 = vor.u32 %v4556_v26, %v4318_v24  ;;  %v4547_v26 = vld [vmem:[#allocation5 + $0xc] sm:$0xf] }
  0x7c   : > { %384 = vadd.xlane.f32.xlu0 %v5889_v31  ;;  %519 = vadd.xlane.f32.xlu2 %v475_v32  ;;  %v4374_v32 = vld [vmem:[#allocation5 + $0xa8] sm:$0xf] }
  0x7d   : > { %1324 = vmatpush.bf16.msra.mxu0 %v4351_v50 }
  0x7e   : > { %386 = vadd.xlane.f32.xlu1 %v5893_v33 }
  0x81   : > { %1325 = vmatpush.bf16.msra.mxu0 %v4335_v7  ;;  %v4311_v7 = vor.u32 %v4553_v58, %v4310_v57 }
  0x84   : > { %521 = vadd.xlane.f32.xlu0 %v476_v35  ;;  %390 = vadd.xlane.f32.xlu2 %v5900_v36  ;;  %v426_v35 = vsub.f32 1.0, %v425_v11  ;;  %v4561_v11 = vld [vmem:[#allocation5 + $0x74] sm:$0xf0] }
  0x85   : > { %v4343_v15 = vor.u32 %v4561_v11, %v4342_v9  ;;  %1326 = vmatpush.bf16.msra.mxu0 %v4319_v29  ;;  %v4286_v9 = vld [vmem:[#allocation5] sm:$0xf]  ;;  %v4548_v11 = vld [vmem:[#allocation5 + $0xc] sm:$0xf0] }
  0x86   : > { %388 = vadd.xlane.f32.xlu1 %v5902_v37  ;;  %v427_v54 = vmul.f32 %v5926_v60, %v426_v35 }
  0x88   : > { %v428_v13 = vadd.f32 %v5926_v60, %v427_v54 }
  0x8a   : > { %v5950_v35 = vsel %vm429_vm0, %v5926_v60, %v428_v13  ;;  %v4302_v60 = vld [vmem:[#allocation5 + $0x20] sm:$0xf]  ;;  %v4546_v13 = vld [vmem:[#allocation5 + $0x4] sm:$0xf] }
  0x8c   : > { %523 = vadd.xlane.f32.xlu0 %v477_v39  ;;  %392 = vadd.xlane.f32.xlu2 %v5909_v40  ;;  %v4375_v39 = vor.u32 %v4569_v34, %v4374_v32  ;;  %v4326_v32 = vld [vmem:[#allocation5 + $0x48] sm:$0xf]  ;;  %v4557_v34 = vld [vmem:[#allocation5 + $0x54] sm:$0xf0] }
  0x8e   : > { %525 = vadd.xlane.f32.xlu1 %v478_v41  ;;  %v4567_v41 = vld [vmem:[#allocation5 + $0xac] sm:$0xf]  ;;  %1501 = vmatpush.bf16.msra.mxu2 %v4375_v39  ;;  %v4327_v39 = vor.u32 %v4557_v34, %v4326_v32 }
  0x92   : > { %1502 = vmatpush.bf16.msra.mxu2 %v4359_v56  ;;  %v4304_v56 = vld [vmem:[#allocation5 + $0x30] sm:$0xf0] }
  0x94   : > { %394 = vadd.xlane.f32.xlu0 %v5914_v42  ;;  %529 = vadd.xlane.f32.xlu2 %v480_v43  ;;  %v4376_v43 = vld [vmem:[#allocation5 + $0xb8] sm:$0xf0] }
  0x95   : > { %v4379_v45 = vor.u32 %v4567_v41, %v4376_v43  ;;  %v4555_v41 = vld [vmem:[#allocation5 + $0x4c] sm:$0xf]  ;;  %v4328_v43 = vld [vmem:[#allocation5 + $0x58] sm:$0xf0] }
  0x96   : > { %527 = vadd.xlane.f32.xlu1 %v479_v44  ;;  %v5936_v44 = vunpack.c.l.bf16 %v4764_v20  ;;  %v484_v20 = vmul.f32 %v5939_v59, %v5939_v59  ;;  %1503 = vmatpush.bf16.msra.mxu2 %v4343_v15  ;;  %v4287_v15 = vor.u32 %v4548_v11, %v4286_v9 }
  0x97   : > { %1590 = vmatpush.bf16.msra.mxu3 %v4379_v45  ;;  %v4331_v45 = vor.u32 %v4555_v41, %v4328_v43 }
  0x98   : > { %v483_v4 = vmul.f32 %v5936_v44, %v5936_v44 }
  0x9a   : > { %1504 = vmatpush.bf16.msra.mxu2 %v4327_v39 }
  0x9b   : > { %1591 = vmatpush.bf16.msra.mxu3 %v4363_v62 }
  0x9c   : > { %396 = vadd.xlane.f32.xlu0 %v5922_v47  ;;  %531 = vadd.xlane.f32.xlu2 %v481_v51  ;;  %v4352_v51 = vld [vmem:[#allocation5 + $0x90] sm:$0xf0] }
  0x9d   : > { %v4355_v55 = vor.u32 %v4562_v49, %v4352_v51  ;;  %v4765_v49 = vld [vmem:[%s5808_s11 + $0x58] sm:$0xff]  }
  0x9e   : > { %398 = vadd.xlane.f32.xlu1 %v5928_v61  ;;  %v5956_v51 = vunpack.c.l.bf16 %v4765_v49  ;;  %1505 = vmatpush.bf16.msra.mxu2 %v4311_v7  ;;  %v5962_v29 = vunpack.c.h.bf16 %v4765_v49 }
  0x9f   : > { %1413 = vmatpush.bf16.msra.mxu1 %v4355_v55  ;;  %1592 = vmatpush.bf16.msra.mxu3 %v4347_v23  ;;  %v4303_v55 = vor.u32 %v4552_v52, %v4302_v60  ;;  %v4291_v23 = vor.u32 %v4546_v13, %v4288_v17 }
  0xa0   : > { %v486_v41 = vmul.f32 %v5962_v29, %v5962_v29  ;;  %v485_v43 = vmul.f32 %v5956_v51, %v5956_v51 }
  0xa1   : > { %1327 = vmatpush.bf16.msra.mxu0 %v4303_v55 }
  0xa3   : > { %1414 = vmatpush.bf16.msra.mxu1 %v4339_v14  ;;  %1593 = vmatpush.bf16.msra.mxu3 %v4331_v45 }
  0xa4   : > { %533 = vadd.xlane.f32.xlu0 %v482_v28  ;;  %402 = vadd.xlane.f32.xlu2 %v5939_v59  ;;  %v4554_v28 = vld [vmem:[#allocation5 + $0x44] sm:$0xf] }
  0xa5   : > { %v4323_v38 = vor.u32 %v4554_v28, %v4320_v30  ;;  %v4296_v28 = vld [vmem:[#allocation5 + $0x18] sm:$0xf0]  ;;  %1328 = vmatpush.bf16.msra.mxu0 %v4287_v15 }
  0xa6   : > { %400 = vadd.xlane.f32.xlu1 %v5936_v44 }
  0xa7   : > { %1415 = vmatpush.bf16.msra.mxu1 %v4323_v38  ;;  %1594 = vmatpush.bf16.msra.mxu3 %v4315_v8  ;;  %v4299_v38 = vor.u32 %v4547_v26, %v4296_v28 }
  0xab   : > { %1595 = vmatpush.bf16.msra.mxu3 %v4299_v38 }
  0xac   : > { %535 = vadd.xlane.f32.xlu0 %v483_v4  ;;  %404 = vadd.xlane.f32.xlu2 %v5956_v51  ;;  %v4307_v4 = vor.u32 %v4550_v53, %v4304_v56 }
  0xae   : > { %537 = vadd.xlane.f32.xlu1 %v484_v20  ;;  %1416 = vmatpush.bf16.msra.mxu1 %v4307_v4  ;;  %v4549_v20 = vld [vmem:[#allocation5 + $0x14] sm:$0xf0]  ;;  %v4766_v4 = vld [vmem:[%s5808_s11 + $0x60] sm:$0xff]  }
  0xaf   : > { %v361_v46 = vpop.xlane.xlu0 %360  ;;  %v365_v48 = vpop.xlane.xlu2 %364  ;;  %v4295_v24 = vor.u32 %v4549_v20, %v4294_v19 }
  0xb0   : > { %v5954_v50 = vmul.f32 %v5950_v35, %v361_v46  ;;  %v5975_v49 = vmul.f32 %v5950_v35, %v365_v48 }
  0xb1   : > { %v496_v54 = vpop.xlane.xlu1 %495  ;;  %1506 = vmatpush.bf16.msra.mxu2 %v4295_v24 }
  0xb2   : > { %v591_v62 = vmul.f32 %v5954_v50, %v5954_v50  ;;  %v559_v1 = vmul.f32 %v496_v54, %v5950_v35  ;;  %1417 = vmatpush.bf16.msra.mxu1 %v4291_v23  ;;  %v593_v55 = vmul.f32 %v5975_v49, %v5975_v49 }
  0xb4   : > { %v623_v14 = vsub.f32 %v559_v1, %v591_v62  ;;  %406 = vadd.xlane.f32.xlu0 %v5962_v29  ;;  %541 = vadd.xlane.f32.xlu2 %v486_v41 }
  0xb6   : > { %v655_v30 = vmax.f32 %v623_v14, 0.0  ;;  %539 = vadd.xlane.f32.xlu1 %v485_v43  ;;  %v5999_v14 = vunpack.c.l.bf16 %v4766_v4  ;;  %v6018_v43 = vunpack.c.h.bf16 %v4766_v4 }
  0xb7   : > { %v363_v32 = vpop.xlane.xlu0 %362  ;;  %v367_v34 = vpop.xlane.xlu2 %366 }
  0xb8   : > { %v5965_v39 = vmul.f32 %v5950_v35, %v363_v32  ;;  %v5972_v45 = vadd.f32 1e-05, %v655_v30  ;;  %v5982_v53 = vmul.f32 %v5950_v35, %v367_v34 }
  0xb9   : > { %v498_v46 = vpop.xlane.xlu1 %497 }
  0xba   : > { %v592_v60 = vmul.f32 %v5965_v39, %v5965_v39  ;;  %4873 = vrsqrt.f32 %v5972_v45  ;;  %v560_v52 = vmul.f32 %v498_v46, %v5950_v35  ;;  %v594_v63 = vmul.f32 %v5982_v53, %v5982_v53 }
  0xbb   : > { %vm725_vm2 = vweird.f32 %v5972_v45 }
  0xbc   : > { %v624_v54 = vsub.f32 %v560_v52, %v592_v60  ;;  %408 = vadd.xlane.f32.xlu0 %v5999_v14 }
  0xbe   : > { %v656_v48 = vmax.f32 %v624_v54, 0.0  ;;  %410 = vadd.xlane.f32.xlu1 %v6018_v43 }
  0xbf   : > { %v500_v56 = vpop.xlane.xlu0 %499  ;;  %v369_v57 = vpop.xlane.xlu2 %368 }
  0xc0   : > { %v561_v58 = vmul.f32 %v500_v56, %v5950_v35  ;;  %v5987_v62 = vpop.eup %4873  ;;  %v5991_v0 = vadd.f32 1e-05, %v656_v48  ;;  %v6002_v15 = vmul.f32 %v5950_v35, %v369_v57  ;;  %v487_v56 = vmul.f32 %v5999_v14, %v5999_v14 }
  0xc1   : > { %v502_v1 = vpop.xlane.xlu1 %501  ;;  %v720_v7 = vmul.f32 %v5987_v62, %v5972_v45  ;;  %vm726_vm1 = vweird.f32 %v5987_v62 }
  0xc2   : > { %v625_v8 = vsub.f32 %v561_v58, %v593_v55  ;;  %4875 = vrsqrt.f32 %v5991_v0  ;;  %v562_v9 = vmul.f32 %v502_v1, %v5950_v35  ;;  %v595_v32 = vmul.f32 %v6002_v15, %v6002_v15  ;;  %543 = vadd.xlane.f32.xlu2 %v487_v56  ;;  %vm6048_vm4 = vmor %vm725_vm2, %vm726_vm1 }
  0xc3   : > { %v721_v11 = vmul.f32 %v5987_v62, %v720_v7  ;;  %v488_v58 = vmul.f32 %v6018_v43, %v6018_v43  ;;  %vm735_vm5 = vweird.f32 %v5991_v0  ;;  %v1039_v56 = vsub.f32 %v5824_v2, %v5954_v50 }
  0xc4   : > { %v657_v13 = vmax.f32 %v625_v8, 0.0  ;;  %v626_v17 = vsub.f32 %v562_v9, %v594_v63 }
  0xc5   : > { %v722_v20 = vmul.f32 0.5, %v721_v11  ;;  %545 = vadd.xlane.f32.xlu0 %v488_v58 }
  0xc6   : > { %v6004_v19 = vadd.f32 1e-05, %v657_v13  ;;  %v658_v23 = vmax.f32 %v626_v17, 0.0 }
  0xc7   : > { %v371_v24 = vpop.xlane.xlu0 %370  ;;  %v506_v26 = vpop.xlane.xlu2 %505  ;;  %v723_v52 = vsub.f32 1.5, %v722_v20  ;;  %v4601_v20 = vld [vmem:[#allocation8 + $0xb8] sm:$0xff] }
  0xc8   : > { %4877 = vrsqrt.f32 %v6004_v19  ;;  %v6009_v28 = vmul.f32 %v5950_v35, %v371_v24  ;;  %v6011_v30 = vpop.eup %4875  ;;  %v6015_v34 = vadd.f32 1e-05, %v658_v23  ;;  %v564_v38 = vmul.f32 %v506_v26, %v5950_v35  ;;  %v4585_v23 = vld [vmem:[#allocation8 + $0x38] sm:$0xff]  ;;  %3909 = vmatpush.bf16.msrb.mxu2 %v4601_v20 }
  0xc9   : > { %v504_v41 = vpop.xlane.xlu1 %503  ;;  %v730_v46 = vmul.f32 %v6011_v30, %v5991_v0  ;;  %v724_v7 = vmul.f32 %v5987_v62, %v723_v52  ;;  %vm736_vm3 = vweird.f32 %v6011_v30  ;;  %3731 = vmatpush.bf16.msrb.mxu0 %v4585_v23  ;;  %v4767_v52 = vld [vmem:[%s5808_s11 + $0x68] sm:$0xff]   ;;  %vm745_vm11 = vweird.f32 %v6004_v19 }
  0xca   : > { %v596_v60 = vmul.f32 %v6009_v28, %v6009_v28  ;;  %4879 = vrsqrt.f32 %v6015_v34  ;;  %v563_v54 = vmul.f32 %v504_v41, %v5950_v35  ;;  %v4593_v41 = vld [vmem:[#allocation8 + $0x78] sm:$0xff]  ;;  %vm737_vm6 = vmor %vm735_vm5, %vm736_vm3  ;;  %vm755_vm7 = vweird.f32 %v6015_v34 }
  0xcb   : > { %v731_v55 = vmul.f32 %v6011_v30, %v730_v46  ;;  %v728_v0 = vsel %vm6048_vm4, %v5987_v62, %v724_v7  ;;  %3820 = vmatpush.bf16.msrb.mxu1 %v4593_v41 }
  0xcc   : > { %v628_v48 = vsub.f32 %v564_v38, %v596_v60  ;;  %v627_v57 = vsub.f32 %v563_v54, %v595_v32  ;;  %v4609_v38 = vld [vmem:[#allocation8 + $0xf8] sm:$0xff] }
  0xcd   : > { %v732_v1 = vmul.f32 0.5, %v731_v55  ;;  %3998 = vmatpush.bf16.msrb.mxu3 %v4609_v38 }
  0xce   : > { %v6032_v63 = vpop.eup %4877  ;;  %v660_v4 = vmax.f32 %v628_v48, 0.0  ;;  %v659_v9 = vmax.f32 %v627_v57, 0.0 }
  0xcf   : > { %v740_v8 = vmul.f32 %v6032_v63, %v6004_v19  ;;  %v373_v11 = vpop.xlane.xlu0 %372  ;;  %v733_v13 = vsub.f32 1.5, %v732_v1  ;;  %v508_v48 = vpop.xlane.xlu2 %507  ;;  %v1040_v1 = vsub.f32 %v5832_v5, %v5965_v39  ;;  %vm746_vm9 = vweird.f32 %v6032_v63 }
  0xd0   : > { %v6038_v17 = vadd.f32 1e-05, %v660_v4  ;;  %v6040_v24 = vpop.eup %4879  ;;  %v6044_v26 = vadd.f32 1e-05, %v659_v9  ;;  %v6061_v55 = vmul.f32 %v5950_v35, %v373_v11  ;;  %v565_v7 = vmul.f32 %v508_v48, %v5950_v35  ;;  %vm6128_vm12 = vmor %vm745_vm11, %vm746_vm9 }
  0xd1   : > { %v375_v32 = vpop.xlane.xlu1 %374  ;;  %v734_v60 = vmul.f32 %v6011_v30, %v733_v13  ;;  %v750_v45 = vmul.f32 %v6040_v24, %v6015_v34  ;;  %v741_v54 = vmul.f32 %v6032_v63, %v740_v8  ;;  %v6077_v8 = vunpack.c.l.bf16 %v4767_v52 }
  0xd2   : > { %4881 = vrsqrt.f32 %v6038_v17  ;;  %v6072_v58 = vmul.f32 %v5950_v35, %v375_v32  ;;  %v1071_v9 = vmul.f32 %v1039_v56, %v728_v0  ;;  %v597_v50 = vmul.f32 %v6061_v55, %v6061_v55 }
  0xd3   : > { %4883 = vrsqrt.f32 %v6044_v26  ;;  %v751_v57 = vmul.f32 %v6040_v24, %v750_v45  ;;  %v738_v4 = vsel %vm737_vm6, %v6011_v30, %v734_v60  ;;  %v742_v2 = vmul.f32 0.5, %v741_v54  ;;  %412 = vadd.xlane.f32.xlu1 %v6077_v8 }
  0xd4   : > { %v598_v11 = vmul.f32 %v6072_v58, %v6072_v58  ;;  %v1072_v20 = vmul.f32 %v1040_v1, %v738_v4  ;;  %v629_v46 = vsub.f32 %v565_v7, %v597_v50  ;;  %v6090_v45 = vunpack.c.h.bf16 %v4767_v52 }
  0xd5   : > { %v752_v62 = vmul.f32 0.5, %v751_v57  ;;  %v743_v41 = vsub.f32 1.5, %v742_v2  ;;  %vm756_vm8 = vweird.f32 %v6040_v24  ;;  %v489_v4 = vmul.f32 %v6077_v8, %v6077_v8 }
  0xd6   : > { %v1103_v23 = vpack.c.bf16 %v1072_v20, %v1071_v9  ;;  %8623 = vst [vmem:[#allocation15_spill] sm:$0xff] %v6090_v45  ;;  %414 = vadd.xlane.f32.xlu2 %v6090_v45  ;;  %v661_v1 = vmax.f32 %v629_v46, 0.0  ;;  %v490_v34 = vmul.f32 %v6090_v45, %v6090_v45  ;;  %vm6111_vm10 = vmor %vm755_vm7, %vm756_vm8  ;;  %v1042_v46 = vsub.f32 %v5834_v6, %v5982_v53 }
  0xd7   : > { %v510_v13 = vpop.xlane.xlu0 %509  ;;  %v753_v38 = vsub.f32 1.5, %v752_v62  ;;  %v379_v56 = vpop.xlane.xlu2 %378  ;;  %v744_v52 = vmul.f32 %v6032_v63, %v743_v41  ;;  %547 = vadd.xlane.f32.xlu0 %v489_v4  ;;  %v1041_v41 = vsub.f32 %v5826_v3, %v5975_v49  ;;  %vm775_vm13 = vweird.f32 %v6038_v17 }
  0xd8   : > { %v6085_v5 = vpop.eup %4881  ;;  %v566_v39 = vmul.f32 %v510_v13, %v5950_v35  ;;  %1329 = vmatmul.bf16.vlgmr.msra.gmra.mxu0 %v1103_v23  ;;  %1418 = vmatmul.bf16.vlgmr.msra.gmra.mxu1 %v1103_v23  ;;  %v6107_v9 = vmul.f32 %v5950_v35, %v379_v56  ;;  %v6132_v19 = vadd.f32 1e-05, %v661_v1  ;;  %vm765_vm15 = vweird.f32 %v6044_v26 }
  0xd9   : > { %v6088_v30 = vpop.eup %4883  ;;  %v377_v32 = vpop.xlane.xlu1 %376  ;;  %v770_v54 = vmul.f32 %v6085_v5, %v6038_v17  ;;  %1507 = vmatmul.bf16.vlgmr.msra.gmra.mxu2 %v1103_v23  ;;  %1596 = vmatmul.bf16.vlgmr.msra.gmra.mxu3 %v1103_v23  ;;  %v754_v57 = vmul.f32 %v6040_v24, %v753_v38  ;;  %v4584_v23 = vld [vmem:[#allocation8 + $0x30] sm:$0xff]  ;;  %v748_v6 = vsel %vm6128_vm12, %v6032_v63, %v744_v52  ;;  %vm776_vm14 = vweird.f32 %v6085_v5 }
  0xda   : > { %v630_v60 = vsub.f32 %v566_v39, %v598_v11  ;;  %v760_v48 = vmul.f32 %v6088_v30, %v6044_v26  ;;  %v4768_v11 = vld [vmem:[%s5808_s11 + $0x70] sm:$0xff]   ;;  %3732 = vmatpush.bf16.msrb.mxu0 %v4584_v23  ;;  %v1073_v4 = vmul.f32 %v1041_v41, %v748_v6  ;;  %vm766_vm0 = vweird.f32 %v6088_v30  ;;  %vm6172_vm1 = vmor %vm775_vm13, %vm776_vm14 }
  0xdb   : > { %v771_v62 = vmul.f32 %v6085_v5, %v770_v54  ;;  %v758_v20 = vsel %vm6111_vm10, %v6040_v24, %v754_v57  ;;  %v4600_v39 = vld [vmem:[#allocation8 + $0xb0] sm:$0xff]  ;;  %549 = vadd.xlane.f32.xlu1 %v490_v34  ;;  %v6135_v24 = vmul.f32 %v5950_v35, %v377_v32  ;;  %v6144_v32 = vunpack.c.l.bf16 %v4768_v11  ;;  %vm6183_vm2 = vmor %vm765_vm15, %vm766_vm0 }
  0xdc   : > { %v662_v0 = vmax.f32 %v630_v60, 0.0  ;;  %v761_v7 = vmul.f32 %v6088_v30, %v760_v48  ;;  %v4608_v38 = vld [vmem:[#allocation8 + $0xf0] sm:$0xff]  ;;  %3910 = vmatpush.bf16.msrb.mxu2 %v4600_v39  ;;  %v1074_v53 = vmul.f32 %v1042_v46, %v758_v20  ;;  %v6151_v34 = vunpack.c.h.bf16 %v4768_v11 }
  0xdd   : > { %v772_v54 = vmul.f32 0.5, %v771_v62  ;;  %3999 = vmatpush.bf16.msrb.mxu3 %v4608_v38  ;;  %8628 = vst [vmem:[#allocation16_spill] sm:$0xff] %v6144_v32  ;;  %v599_v56 = vmul.f32 %v6135_v24, %v6135_v24  ;;  %v491_v2 = vmul.f32 %v6144_v32, %v6144_v32  ;;  %vm785_vm5 = vweird.f32 %v6132_v19 }
  0xde   : > { %v6115_v50 = vadd.f32 1e-05, %v662_v0  ;;  %v762_v48 = vmul.f32 0.5, %v761_v7  ;;  %v600_v0 = vmul.f32 %v6107_v9, %v6107_v9  ;;  %416 = vadd.xlane.f32.xlu2 %v6144_v32  ;;  %v1104_v7 = vpack.c.bf16 %v1074_v53, %v1073_v4  ;;  %8629 = vst [vmem:[#allocation17_spill] sm:$0xff] %v6151_v34 }
  0xdf   : > { %v512_v3 = vpop.xlane.xlu0 %511  ;;  %v381_v1 = vpop.xlane.xlu2 %380  ;;  %v773_v63 = vsub.f32 1.5, %v772_v54  ;;  %v492_v11 = vmul.f32 %v6151_v34, %v6151_v34  ;;  %418 = vadd.xlane.f32.xlu0 %v6151_v34  ;;  %v1043_v4 = vsub.f32 %v5843_v10, %v6002_v15 }
  0xe0   : > { %4885 = vrsqrt.f32 %v6115_v50  ;;  %v567_v57 = vmul.f32 %v512_v3, %v5950_v35  ;;  %v763_v52 = vsub.f32 1.5, %v762_v48  ;;  %v4592_v3 = vld [vmem:[#allocation8 + $0x70] sm:$0xff]  ;;  %vm795_vm3 = vweird.f32 %v6115_v50 }
  0xe1   : > { %v514_v13 = vpop.xlane.xlu1 %513  ;;  %4887 = vrsqrt.f32 %v6132_v19  ;;  %v774_v23 = vmul.f32 %v6085_v5, %v773_v63  ;;  %3821 = vmatpush.bf16.msrb.mxu1 %v4592_v3  ;;  %v1044_v63 = vsub.f32 %v5848_v12, %v6009_v28 }
  0xe2   : > { %v568_v49 = vmul.f32 %v514_v13, %v5950_v35  ;;  %v631_v20 = vsub.f32 %v567_v57, %v599_v56  ;;  %v764_v38 = vmul.f32 %v6088_v30, %v763_v52 }
  0xe3   : > { %551 = vadd.xlane.f32.xlu1 %v491_v2  ;;  %v778_v26 = vsel %vm6172_vm1, %v6085_v5, %v774_v23 }
  0xe4   : > { %v632_v62 = vsub.f32 %v568_v49, %v600_v0  ;;  %v663_v48 = vmax.f32 %v631_v20, 0.0  ;;  %v6179_v0 = vmul.f32 %v5950_v35, %v381_v1  ;;  %v768_v1 = vsel %vm6183_vm2, %v6088_v30, %v764_v38 }
  0xe5   : > { %v1075_v5 = vmul.f32 %v1043_v4, %v768_v1  ;;  %v4607_v4 = vld [vmem:[#allocation8 + $0xe8] sm:$0xff] }
  0xe6   : > { %v6155_v13 = vpop.eup %4885  ;;  %v664_v41 = vmax.f32 %v632_v62, 0.0  ;;  %553 = vadd.xlane.f32.xlu2 %v492_v11  ;;  %v4769_v62 = vld [vmem:[%s5808_s11 + $0x78] sm:$0xff]   ;;  %v601_v2 = vmul.f32 %v6179_v0, %v6179_v0  ;;  %v1076_v11 = vmul.f32 %v1044_v63, %v778_v26  ;;  %v4583_v26 = vld [vmem:[#allocation8 + $0x28] sm:$0xff]  ;;  %4000 = vmatpush.bf16.msrb.mxu3 %v4607_v4 }
  0xe7   : > { %v6162_v39 = vpop.eup %4887  ;;  %v383_v46 = vpop.xlane.xlu0 %382  ;;  %v790_v54 = vmul.f32 %v6155_v13, %v6115_v50  ;;  %v6216_v28 = vunpack.c.l.bf16 %v4769_v62  ;;  %vm796_vm4 = vweird.f32 %v6155_v13  ;;  %3733 = vmatpush.bf16.msrb.mxu0 %v4583_v26 }
  0xe8   : > { %1334 = vmatmul.bf16.gmra.mxu0 %v1104_v7  ;;  %1423 = vmatmul.bf16.gmra.mxu1 %v1104_v7  ;;  %v780_v17 = vmul.f32 %v6162_v39, %v6132_v19  ;;  %v6189_v49 = vadd.f32 1e-05, %v664_v41  ;;  %v6192_v53 = vmul.f32 %v5950_v35, %v383_v46  ;;  %v518_v56 = vpop.xlane.xlu2 %517  ;;  %v6220_v46 = vunpack.c.h.bf16 %v4769_v62  ;;  %vm6245_vm7 = vmor %vm795_vm3, %vm796_vm4  ;;  %v4591_v19 = vld [vmem:[#allocation8 + $0x68] sm:$0xff] }
  0xe9   : > { %1512 = vmatmul.bf16.gmra.mxu2 %v1104_v7  ;;  %1601 = vmatmul.bf16.gmra.mxu3 %v1104_v7  ;;  %v516_v57 = vpop.xlane.xlu1 %515  ;;  %v791_v52 = vmul.f32 %v6155_v13, %v790_v54  ;;  %v6206_v7 = vadd.f32 1e-05, %v663_v48  ;;  %v570_v12 = vmul.f32 %v518_v56, %v5950_v35  ;;  %8634 = vst [vmem:[#allocation18_spill] sm:$0xff] %v6216_v28  ;;  %vm786_vm6 = vweird.f32 %v6162_v39 }
  0xea   : > { %v781_v30 = vmul.f32 %v6162_v39, %v780_v17  ;;  %v569_v20 = vmul.f32 %v516_v57, %v5950_v35  ;;  %4889 = vrsqrt.f32 %v6189_v49  ;;  %v602_v10 = vmul.f32 %v6192_v53, %v6192_v53  ;;  %420 = vadd.xlane.f32.xlu0 %v6216_v28  ;;  %8635 = vst [vmem:[#allocation19_spill] sm:$0xff] %v6220_v46  ;;  %v4599_v17 = vld [vmem:[#allocation8 + $0xa8] sm:$0xff]  ;;  %vm6259_vm8 = vmor %vm785_vm5, %vm786_vm6 }
  0xeb   : > { %v792_v23 = vmul.f32 0.5, %v791_v52  ;;  %4891 = vrsqrt.f32 %v6206_v7  ;;  %v1105_v54 = vpack.c.bf16 %v1076_v11, %v1075_v5  ;;  %422 = vadd.xlane.f32.xlu1 %v6220_v46  ;;  %3911 = vmatpush.bf16.msrb.mxu2 %v4599_v17  ;;  %v494_v5 = vmul.f32 %v6220_v46, %v6220_v46 }
  0xec   : > { %v782_v38 = vmul.f32 0.5, %v781_v30  ;;  %v633_v41 = vsub.f32 %v569_v20, %v601_v2  ;;  %v634_v60 = vsub.f32 %v570_v12, %v602_v10  ;;  %v493_v2 = vmul.f32 %v6216_v28, %v6216_v28  ;;  %3822 = vmatpush.bf16.msrb.mxu1 %v4591_v19 }
  0xed   : > { %v793_v6 = vsub.f32 1.5, %v792_v23  ;;  %vm815_vm9 = vweird.f32 %v6189_v49  ;;  %vm805_vm11 = vweird.f32 %v6206_v7 }
  0xee   : > { %v783_v57 = vsub.f32 1.5, %v782_v38  ;;  %v665_v1 = vmax.f32 %v633_v41, 0.0  ;;  %v666_v52 = vmax.f32 %v634_v60, 0.0  ;;  %555 = vadd.xlane.f32.xlu2 %v493_v2 }
  0xef   : > { %v385_v15 = vpop.xlane.xlu0 %384  ;;  %v794_v30 = vmul.f32 %v6155_v13, %v793_v6 }
  0xf0   : > { %v520_v3 = vpop.xlane.xlu2 %519  ;;  %v6223_v56 = vpop.eup %4889  ;;  %v6231_v62 = vmul.f32 %v5950_v35, %v385_v15  ;;  %v784_v15 = vmul.f32 %v6162_v39, %v783_v57  ;;  %v6255_v38 = vadd.f32 1e-05, %v665_v1  ;;  %v6263_v41 = vadd.f32 1e-05, %v666_v52 }
  0xf1   : > { %v387_v48 = vpop.xlane.xlu1 %386  ;;  %v6227_v63 = vpop.eup %4891  ;;  %v810_v20 = vmul.f32 %v6223_v56, %v6189_v49  ;;  %v798_v57 = vsel %vm6245_vm7, %v6155_v13, %v794_v30  ;;  %v1046_v1 = vsub.f32 %v5860_v18, %v6072_v58  ;;  %v1045_v13 = vsub.f32 %v5856_v16, %v6061_v55 }
  0xf2   : > { %v6250_v10 = vmul.f32 %v5950_v35, %v387_v48  ;;  %v800_v23 = vmul.f32 %v6227_v63, %v6206_v7  ;;  %557 = vadd.xlane.f32.xlu0 %v494_v5  ;;  %v603_v60 = vmul.f32 %v6231_v62, %v6231_v62  ;;  %4893 = vrsqrt.f32 %v6255_v38 }
  0xf3   : > { %v811_v17 = vmul.f32 %v6223_v56, %v810_v20  ;;  %4895 = vrsqrt.f32 %v6263_v41  ;;  %v1078_v58 = vmul.f32 %v1046_v1, %v798_v57  ;;  %vm816_vm10 = vweird.f32 %v6223_v56 }
  0xf4   : > { %v604_v26 = vmul.f32 %v6250_v10, %v6250_v10  ;;  %v801_v52 = vmul.f32 %v6227_v63, %v800_v23  ;;  %vm806_vm12 = vweird.f32 %v6227_v63  ;;  %vm6305_vm13 = vmor %vm815_vm9, %vm816_vm10  ;;  %vm825_vm15 = vweird.f32 %v6255_v38 }
  0xf5   : > { %v812_v2 = vmul.f32 0.5, %v811_v17  ;;  %vm6317_vm14 = vmor %vm805_vm11, %vm806_vm12  ;;  %vm835_vm1 = vweird.f32 %v6263_v41 }
  0xf6   : > { %v802_v11 = vmul.f32 0.5, %v801_v52  ;;  %v1048_v52 = vsub.f32 %v5867_v21, %v6107_v9 }
  0xf7   : > { %v522_v12 = vpop.xlane.xlu0 %521 }
  0xf8   : > { %1339 = vmatmul.bf16.gmra.mxu0 %v1105_v54  ;;  %1428 = vmatmul.bf16.gmra.mxu1 %v1105_v54  ;;  %v391_v6 = vpop.xlane.xlu2 %390  ;;  %v572_v4 = vmul.f32 %v522_v12, %v5950_v35  ;;  %v6287_v28 = vpop.eup %4893  ;;  %v803_v55 = vsub.f32 1.5, %v802_v11 }
  0xf9   : > { %1517 = vmatmul.bf16.gmra.mxu2 %v1105_v54  ;;  %1606 = vmatmul.bf16.gmra.mxu3 %v1105_v54  ;;  %v571_v54 = vmul.f32 %v520_v3, %v5950_v35  ;;  %v389_v48 = vpop.xlane.xlu1 %388  ;;  %v788_v3 = vsel %vm6259_vm8, %v6162_v39, %v784_v15  ;;  %v813_v39 = vsub.f32 1.5, %v812_v2  ;;  %v6289_v15 = vpop.eup %4895  ;;  %vm826_vm0 = vweird.f32 %v6287_v28 }
  0xfa   : > { %v636_v30 = vsub.f32 %v572_v4, %v604_v26  ;;  %v1077_v20 = vmul.f32 %v1045_v13, %v788_v3  ;;  %v830_v57 = vmul.f32 %v6289_v15, %v6263_v41  ;;  %v6303_v49 = vmul.f32 %v5950_v35, %v389_v48  ;;  %v4598_v3 = vld [vmem:[#allocation8 + $0xa0] sm:$0xff]  ;;  %vm6357_vm3 = vmor %vm825_vm15, %vm826_vm0 }
  0xfb   : > { %v635_v18 = vsub.f32 %v571_v54, %v603_v60  ;;  %v820_v60 = vmul.f32 %v6287_v28, %v6255_v38  ;;  %v814_v17 = vmul.f32 %v6223_v56, %v813_v39  ;;  %v804_v26 = vmul.f32 %v6227_v63, %v803_v55  ;;  %3912 = vmatpush.bf16.msrb.mxu2 %v4598_v3 }
  0xfc   : > { %v1106_v23 = vpack.c.bf16 %v1078_v58, %v1077_v20  ;;  %v668_v50 = vmax.f32 %v636_v30, 0.0  ;;  %v6313_v4 = vmul.f32 %v5950_v35, %v391_v6  ;;  %v831_v13 = vmul.f32 %v6289_v15, %v830_v57 }
  0xfd   : > { %v667_v12 = vmax.f32 %v635_v18, 0.0  ;;  %v821_v48 = vmul.f32 %v6287_v28, %v820_v60  ;;  %v605_v18 = vmul.f32 %v6303_v49, %v6303_v49  ;;  %v818_v6 = vsel %vm6305_vm13, %v6223_v56, %v814_v17 }
  0xfe   : > { %v6309_v7 = vadd.f32 1e-05, %v668_v50  ;;  %v606_v2 = vmul.f32 %v6313_v4, %v6313_v4  ;;  %v808_v20 = vsel %vm6317_vm14, %v6227_v63, %v804_v26  ;;  %vm836_vm2 = vweird.f32 %v6289_v15 }
  0xff   : > { %v524_v5 = vpop.xlane.xlu0 %523  ;;  %v6296_v54 = vadd.f32 1e-05, %v667_v12  ;;  %v822_v11 = vmul.f32 0.5, %v821_v48  ;;  %v1080_v12 = vmul.f32 %v1048_v52, %v818_v6  ;;  %v4582_v48 = vld [vmem:[#allocation8 + $0x20] sm:$0xff]  ;;  %vm6370_vm4 = vmor %vm835_vm1, %vm836_vm2  ;;  %v1050_v41 = vsub.f32 %v5881_v27, %v6192_v53 }
 0x100   : > { %v6285_v46 = vpop.xlane.xlu2 %392  ;;  %v573_v58 = vmul.f32 %v524_v5, %v5950_v35  ;;  %v1047_v5 = vsub.f32 %v5869_v22, %v6135_v24  ;;  %3734 = vmatpush.bf16.msrb.mxu0 %v4582_v48  ;;  %vm855_vm7 = vweird.f32 %v6309_v7 }
 0x101   : > { %v526_v16 = vpop.xlane.xlu1 %525  ;;  %4897 = vrsqrt.f32 %v6296_v54  ;;  %v823_v57 = vsub.f32 1.5, %v822_v11  ;;  %v6377_v11 = vmul.f32 %v5950_v35, %v6285_v46  ;;  %vm845_vm5 = vweird.f32 %v6296_v54 }
 0x102   : > { %4899 = vrsqrt.f32 %v6309_v7  ;;  %v574_v30 = vmul.f32 %v526_v16, %v5950_v35  ;;  %v637_v56 = vsub.f32 %v573_v58, %v605_v18  ;;  %v1079_v50 = vmul.f32 %v1047_v5, %v808_v20  ;;  %v4590_v58 = vld [vmem:[#allocation8 + $0x60] sm:$0xff] }
 0x103   : > { %v824_v18 = vmul.f32 %v6287_v28, %v823_v57  ;;  %3823 = vmatpush.bf16.msrb.mxu1 %v4590_v58  ;;  %v607_v27 = vmul.f32 %v6377_v11, %v6377_v11 }
 0x104   : > { %v638_v60 = vsub.f32 %v574_v30, %v606_v2  ;;  %v1107_v16 = vpack.c.bf16 %v1080_v12, %v1079_v50  ;;  %v669_v34 = vmax.f32 %v637_v56, 0.0  ;;  %v1049_v12 = vsub.f32 %v5876_v25, %v6179_v0 }
 0x106   : > { %v670_v52 = vmax.f32 %v638_v60, 0.0  ;;  %v6361_v30 = vadd.f32 1e-05, %v669_v34 }
 0x107   : > { %v395_v1 = vpop.xlane.xlu0 %394  ;;  %v6339_v39 = vpop.eup %4897 }
 0x108   : > { %1344 = vmatmul.bf16.gmra.mxu0 %v1106_v23  ;;  %1433 = vmatmul.bf16.gmra.mxu1 %v1106_v23  ;;  %v530_v21 = vpop.xlane.xlu2 %529  ;;  %v6341_v17 = vpop.eup %4899  ;;  %v840_v22 = vmul.f32 %v6339_v39, %v6296_v54  ;;  %v6364_v20 = vmul.f32 %v5950_v35, %v395_v1  ;;  %v6380_v1 = vadd.f32 1e-05, %v670_v52  ;;  %4901 = vrsqrt.f32 %v6361_v30 }
 0x109   : > { %1522 = vmatmul.bf16.gmra.mxu2 %v1106_v23  ;;  %1611 = vmatmul.bf16.gmra.mxu3 %v1106_v23  ;;  %v528_v9 = vpop.xlane.xlu1 %527  ;;  %v832_v23 = vmul.f32 0.5, %v831_v13  ;;  %v850_v26 = vmul.f32 %v6341_v17, %v6309_v7  ;;  %v4606_v13 = vld [vmem:[#allocation8 + $0xe0] sm:$0xff]  ;;  %v576_v50 = vmul.f32 %v530_v21, %v5950_v35  ;;  %vm846_vm6 = vweird.f32 %v6339_v39 }
 0x10a   : > { %v841_v38 = vmul.f32 %v6339_v39, %v840_v22  ;;  %4001 = vmatpush.bf16.msrb.mxu3 %v4606_v13  ;;  %v608_v46 = vmul.f32 %v6364_v20, %v6364_v20  ;;  %v575_v0 = vmul.f32 %v528_v9, %v5950_v35  ;;  %4903 = vrsqrt.f32 %v6380_v1  ;;  %vm6430_vm9 = vmor %vm845_vm5, %vm846_vm6 }
 0x10b   : > { %v833_v19 = vsub.f32 1.5, %v832_v23  ;;  %v851_v34 = vmul.f32 %v6341_v17, %v850_v26  ;;  %v828_v23 = vsel %vm6357_vm3, %v6287_v28, %v824_v18  ;;  %vm856_vm8 = vweird.f32 %v6341_v17 }
 0x10c   : > { %v842_v25 = vmul.f32 0.5, %v841_v38  ;;  %v639_v52 = vsub.f32 %v575_v0, %v607_v27  ;;  %vm6442_vm10 = vmor %vm855_vm7, %vm856_vm8  ;;  %vm865_vm11 = vweird.f32 %v6361_v30  ;;  %vm875_vm13 = vweird.f32 %v6380_v1 }
 0x10d   : > { %v834_v6 = vmul.f32 %v6289_v15, %v833_v19  ;;  %v1081_v19 = vmul.f32 %v1049_v12, %v828_v23 }
 0x10e   : > { %v843_v26 = vsub.f32 1.5, %v842_v25 }
 0x10f   : > { %v397_v55 = vpop.xlane.xlu0 %396  ;;  %v838_v60 = vsel %vm6370_vm4, %v6289_v15, %v834_v6  ;;  %v640_v15 = vsub.f32 %v576_v50, %v608_v46 }
 0x110   : > { %v532_v63 = vpop.xlane.xlu2 %531  ;;  %v6400_v53 = vmul.f32 %v5950_v35, %v397_v55  ;;  %v1082_v22 = vmul.f32 %v1050_v41, %v838_v60  ;;  %v6409_v55 = vpop.eup %4901  ;;  %v844_v5 = vmul.f32 %v6339_v39, %v843_v26 }
 0x111   : > { %v399_v24 = vpop.xlane.xlu1 %398  ;;  %v577_v9 = vmul.f32 %v532_v63, %v5950_v35  ;;  %v6419_v2 = vpop.eup %4903  ;;  %v672_v63 = vmax.f32 %v640_v15, 0.0  ;;  %v860_v38 = vmul.f32 %v6409_v55, %v6361_v30  ;;  %vm866_vm12 = vweird.f32 %v6409_v55 }
 0x112   : > { %v6404_v21 = vmul.f32 %v5950_v35, %v399_v24  ;;  %v609_v3 = vmul.f32 %v6400_v53, %v6400_v53  ;;  %v1108_v24 = vpack.c.bf16 %v1082_v22, %v1081_v19  ;;  %v870_v54 = vmul.f32 %v6419_v2, %v6380_v1  ;;  %vm6507_vm15 = vmor %vm865_vm11, %vm866_vm12 }
 0x113   : > { %v6455_v7 = vadd.f32 1e-05, %v672_v63  ;;  %v848_v15 = vsel %vm6430_vm9, %v6339_v39, %v844_v5  ;;  %vm876_vm14 = vweird.f32 %v6419_v2 }
 0x114   : > { %v610_v13 = vmul.f32 %v6404_v21, %v6404_v21  ;;  %v641_v12 = vsub.f32 %v577_v9, %v609_v3  ;;  %vm6530_vm0 = vmor %vm875_vm13, %vm876_vm14 }
 0x115   : > { %4905 = vrsqrt.f32 %v6455_v7  ;;  %vm895_vm1 = vweird.f32 %v6455_v7 }
 0x116   : > { %v673_v22 = vmax.f32 %v641_v12, 0.0 }
 0x117   : > { %v534_v56 = vpop.xlane.xlu0 %533 }
 0x118   : > { %1349 = vmatmul.bf16.gmra.mxu0 %v1107_v16  ;;  %1438 = vmatmul.bf16.gmra.mxu1 %v1107_v16  ;;  %v403_v57 = vpop.xlane.xlu2 %402  ;;  %v578_v18 = vmul.f32 %v534_v56, %v5950_v35  ;;  %v6472_v39 = vadd.f32 1e-05, %v673_v22 }
 0x119   : > { %1527 = vmatmul.bf16.gmra.mxu2 %v1107_v16  ;;  %1616 = vmatmul.bf16.gmra.mxu3 %v1107_v16  ;;  %v401_v28 = vpop.xlane.xlu1 %400  ;;  %v852_v16 = vmul.f32 0.5, %v851_v34  ;;  %v671_v34 = vmax.f32 %v639_v52, 0.0  ;;  %v6436_v50 = vmul.f32 %v5950_v35, %v403_v57  ;;  %v1052_v57 = vsub.f32 %v5893_v33, %v6250_v10 }
 0x11a   : > { %v6417_v58 = vmul.f32 %v5950_v35, %v401_v28  ;;  %v642_v46 = vsub.f32 %v578_v18, %v610_v13  ;;  %v1051_v28 = vsub.f32 %v5889_v31, %v6231_v62  ;;  %v871_v62 = vmul.f32 %v6419_v2, %v870_v54 }
 0x11b   : > { %v853_v48 = vsub.f32 1.5, %v852_v16  ;;  %v861_v16 = vmul.f32 %v6409_v55, %v860_v38  ;;  %v6458_v19 = vadd.f32 1e-05, %v671_v34  ;;  %v612_v31 = vmul.f32 %v6436_v50, %v6436_v50 }
 0x11c   : > { %v611_v25 = vmul.f32 %v6417_v58, %v6417_v58  ;;  %v674_v26 = vmax.f32 %v642_v46, 0.0  ;;  %v1083_v9 = vmul.f32 %v1051_v28, %v848_v15  ;;  %vm905_vm7 = vweird.f32 %v6472_v39 }
 0x11d   : > { %v854_v56 = vmul.f32 %v6341_v17, %v853_v48  ;;  %v862_v48 = vmul.f32 0.5, %v861_v16  ;;  %4907 = vrsqrt.f32 %v6458_v19  ;;  %vm885_vm3 = vweird.f32 %v6458_v19 }
 0x11e   : > { %v6474_v18 = vadd.f32 1e-05, %v674_v26  ;;  %4909 = vrsqrt.f32 %v6472_v39 }
 0x11f   : > { %v536_v6 = vpop.xlane.xlu0 %535  ;;  %v858_v52 = vsel %vm6442_vm10, %v6341_v17, %v854_v56  ;;  %v863_v12 = vsub.f32 1.5, %v862_v48  ;;  %v6485_v56 = vpop.eup %4905 }
 0x120   : > { %v405_v41 = vpop.xlane.xlu2 %404  ;;  %v579_v27 = vmul.f32 %v536_v6, %v5950_v35  ;;  %v1084_v13 = vmul.f32 %v1052_v57, %v858_v52  ;;  %v872_v6 = vmul.f32 0.5, %v871_v62  ;;  %4911 = vrsqrt.f32 %v6474_v18 }
 0x121   : > { %v538_v0 = vpop.xlane.xlu1 %537  ;;  %v6480_v5 = vmul.f32 %v5950_v35, %v405_v41  ;;  %v864_v16 = vmul.f32 %v6409_v55, %v863_v12  ;;  %v890_v22 = vmul.f32 %v6485_v56, %v6455_v7  ;;  %vm896_vm2 = vweird.f32 %v6485_v56 }
 0x122   : > { %v580_v33 = vmul.f32 %v538_v0, %v5950_v35  ;;  %v643_v10 = vsub.f32 %v579_v27, %v611_v25  ;;  %v1109_v23 = vpack.c.bf16 %v1084_v13, %v1083_v9  ;;  %v873_v25 = vsub.f32 1.5, %v872_v6  ;;  %vm6584_vm5 = vmor %vm895_vm1, %vm896_vm2 }
 0x123   : > { %v6491_v54 = vpop.eup %4907  ;;  %v613_v0 = vmul.f32 %v6480_v5, %v6480_v5  ;;  %v1054_v9 = vsub.f32 %v5900_v36, %v6313_v4  ;;  %v891_v6 = vmul.f32 %v6485_v56, %v890_v22  ;;  %vm915_vm9 = vweird.f32 %v6474_v18 }
 0x124   : > { %v644_v17 = vsub.f32 %v580_v33, %v612_v31  ;;  %v675_v63 = vmax.f32 %v643_v10, 0.0  ;;  %v880_v26 = vmul.f32 %v6491_v54, %v6458_v19  ;;  %v6515_v33 = vpop.eup %4909  ;;  %v874_v62 = vmul.f32 %v6419_v2, %v873_v25 }
 0x125   : > { %v900_v1 = vmul.f32 %v6515_v33, %v6472_v39  ;;  %vm886_vm4 = vweird.f32 %v6491_v54  ;;  %vm906_vm8 = vweird.f32 %v6515_v33 }
 0x126   : > { %v676_v46 = vmax.f32 %v644_v17, 0.0  ;;  %v6493_v27 = vadd.f32 1e-05, %v675_v63  ;;  %v1053_v17 = vsub.f32 %v5902_v37, %v6303_v49  ;;  %v868_v63 = vsel %vm6507_vm15, %v6409_v55, %v864_v16  ;;  %vm6589_vm6 = vmor %vm885_vm3, %vm886_vm4 }
 0x127   : > { %v407_v3 = vpop.xlane.xlu0 %406  ;;  %v881_v4 = vmul.f32 %v6491_v54, %v880_v26  ;;  %v878_v49 = vsel %vm6530_vm0, %v6419_v2, %v874_v62  ;;  %v901_v2 = vmul.f32 %v6515_v33, %v900_v1  ;;  %vm6617_vm11 = vmor %vm905_vm7, %vm906_vm8 }
 0x128   : > { %1354 = vmatmul.bf16.gmra.mxu0 %v1108_v24  ;;  %1443 = vmatmul.bf16.gmra.mxu1 %v1108_v24  ;;  %v542_v38 = vpop.xlane.xlu2 %541  ;;  %v6513_v52 = vadd.f32 1e-05, %v676_v46  ;;  %4913 = vrsqrt.f32 %v6493_v27  ;;  %v1085_v25 = vmul.f32 %v1053_v17, %v868_v63  ;;  %v1086_v16 = vmul.f32 %v1054_v9, %v878_v49 }
 0x129   : > { %1532 = vmatmul.bf16.gmra.mxu2 %v1108_v24  ;;  %1621 = vmatmul.bf16.gmra.mxu3 %v1108_v24  ;;  %v6477_v24 = vmul.f32 %v5950_v35, %v407_v3  ;;  %v540_v34 = vpop.xlane.xlu1 %539  ;;  %v582_v41 = vmul.f32 %v542_v38, %v5950_v35  ;;  %v6522_v3 = vpop.eup %4911  ;;  %v902_v9 = vmul.f32 0.5, %v901_v2  ;;  %v1056_v2 = vsub.f32 %v5914_v42, %v6364_v20 }
 0x12a   : > { %v581_v28 = vmul.f32 %v540_v34, %v5950_v35  ;;  %4915 = vrsqrt.f32 %v6513_v52  ;;  %v910_v37 = vmul.f32 %v6522_v3, %v6474_v18  ;;  %vm916_vm10 = vweird.f32 %v6522_v3 }
 0x12b   : > { %v614_v60 = vmul.f32 %v6477_v24, %v6477_v24  ;;  %v903_v19 = vsub.f32 1.5, %v902_v9  ;;  %vm6629_vm12 = vmor %vm915_vm9, %vm916_vm10  ;;  %vm925_vm13 = vweird.f32 %v6493_v27  ;;  %vm935_vm0 = vweird.f32 %v6513_v52 }
 0x12c   : > { %v645_v10 = vsub.f32 %v581_v28, %v613_v0  ;;  %v911_v15 = vmul.f32 %v6522_v3, %v910_v37 }
 0x12d   : > { %v646_v31 = vsub.f32 %v582_v41, %v614_v60  ;;  %v892_v41 = vmul.f32 0.5, %v891_v6  ;;  %v1110_v6 = vpack.c.bf16 %v1086_v16, %v1085_v25 }
 0x12e   : > { %v677_v34 = vmax.f32 %v645_v10, 0.0  ;;  %v6555_v60 = vpop.eup %4913  ;;  %v912_v63 = vmul.f32 0.5, %v911_v15  ;;  %v904_v15 = vmul.f32 %v6515_v33, %v903_v19  ;;  %v1060_v19 = vsub.f32 %v5939_v59, %v6436_v50  ;;  %v4597_v59 = vld [vmem:[#allocation8 + $0x98] sm:$0xff] }
 0x12f   : > { %v409_v57 = vpop.xlane.xlu0 %408  ;;  %v678_v38 = vmax.f32 %v646_v31, 0.0  ;;  %v920_v10 = vmul.f32 %v6555_v60, %v6493_v27  ;;  %v893_v48 = vsub.f32 1.5, %v892_v41  ;;  %vm926_vm14 = vweird.f32 %v6555_v60  ;;  %3913 = vmatpush.bf16.msrb.mxu2 %v4597_v59 }
 0x130   : > { %v6520_v30 = vmul.f32 %v5950_v35, %v409_v57  ;;  %v882_v57 = vmul.f32 0.5, %v881_v4  ;;  %v6564_v26 = vadd.f32 1e-05, %v677_v34  ;;  %v6566_v62 = vpop.eup %4915  ;;  %v1059_v27 = vsub.f32 %v5936_v44, %v6417_v58  ;;  %vm6661_vm15 = vmor %vm925_vm13, %vm926_vm14 }
 0x131   : > { %v411_v13 = vpop.xlane.xlu1 %410  ;;  %v6561_v22 = vadd.f32 1e-05, %v678_v38  ;;  %v930_v4 = vmul.f32 %v6566_v62, %v6513_v52  ;;  %v921_v38 = vmul.f32 %v6555_v60, %v920_v10  ;;  %v894_v49 = vmul.f32 %v6485_v56, %v893_v48 }
 0x132   : > { %v6541_v36 = vmul.f32 %v5950_v35, %v411_v13  ;;  %v615_v55 = vmul.f32 %v6520_v30, %v6520_v30  ;;  %v883_v17 = vsub.f32 1.5, %v882_v57  ;;  %v1058_v10 = vsub.f32 %v5928_v61, %v6404_v21 }
 0x133   : > { %4917 = vrsqrt.f32 %v6561_v22  ;;  %v908_v61 = vsel %vm6617_vm11, %v6515_v33, %v904_v15  ;;  %vm936_vm1 = vweird.f32 %v6566_v62  ;;  %vm945_vm3 = vweird.f32 %v6564_v26 }
 0x134   : > { %v616_v0 = vmul.f32 %v6541_v36, %v6541_v36  ;;  %4919 = vrsqrt.f32 %v6564_v26  ;;  %vm6681_vm2 = vmor %vm935_vm0, %vm936_vm1  ;;  %vm955_vm4 = vweird.f32 %v6561_v22 }
 0x135   : > { %v544_v12 = vpop.xlane.xlu2 %543 }
 0x138   : > { %1359 = vmatmul.bf16.gmra.mxu0 %v1109_v23  ;;  %1448 = vmatmul.bf16.gmra.mxu1 %v1109_v23  ;;  %v546_v46 = vpop.xlane.xlu0 %545 }
 0x139   : > { %1537 = vmatmul.bf16.gmra.mxu2 %v1109_v23  ;;  %1626 = vmatmul.bf16.gmra.mxu3 %v1109_v23  ;;  %v583_v23 = vmul.f32 %v544_v12, %v5950_v35  ;;  %v584_v28 = vmul.f32 %v546_v46, %v5950_v35  ;;  %v931_v46 = vmul.f32 %v6566_v62, %v930_v4  ;;  %v6596_v7 = vpop.eup %4917 }
 0x13a   : > { %v6602_v57 = vpop.eup %4919  ;;  %v950_v18 = vmul.f32 %v6596_v7, %v6561_v22 }
 0x13b   : > { %v647_v31 = vsub.f32 %v583_v23, %v615_v55  ;;  %v648_v13 = vsub.f32 %v584_v28, %v616_v0  ;;  %v884_v55 = vmul.f32 %v6491_v54, %v883_v17  ;;  %v913_v23 = vsub.f32 1.5, %v912_v63 }
 0x13c   : > { %v1055_v0 = vsub.f32 %v5909_v40, %v6377_v11  ;;  %v922_v28 = vmul.f32 0.5, %v921_v38  ;;  %v898_v11 = vsel %vm6584_vm5, %v6485_v56, %v894_v49  ;;  %v932_v20 = vmul.f32 0.5, %v931_v46 }
 0x13d   : > { %v679_v1 = vmax.f32 %v647_v31, 0.0  ;;  %v680_v37 = vmax.f32 %v648_v13, 0.0  ;;  %v888_v40 = vsel %vm6589_vm6, %v6491_v54, %v884_v55  ;;  %v914_v42 = vmul.f32 %v6522_v3, %v913_v23  ;;  %v1151_v31 = vld [vmem:[#allocation7] sm:$0xf] }
 0x13e   : > { %v1057_v54 = vsub.f32 %v5922_v47, %v6400_v53  ;;  %v923_v48 = vsub.f32 1.5, %v922_v28  ;;  %v940_v13 = vmul.f32 %v6602_v57, %v6564_v26  ;;  %v1087_v17 = vmul.f32 %v1055_v0, %v888_v40 }
 0x13f   : > { %v6594_v41 = vadd.f32 1e-05, %v679_v1  ;;  %v6608_v16 = vadd.f32 1e-05, %v680_v37  ;;  %v1088_v9 = vmul.f32 %v1056_v2, %v898_v11  ;;  %v6641_v47 = vperm.slane %v1151_v31, 0 }
 0x140   : > { %v933_v21 = vsub.f32 1.5, %v932_v20  ;;  %v951_v4 = vmul.f32 %v6596_v7, %v950_v18  ;;  %v6647_v1 = vperm.slane %v1151_v31, 1  ;;  %v918_v38 = vsel %vm6629_vm12, %v6522_v3, %v914_v42 }
 0x141   : > { %4921 = vrsqrt.f32 %v6594_v41  ;;  %v924_v37 = vmul.f32 %v6555_v60, %v923_v48  ;;  %v941_v49 = vmul.f32 %v6602_v57, %v940_v13  ;;  %v1111_v46 = vpack.c.bf16 %v1088_v9, %v1087_v17 }
 0x142   : > { %4923 = vrsqrt.f32 %v6608_v16  ;;  %v1090_v0 = vmul.f32 %v1058_v10, %v918_v38  ;;  %v934_v2 = vmul.f32 %v6566_v62, %v933_v21  ;;  %v952_v15 = vmul.f32 0.5, %v951_v4 }
 0x143   : > { %v942_v50 = vmul.f32 0.5, %v941_v49  ;;  %v928_v20 = vsel %vm6661_vm15, %v6555_v60, %v924_v37  ;;  %v1061_v10 = vsub.f32 %v5956_v51, %v6480_v5  ;;  %v6699_v48 = vperm.slane %v1151_v31, 2 }
 0x144   : > { %v6701_v13 = vperm.slane %v1151_v31, 3  ;;  %v1062_v60 = vsub.f32 %v5962_v29, %v6477_v24  ;;  %v1091_v4 = vmul.f32 %v1059_v27, %v928_v20  ;;  %vm956_vm5 = vweird.f32 %v6596_v7 }
 0x145   : > { %vm946_vm6 = vweird.f32 %v6602_v57  ;;  %vm6778_vm8 = vmor %vm955_vm4, %vm956_vm5  ;;  %vm965_vm9 = vweird.f32 %v6594_v41  ;;  %vm975_vm11 = vweird.f32 %v6608_v16 }
 0x146   : > { %v413_v25 = vpop.xlane.xlu1 %412  ;;  %vm6756_vm7 = vmor %vm945_vm3, %vm946_vm6 }
 0x147   : > { %v6659_v33 = vpop.eup %4921 }
 0x148   : > { %1364 = vmatmul.bf16.gmra.mxu0 %v1110_v6  ;;  %1453 = vmatmul.bf16.gmra.mxu1 %v1110_v6  ;;  %v6672_v28 = vpop.eup %4923  ;;  %v960_v39 = vmul.f32 %v6659_v33, %v6594_v41  ;;  %vm966_vm10 = vweird.f32 %v6659_v33 }
 0x149   : > { %1542 = vmatmul.bf16.gmra.mxu2 %v1110_v6  ;;  %1631 = vmatmul.bf16.gmra.mxu3 %v1110_v6  ;;  %v6637_v6 = vmul.f32 %v5950_v35, %v413_v25  ;;  %v415_v63 = vpop.xlane.xlu2 %414  ;;  %v1089_v25 = vmul.f32 %v1057_v54, %v908_v61  ;;  %v970_v56 = vmul.f32 %v6672_v28, %v6608_v16  ;;  %v953_v61 = vsub.f32 1.5, %v952_v15  ;;  %vm7048_vm13 = vmor %vm965_vm9, %vm966_vm10 }
 0x14a   : > { %v548_v53 = vpop.xlane.xlu0 %547  ;;  %v6657_v34 = vmul.f32 %v5950_v35, %v415_v63  ;;  %v938_v63 = vsel %vm6681_vm2, %v6566_v62, %v934_v2  ;;  %v961_v21 = vmul.f32 %v6659_v33, %v960_v39  ;;  %vm976_vm12 = vweird.f32 %v6672_v28 }
 0x14b   : > { %v617_v44 = vmul.f32 %v6637_v6, %v6637_v6  ;;  %v585_v58 = vmul.f32 %v548_v53, %v5950_v35  ;;  %v6706_v9 = vpack.c.bf16 %v1090_v0, %v1089_v25  ;;  %v943_v53 = vsub.f32 1.5, %v942_v50  ;;  %v4581_v50 = vld [vmem:[#allocation8 + $0x18] sm:$0xff]  ;;  %vm7063_vm14 = vmor %vm975_vm11, %vm976_vm12 }
 0x14c   : > { %8664 = vst [vmem:[#allocation20_spill] sm:$0xff] %v6657_v34  ;;  %v618_v42 = vmul.f32 %v6657_v34, %v6657_v34  ;;  %3735 = vmatpush.bf16.msrb.mxu0 %v4581_v50 }
 0x14d   : > { %v649_v52 = vsub.f32 %v585_v58, %v617_v44  ;;  %v971_v58 = vmul.f32 %v6672_v28, %v970_v56  ;;  %v6734_v56 = vmul.f32 %v6602_v57, %v943_v53 }
 0x14e   : > { %v550_v3 = vpop.xlane.xlu1 %549 }
 0x14f   : > { %v586_v54 = vmul.f32 %v550_v3, %v5950_v35  ;;  %v681_v55 = vmax.f32 %v649_v52, 0.0  ;;  %v6729_v52 = vmul.f32 %v6596_v7, %v953_v61  ;;  %v948_v22 = vsel %vm6756_vm7, %v6602_v57, %v6734_v56 }
 0x151   : > { %v650_v44 = vsub.f32 %v586_v54, %v618_v42  ;;  %v6726_v42 = vadd.f32 1e-05, %v681_v55 }
 0x153   : > { %v682_v20 = vmax.f32 %v650_v44, 0.0  ;;  %vm985_vm15 = vweird.f32 %v6726_v42 }
 0x155   : > { %v1330_v12 = vpop.f32.mrf.mxu0  ;;  %v1419_v23 = vpop.f32.mrf.mxu1 }
 0x156   : > { %v1331_v40 = vadd.f32 %v1330_v12, %v6641_v47  ;;  %v1420_v11 = vadd.f32 %v1419_v23, %v6647_v1 }
 0x158   : > { %v6692_v18 = vpack.c.bf16 %v1420_v11, %v1331_v40  ;;  %1369 = vmatmul.bf16.gmra.mxu0 %v1111_v46  ;;  %1458 = vmatmul.bf16.gmra.mxu1 %v1111_v46  ;;  %v962_v40 = vmul.f32 0.5, %v961_v21 }
 0x159   : > { %1547 = vmatmul.bf16.gmra.mxu2 %v1111_v46  ;;  %1636 = vmatmul.bf16.gmra.mxu3 %v1111_v46  ;;  %v1092_v46 = vmul.f32 %v1060_v19, %v938_v63  ;;  %v4605_v19 = vld [vmem:[#allocation8 + $0xd8] sm:$0xff] }
 0x15a   : > { %v1741_v17 = vxor.u32 2147516416, %v6692_v18  ;;  %4002 = vmatpush.bf16.msrb.mxu3 %v4605_v19  ;;  %v4589_v19 = vld [vmem:[#allocation8 + $0x58] sm:$0xff] }
 0x15b   : > { %v6737_v21 = vpack.c.bf16 %v1092_v46, %v1091_v4  ;;  %3824 = vmatpush.bf16.msrb.mxu1 %v4589_v19 }
 0x15c   : > { %v1805_v38 = vunpack.c.l.bf16 %v1741_v17  ;;  %v1806_v37 = vunpack.c.h.bf16 %v1741_v17  ;;  %v1508_v31 = vpop.f32.mrf.mxu2  ;;  %v1597_v49 = vpop.f32.mrf.mxu3  ;;  %v972_v17 = vmul.f32 0.5, %v971_v58 }
 0x15d   : > { %v1509_v3 = vadd.f32 %v1508_v31, %v6699_v48  ;;  %v1598_v12 = vadd.f32 %v1597_v49, %v6701_v13  ;;  %v1332_v62 = vpop.f32.mrf.mxu0  ;;  %v1421_v23 = vpop.f32.mrf.mxu1 }
 0x15e   : > { %v1933_v25 = vmul.f32 1.442695, %v1805_v38  ;;  %v1935_v0 = vmul.f32 1.442695, %v1806_v37  ;;  %v1333_v27 = vadd.f32 %v1332_v62, %v6641_v47  ;;  %v1422_v2 = vadd.f32 %v1421_v23, %v6647_v1 }
 0x15f   : > { %v6722_v11 = vpack.c.bf16 %v1598_v12, %v1509_v3  ;;  %v963_v38 = vsub.f32 1.5, %v962_v40  ;;  %v6740_v3 = vadd.f32 1e-05, %v682_v20 }
 0x160   : > { %4925 = vpow2.f32 %v1933_v25  ;;  %v6724_v39 = vpack.c.bf16 %v1422_v2, %v1333_v27  ;;  %v5654_v25 = vmov 1065369472   ;;  %v973_v27 = vsub.f32 1.5, %v972_v17 }
 0x161   : > { %4927 = vpow2.f32 %v1935_v0  ;;  %v1742_v54 = vxor.u32 2147516416, %v6722_v11  ;;  %v6744_v0 = vunpack.c.h.bf16 %v5654_v25  ;;  %v6748_v50 = vunpack.c.l.bf16 %v5654_v25 }
 0x162   : > { %8669 = vst [vmem:[#allocation21_spill] sm:$0xff] %v6724_v39  ;;  %v1743_v63 = vxor.u32 2147516416, %v6724_v39  ;;  %4929 = vrsqrt.f32 %v6726_v42  ;;  %vm995_vm1 = vweird.f32 %v6740_v3 }
 0x163   : > { %v1807_v37 = vunpack.c.l.bf16 %v1742_v54  ;;  %v1808_v61 = vunpack.c.h.bf16 %v1742_v54  ;;  %8670 = vst [vmem:[#allocation22_spill] sm:$0xff] %v6744_v0 }
 0x164   : > { %v1809_v31 = vunpack.c.l.bf16 %v1743_v63  ;;  %v1810_v49 = vunpack.c.h.bf16 %v1743_v63  ;;  %v1510_v55 = vpop.f32.mrf.mxu2  ;;  %v1599_v44 = vpop.f32.mrf.mxu3  ;;  %8671 = vst [vmem:[#allocation23_spill] sm:$0xff] %v6748_v50 }
 0x165   : > { %v1937_v53 = vmul.f32 1.442695, %v1807_v37  ;;  %v1939_v12 = vmul.f32 1.442695, %v1808_v61  ;;  %v1511_v58 = vadd.f32 %v1510_v55, %v6699_v48  ;;  %v1600_v62 = vadd.f32 %v1599_v44, %v6701_v13  ;;  %v1335_v4 = vpop.f32.mrf.mxu0  ;;  %v1424_v23 = vpop.f32.mrf.mxu1 }
 0x166   : > { %v4926_v46 = vpop.eup %4925  ;;  %v1336_v2 = vadd.f32 %v1335_v4, %v6641_v47  ;;  %v1425_v40 = vadd.f32 %v1424_v23, %v6647_v1  ;;  %v1941_v20 = vmul.f32 1.442695, %v1809_v31  ;;  %v1943_v37 = vmul.f32 1.442695, %v1810_v49 }
 0x167   : > { %v4928_v59 = vpop.eup %4927  ;;  %4931 = vpow2.f32 %v1937_v53  ;;  %v6750_v54 = vpack.c.bf16 %v1600_v62, %v1511_v58  ;;  %v6767_v55 = vmul.f32 %v6659_v33, %v963_v38 }
 0x168   : > { %v2189_v17 = vpack.c.bf16 %v4928_v59, %v4926_v46  ;;  %4933 = vpow2.f32 %v1939_v12  ;;  %v6760_v61 = vpack.c.bf16 %v1425_v40, %v1336_v2  ;;  %1374 = vmatmul.bf16.gmra.mxu0 %v6706_v9  ;;  %1463 = vmatmul.bf16.gmra.mxu1 %v6706_v9  ;;  %v6772_v49 = vpop.eup %4929  ;;  %v6783_v12 = vmul.f32 %v6672_v28, %v973_v27 }
 0x169   : > { %8672 = vst [vmem:[#allocation24_spill] sm:$0xff] %v6750_v54  ;;  %v1744_v26 = vxor.u32 2147516416, %v6750_v54  ;;  %1552 = vmatmul.bf16.gmra.mxu2 %v6706_v9  ;;  %4935 = vrsqrt.f32 %v6740_v3  ;;  %1641 = vmatmul.bf16.gmra.mxu3 %v6706_v9  ;;  %v980_v9 = vmul.f32 %v6772_v49, %v6726_v42  ;;  %vm986_vm0 = vweird.f32 %v6772_v49 }
 0x16a   : > { %8675 = vst [vmem:[#allocation25_spill] sm:$0xff] %v6760_v61  ;;  %v2253_v53 = vunpack.c.l.bf16 %v2189_v17  ;;  %v2254_v38 = vunpack.c.h.bf16 %v2189_v17  ;;  %v1745_v58 = vxor.u32 2147516416, %v6760_v61  ;;  %4937 = vpow2.f32 %v1941_v20  ;;  %vm7148_vm3 = vmor %vm985_vm15, %vm986_vm0 }
 0x16b   : > { %v1811_v62 = vunpack.c.l.bf16 %v1744_v26  ;;  %v1812_v4 = vunpack.c.h.bf16 %v1744_v26  ;;  %4939 = vpow2.f32 %v1943_v37  ;;  %v958_v20 = vsel %vm6778_vm8, %v6596_v7, %v6729_v52 }
 0x16c   : > { %v2381_v23 = vadd.f32 1.0, %v2253_v53  ;;  %v2382_v46 = vadd.f32 1.0, %v2254_v38  ;;  %v1513_v2 = vpop.f32.mrf.mxu2  ;;  %v1602_v27 = vpop.f32.mrf.mxu3  ;;  %v1813_v17 = vunpack.c.l.bf16 %v1745_v58  ;;  %v1093_v37 = vmul.f32 %v1061_v10, %v948_v22 }
 0x16d   : > { %v4932_v40 = vpop.eup %4931  ;;  %v1945_v59 = vmul.f32 1.442695, %v1811_v62  ;;  %v1947_v19 = vmul.f32 1.442695, %v1812_v4  ;;  %v1814_v38 = vunpack.c.h.bf16 %v1745_v58  ;;  %v1514_v62 = vadd.f32 %v1513_v2, %v6699_v48 }
 0x16e   : > { %v4934_v63 = vpop.eup %4933  ;;  %v2509_v57 = vpack.c.bf16 %v2382_v46, %v2381_v23  ;;  %v1603_v7 = vadd.f32 %v1602_v27, %v6701_v13  ;;  %v1094_v52 = vmul.f32 %v1062_v60, %v958_v20  ;;  %v981_v5 = vmul.f32 %v6772_v49, %v980_v9  ;;  %v1337_v60 = vpop.f32.mrf.mxu0 }
 0x16f   : > { %v6802_v26 = vpop.eup %4935  ;;  %v2190_v53 = vpack.c.bf16 %v4934_v63, %v4932_v40  ;;  %4941 = vpow2.f32 %v1945_v59  ;;  %v1949_v58 = vmul.f32 1.442695, %v1813_v17  ;;  %v1951_v24 = vmul.f32 1.442695, %v1814_v38 }
 0x170   : > { %v2575_v4 = vunpack.c.h.bf16 %v2509_v57  ;;  %4943 = vpow2.f32 %v1947_v19  ;;  %v4938_v44 = vpop.eup %4937  ;;  %v2576_v23 = vunpack.c.l.bf16 %v2509_v57  ;;  %v6811_v40 = vpack.c.bf16 %v1603_v7, %v1514_v62  ;;  %v1426_v19 = vpop.f32.mrf.mxu1 }
 0x171   : > { %v2255_v46 = vunpack.c.l.bf16 %v2190_v53  ;;  %v2256_v51 = vunpack.c.h.bf16 %v2190_v53  ;;  %v4940_v10 = vpop.eup %4939  ;;  %v990_v2 = vmul.f32 %v6802_v26, %v6740_v3  ;;  %v982_v62 = vmul.f32 0.5, %v981_v5 }
 0x172   : > { %8678 = vst [vmem:[#allocation26_spill] sm:$0xff] %v6811_v40  ;;  %4945 = vrcp.f32 %v2575_v4  ;;  %v1746_v63 = vxor.u32 2147516416, %v6811_v40  ;;  %v2191_v53 = vpack.c.bf16 %v4940_v10, %v4938_v44  ;;  %v6822_v31 = vpack.c.bf16 %v1094_v52, %v1093_v37  ;;  %v6827_v10 = vpop.xlane.xlu2 %416  ;;  %v4580_v37 = vld [vmem:[#allocation8 + $0x10] sm:$0xff] }
 0x173   : > { %v2383_v27 = vadd.f32 1.0, %v2255_v46  ;;  %v2384_v59 = vadd.f32 1.0, %v2256_v51  ;;  %4947 = vrcp.f32 %v2576_v23  ;;  %v991_v4 = vmul.f32 %v6802_v26, %v990_v2  ;;  %3736 = vmatpush.bf16.msrb.mxu0 %v4580_v37 }
 0x174   : > { %v1515_v7 = vpop.f32.mrf.mxu2  ;;  %v1604_v46 = vpop.f32.mrf.mxu3  ;;  %4949 = vpow2.f32 %v1949_v58  ;;  %v1815_v15 = vunpack.c.l.bf16 %v1746_v63  ;;  %v1816_v23 = vunpack.c.h.bf16 %v1746_v63  ;;  %v1338_v5 = vadd.f32 %v1337_v60, %v6641_v47  ;;  %v4596_v58 = vld [vmem:[#allocation8 + $0x90] sm:$0xff] }
 0x175   : > { %v4942_v57 = vpop.eup %4941  ;;  %v2510_v17 = vpack.c.bf16 %v2384_v59, %v2383_v27  ;;  %4951 = vpow2.f32 %v1951_v24  ;;  %v2257_v52 = vunpack.c.l.bf16 %v2191_v53  ;;  %v2258_v2 = vunpack.c.h.bf16 %v2191_v53  ;;  %v4604_v59 = vld [vmem:[#allocation8 + $0xd0] sm:$0xff]  ;;  %3914 = vmatpush.bf16.msrb.mxu2 %v4596_v58 }
 0x176   : > { %v4944_v51 = vpop.eup %4943  ;;  %v983_v27 = vsub.f32 1.5, %v982_v62  ;;  %v1953_v62 = vmul.f32 1.442695, %v1815_v15  ;;  %4003 = vmatpush.bf16.msrb.mxu3 %v4604_v59  ;;  %v1955_v63 = vmul.f32 1.442695, %v1816_v23  ;;  %v1516_v58 = vadd.f32 %v1515_v7, %v6699_v48  ;;  %v419_v23 = vpop.xlane.xlu0 %418 }
 0x177   : > { %v2582_v20 = vunpack.c.h.bf16 %v2510_v17  ;;  %v2583_v9 = vunpack.c.l.bf16 %v2510_v17  ;;  %v2192_v29 = vpack.c.bf16 %v4944_v51, %v4942_v57  ;;  %v1427_v57 = vadd.f32 %v1426_v19, %v6647_v1 }
 0x178   : > { %1379 = vmatmul.bf16.gmra.mxu0 %v6737_v21  ;;  %1468 = vmatmul.bf16.gmra.mxu1 %v6737_v21  ;;  %v4946_v24 = vpop.eup %4945  ;;  %v992_v51 = vmul.f32 0.5, %v991_v4  ;;  %v2385_v19 = vadd.f32 1.0, %v2257_v52  ;;  %v2386_v56 = vadd.f32 1.0, %v2258_v2  ;;  %v1429_v53 = vpop.f32.mrf.mxu1  ;;  %v6861_v52 = vmul.f32 %v5950_v35, %v419_v23 }
 0x179   : > { %4953 = vrcp.f32 %v2582_v20  ;;  %1557 = vmatmul.bf16.gmra.mxu2 %v6737_v21  ;;  %1646 = vmatmul.bf16.gmra.mxu3 %v6737_v21  ;;  %v4948_v17 = vpop.eup %4947  ;;  %v2260_v38 = vunpack.c.h.bf16 %v2192_v29  ;;  %v6838_v22 = vpack.c.bf16 %v1427_v57, %v1338_v5  ;;  %v6841_v21 = vmul.f32 %v6772_v49, %v983_v27  ;;  %v1340_v20 = vpop.f32.mrf.mxu0 }
 0x17a   : > { %4955 = vrcp.f32 %v2583_v9  ;;  %v4950_v44 = vpop.eup %4949  ;;  %v2259_v9 = vunpack.c.l.bf16 %v2192_v29  ;;  %v2578_v15 = vmul.f32 %v4946_v24, %v6744_v0  ;;  %v2580_v4 = vmul.f32 %v4948_v17, %v6748_v50  ;;  %8681 = vst [vmem:[#allocation29_spill] sm:$0xff] %v6861_v52 }
 0x17b   : > { %8679 = vst [vmem:[#allocation27_spill] sm:$0xff] %v6838_v22  ;;  %v4952_v60 = vpop.eup %4951  ;;  %v1747_v29 = vxor.u32 2147516416, %v6838_v22  ;;  %4957 = vpow2.f32 %v1953_v62  ;;  %v993_v2 = vsub.f32 1.5, %v992_v51  ;;  %v1605_v27 = vadd.f32 %v1604_v46, %v6701_v13 }
 0x17c   : > { %v1518_v59 = vpop.f32.mrf.mxu2  ;;  %v1607_v7 = vpop.f32.mrf.mxu3  ;;  %v2387_v25 = vadd.f32 1.0, %v2259_v9  ;;  %v2388_v61 = vadd.f32 1.0, %v2260_v38  ;;  %v6850_v24 = vpack.c.bf16 %v4952_v60, %v4950_v44  ;;  %4959 = vpow2.f32 %v1955_v63 }
 0x17d   : > { %v6852_v17 = vpack.c.bf16 %v2386_v56, %v2385_v19  ;;  %v1817_v37 = vunpack.c.l.bf16 %v1747_v29  ;;  %v6854_v22 = vpack.c.bf16 %v1605_v27, %v1516_v58  ;;  %v1341_v62 = vadd.f32 %v1340_v20, %v6641_v47  ;;  %v554_v9 = vpop.xlane.xlu2 %553 }
 0x17e   : > { %v6857_v54 = vpack.c.bf16 %v2578_v15, %v2580_v4  ;;  %v1818_v51 = vunpack.c.h.bf16 %v1747_v29  ;;  %v1430_v46 = vadd.f32 %v1429_v53, %v6647_v1  ;;  %v6867_v56 = vmul.f32 %v5950_v35, %v6827_v10 }
 0x17f   : > { %v4954_v5 = vpop.eup %4953  ;;  %8680 = vst [vmem:[#allocation28_spill] sm:$0xff] %v6854_v22  ;;  %v1748_v63 = vxor.u32 2147516416, %v6854_v22  ;;  %v6870_v60 = vpack.c.bf16 %v2388_v61, %v2387_v25  ;;  %v2261_v20 = vunpack.c.l.bf16 %v6850_v24  ;;  %v6874_v53 = vmul.f32 %v6802_v26, %v993_v2 }
 0x180   : > { %v4956_v57 = vpop.eup %4955  ;;  %v2585_v38 = vmul.f32 %v4954_v5, %v6744_v0  ;;  %8682 = vst [vmem:[#allocation30_spill] sm:$0xff] %v6867_v56  ;;  %v6876_v19 = vpack.c.bf16 %v1430_v46, %v1341_v62  ;;  %v2262_v15 = vunpack.c.h.bf16 %v6850_v24  ;;  %v1957_v4 = vmul.f32 1.442695, %v1817_v37  ;;  %v1431_v40 = vpop.f32.mrf.mxu1 }
 0x181   : > { %v2587_v44 = vmul.f32 %v4956_v57, %v6748_v50  ;;  %8683 = vst [vmem:[#allocation31_spill] sm:$0xff] %v6870_v60  ;;  %v4958_v58 = vpop.eup %4957  ;;  %v620_v29 = vmul.f32 %v6861_v52, %v6861_v52  ;;  %v588_v10 = vmul.f32 %v554_v9, %v5950_v35  ;;  %v1959_v5 = vmul.f32 1.442695, %v1818_v51  ;;  %v4588_v57 = vld [vmem:[#allocation8 + $0x50] sm:$0xff]  ;;  %v1342_v24 = vpop.f32.mrf.mxu0 }
 0x182   : > { %8684 = vst [vmem:[#allocation32_spill] sm:$0xff] %v6876_v19  ;;  %v4960_v23 = vpop.eup %4959  ;;  %v1819_v61 = vunpack.c.l.bf16 %v1748_v63  ;;  %v1820_v25 = vunpack.c.h.bf16 %v1748_v63  ;;  %v1749_v27 = vxor.u32 2147516416, %v6876_v19  ;;  %v3151_v2 = vunpack.c.l.bf16 %v6857_v54  ;;  %v552_v50 = vpop.xlane.xlu1 %551  ;;  %3825 = vmatpush.bf16.msrb.mxu1 %v4588_v57 }
 0x183   : > { %v3152_v62 = vunpack.c.h.bf16 %v6857_v54  ;;  %v6885_v46 = vpack.c.bf16 %v2585_v38, %v2587_v44  ;;  %v619_v37 = vmul.f32 %v6867_v56, %v6867_v56  ;;  %v2194_v63 = vpack.c.bf16 %v4960_v23, %v4958_v58 }
 0x184   : > { %v1961_v22 = vmul.f32 1.442695, %v1819_v61  ;;  %v1963_v9 = vmul.f32 1.442695, %v1820_v25  ;;  %v1821_v39 = vunpack.c.l.bf16 %v1749_v27  ;;  %v1822_v51 = vunpack.c.h.bf16 %v1749_v27  ;;  %v1520_v38 = vpop.f32.mrf.mxu2  ;;  %v1609_v44 = vpop.f32.mrf.mxu3 }
 0x185   : > { %4961 = vpow2.f32 %v1957_v4  ;;  %v652_v0 = vsub.f32 %v588_v10, %v620_v29  ;;  %v1519_v54 = vadd.f32 %v1518_v59, %v6699_v48  ;;  %v1608_v27 = vadd.f32 %v1607_v7, %v6701_v13 }
 0x186   : > { %4963 = vpow2.f32 %v1959_v5  ;;  %v1965_v61 = vmul.f32 1.442695, %v1821_v39  ;;  %v1967_v25 = vmul.f32 1.442695, %v1822_v51  ;;  %v587_v58 = vmul.f32 %v552_v50, %v5950_v35 }
 0x187   : > { %4965 = vpow2.f32 %v1961_v22  ;;  %v684_v57 = vmax.f32 %v652_v0, 0.0  ;;  %v1343_v4 = vadd.f32 %v1342_v24, %v6641_v47  ;;  %v6897_v59 = vadd.f32 1.0, %v2261_v20 }
 0x188   : > { %1384 = vmatmul.bf16.gmra.mxu0 %v6822_v31  ;;  %1473 = vmatmul.bf16.gmra.mxu1 %v6822_v31  ;;  %4967 = vpow2.f32 %v1963_v9  ;;  %v6899_v29 = vpack.c.bf16 %v1608_v27, %v1519_v54  ;;  %v1432_v10 = vadd.f32 %v1431_v40, %v6647_v1  ;;  %v6902_v23 = vadd.f32 1.0, %v2262_v15  ;;  %v421_v54 = vpop.xlane.xlu0 %420 }
 0x189   : > { %1562 = vmatmul.bf16.gmra.mxu2 %v6822_v31  ;;  %1651 = vmatmul.bf16.gmra.mxu3 %v6822_v31  ;;  %8685 = vst [vmem:[#allocation33_spill] sm:$0xff] %v6897_v59  ;;  %4969 = vpow2.f32 %v1965_v61  ;;  %v6904_v39 = vadd.f32 1e-05, %v684_v57  ;;  %v651_v7 = vsub.f32 %v587_v58, %v619_v37  ;;  %v3153_v31 = vunpack.c.l.bf16 %v6885_v46 }
 0x18a   : > { %8686 = vst [vmem:[#allocation34_spill] sm:$0xff] %v6899_v29  ;;  %4971 = vpow2.f32 %v1967_v25  ;;  %v1750_v0 = vxor.u32 2147516416, %v6899_v29  ;;  %v6908_v50 = vpack.c.bf16 %v1432_v10, %v1343_v4  ;;  %v3154_v20 = vunpack.c.h.bf16 %v6885_v46  ;;  %v1345_v10 = vpop.f32.mrf.mxu0 }
 0x18b   : > { %8687 = vst [vmem:[#allocation35_spill] sm:$0xff] %v6902_v23  ;;  %v4962_v22 = vpop.eup %4961  ;;  %v2263_v5 = vunpack.c.l.bf16 %v2194_v63  ;;  %v2264_v24 = vunpack.c.h.bf16 %v2194_v63  ;;  %4973 = vrsqrt.f32 %v6904_v39  ;;  %v683_v51 = vmax.f32 %v651_v7, 0.0  ;;  %v1434_v7 = vpop.f32.mrf.mxu1 }
 0x18c   : > { %8688 = vst [vmem:[#allocation36_spill] sm:$0xff] %v6904_v39  ;;  %v4964_v40 = vpop.eup %4963  ;;  %v1823_v15 = vunpack.c.l.bf16 %v1750_v0  ;;  %v1824_v9 = vunpack.c.h.bf16 %v1750_v0  ;;  %v1751_v37 = vxor.u32 2147516416, %v6908_v50  ;;  %v8690_v25 = vunpack.c.l.bf16 %v6692_v18  ;;  %v6935_v4 = vpop.f32.mrf.mxu3 }
 0x18d   : > { %8689 = vst [vmem:[#allocation37_spill] sm:$0xff] %v6908_v50  ;;  %v4966_v61 = vpop.eup %4965  ;;  %v8692_v57 = vunpack.c.h.bf16 %v6692_v18  ;;  %v8695_v50 = vunpack.c.l.bf16 %v6722_v11  ;;  %v1610_v46 = vadd.f32 %v1609_v44, %v6701_v13  ;;  %v8698_v52 = vunpack.c.h.bf16 %v6722_v11 }
 0x18e   : > { %v6915_v27 = vmul.f32 %v3151_v2, %v8690_v25  ;;  %v4968_v0 = vpop.eup %4967  ;;  %v1969_v59 = vmul.f32 1.442695, %v1823_v15  ;;  %v1971_v2 = vmul.f32 1.442695, %v1824_v9  ;;  %v6929_v25 = vadd.f32 1e-05, %v683_v51 }
 0x18f   : > { %v6919_v58 = vmul.f32 %v3152_v62, %v8692_v57  ;;  %v6927_v23 = vmul.f32 %v3153_v31, %v8695_v50  ;;  %v4970_v18 = vpop.eup %4969  ;;  %v1825_v62 = vunpack.c.l.bf16 %v1751_v37  ;;  %v1826_v57 = vunpack.c.h.bf16 %v1751_v37 }
 0x190   : > { %8691 = vst [vmem:[#allocation38_spill] sm:$0xff] %v6915_v27  ;;  %v6933_v27 = vpop.f32.mrf.mxu2  ;;  %v4972_v60 = vpop.eup %4971  ;;  %v6939_v31 = vmul.f32 %v3154_v20, %v8698_v52  ;;  %v6941_v50 = vadd.f32 1.0, %v2263_v5  ;;  %v6943_v15 = vadd.f32 1.0, %v2264_v24  ;;  %v2195_v9 = vpack.c.bf16 %v4964_v40, %v4962_v22 }
 0x191   : > { %8693 = vst [vmem:[#allocation39_spill] sm:$0xff] %v6919_v58  ;;  %v1521_v58 = vadd.f32 %v1520_v38, %v6699_v48  ;;  %v6945_v51 = vpop.eup %4973  ;;  %4975 = vpow2.f32 %v1969_v59  ;;  %v1973_v37 = vmul.f32 1.442695, %v1825_v62  ;;  %v1975_v63 = vmul.f32 1.442695, %v1826_v57  ;;  %v423_v5 = vpop.xlane.xlu1 %422 }
 0x192   : > { %8696 = vst [vmem:[#allocation40_spill] sm:$0xff] %v6927_v23  ;;  %4977 = vpow2.f32 %v1971_v2  ;;  %v6951_v11 = vmul.f32 %v5950_v35, %v421_v54  ;;  %v1010_v52 = vmul.f32 %v6945_v51, %v6904_v39  ;;  %v2265_v24 = vunpack.c.l.bf16 %v2195_v9  ;;  %v556_v62 = vpop.xlane.xlu2 %555 }
 0x193   : > { %8697 = vst [vmem:[#allocation41_spill] sm:$0xff] %v6929_v25  ;;  %4979 = vrsqrt.f32 %v6929_v25  ;;  %v6957_v20 = vpack.c.bf16 %v1610_v46, %v1521_v58  ;;  %v2266_v59 = vunpack.c.h.bf16 %v2195_v9  ;;  %v2196_v40 = vpack.c.bf16 %v4968_v0, %v4966_v61  ;;  %v558_v9 = vpop.xlane.xlu0 %557 }
 0x194   : > { %8699 = vst [vmem:[#allocation42_spill] sm:$0xff] %v6939_v31  ;;  %v1346_v2 = vadd.f32 %v1345_v10, %v6641_v47  ;;  %v2197_v57 = vpack.c.bf16 %v4972_v60, %v4970_v18  ;;  %4981 = vpow2.f32 %v1973_v37  ;;  %v1435_v23 = vadd.f32 %v1434_v7, %v6647_v1  ;;  %v1347_v18 = vpop.f32.mrf.mxu0  ;;  %v1436_v37 = vpop.f32.mrf.mxu1 }
 0x195   : > { %8700 = vst [vmem:[#allocation43_spill] sm:$0xff] %v6941_v50  ;;  %v1752_v54 = vxor.u32 2147516416, %v6957_v20  ;;  %v1011_v44 = vmul.f32 %v6945_v51, %v1010_v52  ;;  %4983 = vpow2.f32 %v1975_v63  ;;  %v621_v58 = vmul.f32 %v6951_v11, %v6951_v11 }
 0x196   : > { %8701 = vst [vmem:[#allocation44_spill] sm:$0xff] %v6943_v15  ;;  %v6966_v46 = vmul.f32 %v5950_v35, %v423_v5  ;;  %v6968_v22 = vpack.c.bf16 %v1435_v23, %v1346_v2  ;;  %v589_v60 = vmul.f32 %v556_v62, %v5950_v35  ;;  %v6971_v38 = vadd.f32 1.0, %v2265_v24 }
 0x197   : > { %8702 = vst [vmem:[#allocation45_spill] sm:$0xff] %v6957_v20  ;;  %v4976_v61 = vpop.eup %4975  ;;  %v1827_v0 = vunpack.c.l.bf16 %v1752_v54  ;;  %v1828_v10 = vunpack.c.h.bf16 %v1752_v54  ;;  %v6973_v63 = vadd.f32 1.0, %v2266_v59  ;;  %v2267_v52 = vunpack.c.l.bf16 %v2196_v40  ;;  %v1614_v54 = vpop.f32.mrf.mxu3 }
 0x198   : > { %8703 = vst [vmem:[#allocation46_spill] sm:$0xff] %v6966_v46  ;;  %v4978_v7 = vpop.eup %4977  ;;  %v2268_v29 = vunpack.c.h.bf16 %v2196_v40  ;;  %v2269_v5 = vunpack.c.l.bf16 %v2197_v57  ;;  %v2270_v20 = vunpack.c.h.bf16 %v2197_v57  ;;  %v1753_v15 = vxor.u32 2147516416, %v6968_v22  ;;  %v1525_v2 = vpop.f32.mrf.mxu2 }
 0x199   : > { %8704 = vst [vmem:[#allocation47_spill] sm:$0xff] %v6968_v22  ;;  %v6975_v19 = vpop.eup %4979  ;;  %v590_v23 = vmul.f32 %v558_v9, %v5950_v35  ;;  %v1012_v62 = vmul.f32 0.5, %v1011_v44  ;;  %v1977_v24 = vmul.f32 1.442695, %v1827_v0  ;;  %v622_v59 = vmul.f32 %v6966_v46, %v6966_v46  ;;  %v8708_v44 = vld [vmem:[#allocation18_spill] sm:$0xff] }
 0x19a   : > { %8705 = vst [vmem:[#allocation48_spill] sm:$0xff] %v6971_v38  ;;  %v1000_v50 = vmul.f32 %v6975_v19, %v6929_v25  ;;  %v4982_v31 = vpop.eup %4981  ;;  %v1979_v40 = vmul.f32 1.442695, %v1828_v10  ;;  %v1830_v38 = vunpack.c.h.bf16 %v1753_v15  ;;  %v653_v56 = vsub.f32 %v589_v60, %v621_v58 }
 0x19b   : > { %8706 = vst [vmem:[#allocation49_spill] sm:$0xff] %v6973_v63  ;;  %v1829_v63 = vunpack.c.l.bf16 %v1753_v15  ;;  %v4984_v57 = vpop.eup %4983  ;;  %v6983_v32 = vadd.f32 1.0, %v2267_v52  ;;  %v2198_v39 = vpack.c.bf16 %v4978_v7, %v4976_v61  ;;  %v6988_v34 = vadd.f32 1.0, %v2268_v29 }
 0x19c   : > { %v1001_v35 = vmul.f32 %v6975_v19, %v1000_v50  ;;  %v6990_v0 = vadd.f32 1.0, %v2269_v5  ;;  %v1524_v10 = vadd.f32 %v6933_v27, %v6699_v48  ;;  %v6994_v25 = vadd.f32 1.0, %v2270_v20  ;;  %v7007_v5 = vpop.f32.mrf.mxu1 }
 0x19d   : > { %8707 = vst [vmem:[#allocation50_spill] sm:$0xff] %v6983_v32  ;;  %v1981_v45 = vmul.f32 1.442695, %v1829_v63  ;;  %v1013_v15 = vsub.f32 1.5, %v1012_v62  ;;  %4985 = vpow2.f32 %v1977_v24  ;;  %v1983_v58 = vmul.f32 1.442695, %v1830_v38 }
 0x19e   : > { %8709 = vst [vmem:[#allocation18_spill] sm:$0xff] %v6988_v34  ;;  %4987 = vpow2.f32 %v1979_v40  ;;  %v685_v50 = vmax.f32 %v653_v56, 0.0  ;;  %v654_v61 = vsub.f32 %v590_v23, %v622_v59  ;;  %v1613_v29 = vadd.f32 %v6935_v4, %v6701_v13  ;;  %v1350_v56 = vpop.f32.mrf.mxu0  ;;  %v4595_v59 = vld [vmem:[#allocation8 + $0x88] sm:$0xff] }
 0x19f   : > { %8710 = vst [vmem:[#allocation51_spill] sm:$0xff] %v6990_v0  ;;  %v2271_v27 = vunpack.c.l.bf16 %v2198_v39  ;;  %v1002_v20 = vmul.f32 0.5, %v1001_v35  ;;  %v2199_v60 = vpack.c.bf16 %v4984_v57, %v4982_v31  ;;  %4989 = vpow2.f32 %v1981_v45  ;;  %v4579_v40 = vld [vmem:[#allocation8 + $0x8] sm:$0xff]  ;;  %v7018_v35 = vpop.f32.mrf.mxu3  ;;  %3915 = vmatpush.bf16.msrb.mxu2 %v4595_v59 }
 0x1a0   : > { %8711 = vst [vmem:[#allocation52_spill] sm:$0xff] %v6994_v25  ;;  %v7002_v7 = vadd.f32 1e-05, %v685_v50  ;;  %v686_v38 = vmax.f32 %v654_v61, 0.0  ;;  %v7004_v63 = vpack.c.bf16 %v1613_v29, %v1524_v10  ;;  %v1348_v52 = vadd.f32 %v1347_v18, %v6641_v47  ;;  %v4603_v18 = vld [vmem:[#allocation8 + $0xc8] sm:$0xff]  ;;  %v7016_v57 = vpop.f32.mrf.mxu2  ;;  %3737 = vmatpush.bf16.msrb.mxu0 %v4579_v40 }
 0x1a1   : > { %4991 = vpow2.f32 %v1983_v58  ;;  %v1437_v4 = vadd.f32 %v1436_v37, %v6647_v1  ;;  %v1526_v23 = vadd.f32 %v1525_v2, %v6699_v48  ;;  %v1615_v62 = vadd.f32 %v1614_v54, %v6701_v13  ;;  %4004 = vmatpush.bf16.msrb.mxu3 %v4603_v18 }
 0x1a2   : > { %8712 = vst [vmem:[#allocation53_spill] sm:$0xff] %v7004_v63  ;;  %v2272_v24 = vunpack.c.h.bf16 %v2198_v39  ;;  %4993 = vrsqrt.f32 %v7002_v7  ;;  %v7013_v45 = vadd.f32 1e-05, %v686_v38  ;;  %v1754_v31 = vxor.u32 2147516416, %v7004_v63  ;;  %v8713_v39 = vld [vmem:[#allocation19_spill] sm:$0xff] }
 0x1a3   : > { %v4986_v10 = vpop.eup %4985  ;;  %v7021_v37 = vmul.f32 %v6945_v51, %v1013_v15  ;;  %v2273_v2 = vunpack.c.l.bf16 %v2199_v60  ;;  %v7025_v58 = vpack.c.bf16 %v1437_v4, %v1348_v52  ;;  %v2274_v61 = vunpack.c.h.bf16 %v2199_v60 }
 0x1a4   : > { %v4988_v50 = vpop.eup %4987  ;;  %4995 = vrsqrt.f32 %v7013_v45  ;;  %v1831_v29 = vunpack.c.l.bf16 %v1754_v31  ;;  %v1832_v38 = vunpack.c.h.bf16 %v1754_v31  ;;  %v7028_v25 = vadd.f32 1.0, %v2271_v27 }
 0x1a5   : > { %8714 = vst [vmem:[#allocation19_spill] sm:$0xff] %v7025_v58  ;;  %v4990_v9 = vpop.eup %4989  ;;  %v1003_v0 = vsub.f32 1.5, %v1002_v20  ;;  %v1755_v15 = vxor.u32 2147516416, %v7025_v58  ;;  %v7031_v34 = vpack.c.bf16 %v1615_v62, %v1526_v23  ;;  %v7033_v54 = vadd.f32 1.0, %v2272_v24 }
 0x1a6   : > { %v1985_v60 = vmul.f32 1.442695, %v1831_v29  ;;  %v1987_v4 = vmul.f32 1.442695, %v1832_v38  ;;  %v2200_v46 = vpack.c.bf16 %v4988_v50, %v4986_v10  ;;  %v7039_v20 = vadd.f32 1.0, %v2273_v2  ;;  %v4587_v38 = vld [vmem:[#allocation8 + $0x48] sm:$0xff] }
 0x1a7   : > { %8715 = vst [vmem:[#allocation54_spill] sm:$0xff] %v7031_v34  ;;  %v4992_v32 = vpop.eup %4991  ;;  %v1833_v59 = vunpack.c.l.bf16 %v1755_v15  ;;  %v1834_v40 = vunpack.c.h.bf16 %v1755_v15  ;;  %v7041_v58 = vadd.f32 1.0, %v2274_v61  ;;  %v1756_v23 = vxor.u32 2147516416, %v7031_v34  ;;  %v7069_v15 = vpop.f32.mrf.mxu0  ;;  %3826 = vmatpush.bf16.msrb.mxu1 %v4587_v38 }
 0x1a8   : > { %8716 = vst [vmem:[#allocation55_spill] sm:$0xff] %v7033_v54  ;;  %v7037_v27 = vpop.eup %4993  ;;  %4997 = vpow2.f32 %v1985_v60  ;;  %v7053_v24 = vmul.f32 %v6975_v19, %v1003_v0  ;;  %v1351_v29 = vadd.f32 %v1350_v56, %v6641_v47  ;;  %v7071_v60 = vpop.f32.mrf.mxu1  ;;  %v2276_v52 = vunpack.c.h.bf16 %v2200_v46 }
 0x1a9   : > { %v1020_v18 = vmul.f32 %v7037_v27, %v7002_v7  ;;  %4999 = vpow2.f32 %v1987_v4  ;;  %v1989_v10 = vmul.f32 1.442695, %v1833_v59  ;;  %v1991_v61 = vmul.f32 1.442695, %v1834_v40  ;;  %v1530_v56 = vpop.f32.mrf.mxu2  ;;  %v1619_v50 = vpop.f32.mrf.mxu3 }
 0x1aa   : > { %v7057_v2 = vpop.eup %4995  ;;  %v1835_v0 = vunpack.c.l.bf16 %v1756_v23  ;;  %v2275_v4 = vunpack.c.l.bf16 %v2200_v46  ;;  %v2201_v59 = vpack.c.bf16 %v4992_v32, %v4990_v9  ;;  %v1836_v22 = vunpack.c.h.bf16 %v1756_v23 }
 0x1ab   : > { %v1021_v31 = vmul.f32 %v7037_v27, %v1020_v18  ;;  %v1030_v16 = vmul.f32 %v7057_v2, %v7013_v45  ;;  %5001 = vpow2.f32 %v1989_v10  ;;  %v1440_v40 = vadd.f32 %v7007_v5, %v6647_v1 }
 0x1ac   : > { %v1993_v54 = vmul.f32 1.442695, %v1835_v0  ;;  %v968_v32 = vsel %vm7048_vm13, %v6659_v33, %v6767_v55  ;;  %v978_v46 = vsel %vm7063_vm14, %v6672_v28, %v6783_v12  ;;  %5003 = vpow2.f32 %v1991_v61 }
 0x1ad   : > { %v1031_v34 = vmul.f32 %v7057_v2, %v1030_v16  ;;  %v1995_v23 = vmul.f32 1.442695, %v1836_v22  ;;  %v7087_v5 = vpack.c.bf16 %v1440_v40, %v1351_v29  ;;  %v8722_v18 = vsub.f32 %v5999_v14, %v6520_v30 }
 0x1ae   : > { %v4998_v9 = vpop.eup %4997  ;;  %v2277_v33 = vunpack.c.l.bf16 %v2201_v59  ;;  %v2278_v55 = vunpack.c.h.bf16 %v2201_v59  ;;  %v1022_v62 = vmul.f32 0.5, %v1021_v31  ;;  %v8723_v28 = vsub.f32 %v6018_v43, %v6541_v36 }
 0x1af   : > { %8721 = vst [vmem:[#allocation56_spill] sm:$0xff] %v7087_v5  ;;  %v1095_v10 = vmul.f32 %v8722_v18, %v968_v32  ;;  %v5000_v0 = vpop.eup %4999  ;;  %v7097_v41 = vadd.f32 1.0, %v2275_v4  ;;  %v1032_v22 = vmul.f32 0.5, %v1031_v34  ;;  %v1757_v14 = vxor.u32 2147516416, %v7087_v5  ;;  %v1355_v31 = vpop.f32.mrf.mxu0 }
 0x1b0   : > { %v1096_v12 = vmul.f32 %v8723_v28, %v978_v46  ;;  %v2202_v30 = vpack.c.bf16 %v5000_v0, %v4998_v9  ;;  %5005 = vpow2.f32 %v1993_v54  ;;  %v1529_v38 = vadd.f32 %v7016_v57, %v6699_v48  ;;  %v1444_v4 = vpop.f32.mrf.mxu1 }
 0x1b1   : > { %v5002_v16 = vpop.eup %5001  ;;  %vm996_vm2 = vweird.f32 %v6802_v26  ;;  %v7105_v43 = vadd.f32 1.0, %v2276_v52  ;;  %5007 = vpow2.f32 %v1995_v23  ;;  %v1837_v36 = vunpack.c.l.bf16 %v1757_v14  ;;  %v7114_v18 = vpop.f32.mrf.mxu2 }
 0x1b2   : > { %v1115_v29 = vpack.c.bf16 %v1096_v12, %v1095_v10  ;;  %v1838_v34 = vunpack.c.h.bf16 %v1757_v14  ;;  %v7107_v59 = vadd.f32 1.0, %v2277_v33  ;;  %v7109_v40 = vadd.f32 1.0, %v2278_v55  ;;  %v5004_v32 = vpop.eup %5003  ;;  %v7116_v10 = vpop.f32.mrf.mxu3  ;;  %vm7161_vm4 = vmor %vm995_vm1, %vm996_vm2 }
 0x1b3   : > { %v1023_v54 = vsub.f32 1.5, %v1022_v62  ;;  %v1618_v57 = vadd.f32 %v7018_v35, %v6701_v13  ;;  %v1033_v46 = vsub.f32 1.5, %v1032_v22  ;;  %v1997_v9 = vmul.f32 1.442695, %v1837_v36 }
 0x1b4   : > { %1389 = vmatmul.bf16.gmra.mxu0 %v1115_v29  ;;  %1478 = vmatmul.bf16.gmra.mxu1 %v1115_v29  ;;  %v1999_v52 = vmul.f32 1.442695, %v1838_v34  ;;  %v2279_v0 = vunpack.c.l.bf16 %v2202_v30  ;;  %v2280_v33 = vunpack.c.h.bf16 %v2202_v30  ;;  %v1353_v62 = vadd.f32 %v7069_v15, %v6641_v47 }
 0x1b5   : > { %1567 = vmatmul.bf16.gmra.mxu2 %v1115_v29  ;;  %1656 = vmatmul.bf16.gmra.mxu3 %v1115_v29  ;;  %v7118_v55 = vpack.c.bf16 %v1618_v57, %v1529_v38  ;;  %5009 = vpow2.f32 %v1997_v9  ;;  %v1442_v35 = vadd.f32 %v7071_v60, %v6647_v1  ;;  %v1531_v28 = vadd.f32 %v1530_v56, %v6699_v48 }
 0x1b6   : > { %v1620_v12 = vadd.f32 %v1619_v50, %v6701_v13  ;;  %v5006_v22 = vpop.eup %5005  ;;  %v7127_v14 = vmul.f32 %v7037_v27, %v1023_v54  ;;  %v2203_v29 = vpack.c.bf16 %v5004_v32, %v5002_v16  ;;  %5011 = vpow2.f32 %v1999_v52 }
 0x1b7   : > { %v5008_v38 = vpop.eup %5007  ;;  %v7131_v36 = vmul.f32 %v7057_v2, %v1033_v46  ;;  %v1758_v15 = vxor.u32 2147516416, %v7118_v55  ;;  %v7134_v34 = vpack.c.bf16 %v1442_v35, %v1353_v62  ;;  %v7137_v56 = vadd.f32 1.0, %v2279_v0  ;;  %v1357_v23 = vpop.f32.mrf.mxu0 }
 0x1b8   : > { %v7139_v50 = vadd.f32 1.0, %v2280_v33  ;;  %v7141_v54 = vpack.c.bf16 %v1620_v12, %v1531_v28  ;;  %v1356_v16 = vadd.f32 %v1355_v31, %v6641_v47  ;;  %v1445_v52 = vadd.f32 %v1444_v4, %v6647_v1  ;;  %v1446_v61 = vpop.f32.mrf.mxu1 }
 0x1b9   : > { %8724 = vst [vmem:[#allocation57_spill] sm:$0xff] %v7134_v34  ;;  %v1839_v32 = vunpack.c.l.bf16 %v1758_v15  ;;  %v1840_v46 = vunpack.c.h.bf16 %v1758_v15  ;;  %v1759_v9 = vxor.u32 2147516416, %v7134_v34  ;;  %v2281_v0 = vunpack.c.l.bf16 %v2203_v29  ;;  %v1535_v5 = vpop.f32.mrf.mxu2 }
 0x1ba   : > { %8725 = vst [vmem:[#allocation58_spill] sm:$0xff] %v7139_v50  ;;  %v2282_v33 = vunpack.c.h.bf16 %v2203_v29  ;;  %v7154_v62 = vpack.c.bf16 %v5008_v38, %v5006_v22  ;;  %v1760_v31 = vxor.u32 2147516416, %v7141_v54  ;;  %v7165_v38 = vpack.c.bf16 %v1445_v52, %v1356_v16  ;;  %v1624_v3 = vpop.f32.mrf.mxu3 }
 0x1bb   : > { %8726 = vst [vmem:[#allocation59_spill] sm:$0xff] %v7141_v54  ;;  %v5010_v35 = vpop.eup %5009  ;;  %v2001_v28 = vmul.f32 1.442695, %v1839_v32  ;;  %v2003_v12 = vmul.f32 1.442695, %v1840_v46  ;;  %v1841_v42 = vunpack.c.l.bf16 %v1759_v9  ;;  %v1842_v30 = vunpack.c.h.bf16 %v1759_v9 }
 0x1bc   : > { %v5012_v60 = vpop.eup %5011  ;;  %v1843_v22 = vunpack.c.l.bf16 %v1760_v31  ;;  %v1844_v29 = vunpack.c.h.bf16 %v1760_v31  ;;  %8731 = vst [vmem:[#allocation60_spill] sm:$0xff] %v7165_v38  ;;  %v988_v15 = vsel %vm7148_vm3, %v6772_v49, %v6841_v21  ;;  %v1761_v63 = vxor.u32 2147516416, %v7165_v38 }
 0x1bd   : > { %v7171_v32 = vpack.c.bf16 %v5012_v60, %v5010_v35  ;;  %5013 = vpow2.f32 %v2001_v28  ;;  %v2005_v46 = vmul.f32 1.442695, %v1841_v42  ;;  %v2007_v9 = vmul.f32 1.442695, %v1842_v30  ;;  %v8733_v35 = vld [vmem:[#allocation41_spill] sm:$0xff]  ;;  %v8734_v28 = vld [vmem:[#allocation15_spill] sm:$0xff] }
 0x1be   : > { %5015 = vpow2.f32 %v2003_v12  ;;  %v2009_v54 = vmul.f32 1.442695, %v1843_v22  ;;  %v2011_v34 = vmul.f32 1.442695, %v1844_v29  ;;  %v7174_v31 = vadd.f32 1.0, %v2281_v0  ;;  %v8735_v12 = vld [vmem:[#allocation20_spill] sm:$0xff] }
 0x1bf   : > { %v7176_v16 = vadd.f32 1.0, %v2282_v33  ;;  %5017 = vpow2.f32 %v2005_v46  ;;  %v998_v49 = vsel %vm7161_vm4, %v6802_v26, %v6874_v53  ;;  %v1845_v30 = vunpack.c.l.bf16 %v1761_v63  ;;  %v1360_v22 = vpop.f32.mrf.mxu0 }
 0x1c0   : > { %5019 = vpow2.f32 %v2007_v9  ;;  %v1846_v60 = vunpack.c.h.bf16 %v1761_v63  ;;  %v2283_v57 = vunpack.c.l.bf16 %v7154_v62  ;;  %v2284_v52 = vunpack.c.h.bf16 %v7154_v62  ;;  %v1449_v29 = vpop.f32.mrf.mxu1  ;;  %v8737_v9 = vld [vmem:[#allocation36_spill] sm:$0xff] }
 0x1c1   : > { %5021 = vpow2.f32 %v2009_v54  ;;  %v8732_v0 = vsub.f32 %v6077_v8, %v6637_v6  ;;  %vm1005_vm5 = vweird.f32 %v8733_v35  ;;  %vm1006_vm6 = vweird.f32 %v6975_v19 }
 0x1c2   : > { %v2285_v26 = vunpack.c.l.bf16 %v7171_v32  ;;  %5023 = vpow2.f32 %v2011_v34  ;;  %v2013_v53 = vmul.f32 1.442695, %v1845_v30  ;;  %v8736_v63 = vsub.f32 %v8734_v28, %v8735_v12  ;;  %v4578_v34 = vld [vmem:[#allocation8] sm:$0xff]  ;;  %vm7240_vm9 = vmor %vm1005_vm5, %vm1006_vm6 }
 0x1c3   : > { %v1097_v33 = vmul.f32 %v8732_v0, %v988_v15  ;;  %v5014_v4 = vpop.eup %5013  ;;  %v1534_v54 = vadd.f32 %v7114_v18, %v6699_v48  ;;  %v1623_v8 = vadd.f32 %v7116_v10, %v6701_v13  ;;  %v1358_v6 = vadd.f32 %v1357_v23, %v6641_v47  ;;  %v4594_v15 = vld [vmem:[#allocation8 + $0x80] sm:$0xff]  ;;  %3738 = vmatpush.bf16.msrb.mxu0 %v4578_v34 }
 0x1c4   : > { %v1098_v42 = vmul.f32 %v8736_v63, %v998_v49  ;;  %v1447_v62 = vadd.f32 %v1446_v61, %v6647_v1  ;;  %v5016_v46 = vpop.eup %5015  ;;  %vm1015_vm7 = vweird.f32 %v8737_v9  ;;  %vm1016_vm8 = vweird.f32 %v6945_v51  ;;  %v4602_v10 = vld [vmem:[#allocation8 + $0xc0] sm:$0xff]  ;;  %3916 = vmatpush.bf16.msrb.mxu2 %v4594_v15 }
 0x1c5   : > { %v2015_v49 = vmul.f32 1.442695, %v1846_v60  ;;  %v1536_v18 = vadd.f32 %v1535_v5, %v6699_v48  ;;  %v1625_v0 = vadd.f32 %v1624_v3, %v6701_v13  ;;  %v5018_v28 = vpop.eup %5017  ;;  %v2286_v23 = vunpack.c.h.bf16 %v7171_v32  ;;  %4005 = vmatpush.bf16.msrb.mxu3 %v4602_v10  ;;  %vm7256_vm12 = vmor %vm1015_vm7, %vm1016_vm8 }
 0x1c6   : > { %v1116_v30 = vpack.c.bf16 %v1098_v42, %v1097_v33  ;;  %v2206_v61 = vpack.c.bf16 %v5016_v46, %v5014_v4  ;;  %v7205_v12 = vpack.c.bf16 %v1623_v8, %v1534_v54  ;;  %v7207_v63 = vpack.c.bf16 %v1447_v62, %v1358_v6  ;;  %v5020_v21 = vpop.eup %5019  ;;  %v7220_v54 = vpop.f32.mrf.mxu3 }
 0x1c7   : > { %v7209_v50 = vadd.f32 1.0, %v2283_v57  ;;  %v7211_v60 = vadd.f32 1.0, %v2284_v52  ;;  %v7214_v3 = vpack.c.bf16 %v1625_v0, %v1536_v18  ;;  %v5022_v33 = vpop.eup %5021  ;;  %v7216_v32 = vpack.c.bf16 %v5020_v21, %v5018_v28  ;;  %v1538_v57 = vpop.f32.mrf.mxu2  ;;  %v4586_v28 = vld [vmem:[#allocation8 + $0x40] sm:$0xff] }
 0x1c8   : > { %8738 = vst [vmem:[#allocation41_spill] sm:$0xff] %v7205_v12  ;;  %1394 = vmatmul.bf16.gmra.mxu0 %v1116_v30  ;;  %1483 = vmatmul.bf16.gmra.mxu1 %v1116_v30  ;;  %5025 = vpow2.f32 %v2013_v53  ;;  %v1762_v4 = vxor.u32 2147516416, %v7205_v12  ;;  %v5024_v52 = vpop.eup %5023  ;;  %v1763_v6 = vxor.u32 2147516416, %v7207_v63  ;;  %v7225_v21 = vadd.f32 1.0, %v2285_v26  ;;  %v1362_v38 = vpop.f32.mrf.mxu0 }
 0x1c9   : > { %8739 = vst [vmem:[#allocation15_spill] sm:$0xff] %v7207_v63  ;;  %1572 = vmatmul.bf16.gmra.mxu2 %v1116_v30  ;;  %1661 = vmatmul.bf16.gmra.mxu3 %v1116_v30  ;;  %5027 = vpow2.f32 %v2015_v49  ;;  %v1764_v62 = vxor.u32 2147516416, %v7214_v3  ;;  %v7227_v53 = vadd.f32 1.0, %v2286_v23  ;;  %v2287_v15 = vunpack.c.l.bf16 %v2206_v61  ;;  %v1451_v10 = vpop.f32.mrf.mxu1 }
 0x1ca   : > { %8740 = vst [vmem:[#allocation20_spill] sm:$0xff] %v7214_v3  ;;  %v1361_v34 = vadd.f32 %v1360_v22, %v6641_v47  ;;  %v2288_v46 = vunpack.c.h.bf16 %v2206_v61  ;;  %v1847_v30 = vunpack.c.l.bf16 %v1762_v4  ;;  %v1848_v18 = vunpack.c.h.bf16 %v1762_v4  ;;  %3827 = vmatpush.bf16.msrb.mxu1 %v4586_v28  ;;  %v8750_v4 = vld [vmem:[#allocation29_spill] sm:$0xff] }
 0x1cb   : > { %v1849_v0 = vunpack.c.l.bf16 %v1763_v6  ;;  %v2289_v49 = vunpack.c.l.bf16 %v7216_v32  ;;  %v1850_v8 = vunpack.c.h.bf16 %v1763_v6  ;;  %v1851_v42 = vunpack.c.l.bf16 %v1764_v62 }
 0x1cc   : > { %v1450_v5 = vadd.f32 %v1449_v29, %v6647_v1  ;;  %v7232_v26 = vpack.c.bf16 %v5024_v52, %v5022_v33  ;;  %v2017_v23 = vmul.f32 1.442695, %v1847_v30  ;;  %v2019_v29 = vmul.f32 1.442695, %v1848_v18 }
 0x1cd   : > { %v2021_v33 = vmul.f32 1.442695, %v1849_v0  ;;  %v1852_v52 = vunpack.c.h.bf16 %v1764_v62  ;;  %vm1025_vm10 = vweird.f32 %v7002_v7  ;;  %vm1026_vm11 = vweird.f32 %v7037_v27 }
 0x1ce   : > { %v5026_v61 = vpop.eup %5025  ;;  %v7247_v28 = vadd.f32 1.0, %v2287_v15  ;;  %v7249_v3 = vadd.f32 1.0, %v2288_v46  ;;  %v2290_v35 = vunpack.c.h.bf16 %v7216_v32  ;;  %v2023_v22 = vmul.f32 1.442695, %v1850_v8  ;;  %vm7305_vm15 = vmor %vm1025_vm10, %vm1026_vm11 }
 0x1cf   : > { %v5028_v30 = vpop.eup %5027  ;;  %v7260_v62 = vadd.f32 1.0, %v2289_v49  ;;  %5029 = vpow2.f32 %v2017_v23  ;;  %v2025_v0 = vmul.f32 1.442695, %v1851_v42  ;;  %v7262_v6 = vpack.c.bf16 %v1450_v5, %v1361_v34  ;;  %v1540_v12 = vpop.f32.mrf.mxu2  ;;  %v8746_v42 = vld [vmem:[#allocation16_spill] sm:$0xff]  ;;  %v8747_v34 = vld [vmem:[#allocation30_spill] sm:$0xff] }
 0x1d0   : > { %v2291_v15 = vunpack.c.l.bf16 %v7232_v26  ;;  %5031 = vpow2.f32 %v2019_v29  ;;  %v2027_v46 = vmul.f32 1.442695, %v1852_v52  ;;  %v1008_v32 = vsel %vm7240_vm9, %v6975_v19, %v7053_v24  ;;  %v1629_v23 = vpop.f32.mrf.mxu3  ;;  %v1365_v63 = vpop.f32.mrf.mxu0 }
 0x1d1   : > { %8745 = vst [vmem:[#allocation36_spill] sm:$0xff] %v7262_v6  ;;  %v2292_v9 = vunpack.c.h.bf16 %v7232_v26  ;;  %v2209_v8 = vpack.c.bf16 %v5028_v30, %v5026_v61  ;;  %5033 = vpow2.f32 %v2021_v33  ;;  %v1765_v49 = vxor.u32 2147516416, %v7262_v6  ;;  %v8749_v61 = vld [vmem:[#allocation17_spill] sm:$0xff]  ;;  %v1454_v18 = vpop.f32.mrf.mxu1 }
 0x1d2   : > { %5035 = vpow2.f32 %v2023_v22  ;;  %v1018_v5 = vsel %vm7256_vm12, %v6945_v51, %v7021_v37  ;;  %v8748_v29 = vsub.f32 %v8746_v42, %v8747_v34  ;;  %v1539_v19 = vadd.f32 %v1538_v57, %v6699_v48 }
 0x1d3   : > { %5037 = vpow2.f32 %v2025_v0  ;;  %v1853_v24 = vunpack.c.l.bf16 %v1765_v49  ;;  %v1854_v26 = vunpack.c.h.bf16 %v1765_v49  ;;  %v8751_v33 = vsub.f32 %v8749_v61, %v8750_v4 }
 0x1d4   : > { %v1099_v52 = vmul.f32 %v8748_v29, %v1008_v32  ;;  %5039 = vpow2.f32 %v2027_v46  ;;  %v1628_v22 = vadd.f32 %v7220_v54, %v6701_v13  ;;  %v1363_v51 = vadd.f32 %v1362_v38, %v6641_v47 }
 0x1d5   : > { %v1100_v30 = vmul.f32 %v8751_v33, %v1018_v5  ;;  %v1452_v37 = vadd.f32 %v1451_v10, %v6647_v1  ;;  %v5030_v32 = vpop.eup %5029  ;;  %vm1035_vm13 = vweird.f32 %v7013_v45  ;;  %vm1036_vm14 = vweird.f32 %v7057_v2 }
 0x1d6   : > { %v2029_v57 = vmul.f32 1.442695, %v1853_v24  ;;  %v2031_v0 = vmul.f32 1.442695, %v1854_v26  ;;  %v1541_v5 = vadd.f32 %v1540_v12, %v6699_v48  ;;  %v5032_v42 = vpop.eup %5031  ;;  %v7289_v46 = vpack.c.bf16 %v1628_v22, %v1539_v19  ;;  %vm7331_vm0 = vmor %vm1035_vm13, %vm1036_vm14 }
 0x1d7   : > { %v1117_v49 = vpack.c.bf16 %v1100_v30, %v1099_v52  ;;  %v7291_v34 = vpack.c.bf16 %v1452_v37, %v1363_v51  ;;  %v1630_v38 = vadd.f32 %v1629_v23, %v6701_v13  ;;  %v1366_v54 = vadd.f32 %v1365_v63, %v6641_v47  ;;  %v5034_v10 = vpop.eup %5033 }
 0x1d8   : > { %8752 = vst [vmem:[#allocation16_spill] sm:$0xff] %v7289_v46  ;;  %v2293_v29 = vunpack.c.l.bf16 %v2209_v8  ;;  %v2294_v61 = vunpack.c.h.bf16 %v2209_v8  ;;  %5041 = vpow2.f32 %v2029_v57  ;;  %v1455_v24 = vadd.f32 %v1454_v18, %v6647_v1  ;;  %v5036_v52 = vpop.eup %5035 }
 0x1d9   : > { %8753 = vst [vmem:[#allocation30_spill] sm:$0xff] %v7291_v34  ;;  %1399 = vmatmul.bf16.gmra.mxu0 %v1117_v49  ;;  %1488 = vmatmul.bf16.gmra.mxu1 %v1117_v49  ;;  %v7296_v26 = vadd.f32 1.0, %v2290_v35  ;;  %v7298_v12 = vadd.f32 1.0, %v2291_v15  ;;  %5043 = vpow2.f32 %v2031_v0  ;;  %v1766_v23 = vxor.u32 2147516416, %v7289_v46  ;;  %v5038_v19 = vpop.eup %5037  ;;  %v1543_v0 = vpop.f32.mrf.mxu2 }
 0x1da   : > { %1577 = vmatmul.bf16.gmra.mxu2 %v1117_v49  ;;  %1666 = vmatmul.bf16.gmra.mxu3 %v1117_v49  ;;  %v7309_v8 = vadd.f32 1.0, %v2292_v9  ;;  %v2210_v35 = vpack.c.bf16 %v5032_v42, %v5030_v32  ;;  %v2211_v4 = vpack.c.bf16 %v5036_v52, %v5034_v10  ;;  %v1767_v15 = vxor.u32 2147516416, %v7291_v34  ;;  %v5040_v33 = vpop.eup %5039  ;;  %v1632_v32 = vpop.f32.mrf.mxu3 }
 0x1db   : > { %v1855_v30 = vunpack.c.l.bf16 %v1766_v23  ;;  %v1856_v22 = vunpack.c.h.bf16 %v1766_v23  ;;  %v7312_v51 = vpack.c.bf16 %v1630_v38, %v1541_v5  ;;  %v7314_v37 = vpack.c.bf16 %v1455_v24, %v1366_v54 }
 0x1dc   : > { %v7316_v18 = vadd.f32 1.0, %v2293_v29  ;;  %v7318_v7 = vadd.f32 1.0, %v2294_v61  ;;  %v1857_v10 = vunpack.c.l.bf16 %v1767_v15  ;;  %v1028_v5 = vsel %vm7305_vm15, %v7037_v27, %v7127_v14 }
 0x1dd   : > { %8756 = vst [vmem:[#allocation17_spill] sm:$0xff] %v7312_v51  ;;  %v2033_v49 = vmul.f32 1.442695, %v1855_v30  ;;  %v2035_v42 = vmul.f32 1.442695, %v1856_v22  ;;  %v2295_v54 = vunpack.c.l.bf16 %v2210_v35  ;;  %v2296_v29 = vunpack.c.h.bf16 %v2210_v35 }
 0x1de   : > { %8757 = vst [vmem:[#allocation29_spill] sm:$0xff] %v7314_v37  ;;  %v5042_v38 = vpop.eup %5041  ;;  %v1858_v24 = vunpack.c.h.bf16 %v1767_v15  ;;  %v1768_v61 = vxor.u32 2147516416, %v7312_v51  ;;  %v2297_v23 = vunpack.c.l.bf16 %v2211_v4  ;;  %v2298_v57 = vunpack.c.h.bf16 %v2211_v4  ;;  %v1367_v4 = vpop.f32.mrf.mxu0 }
 0x1df   : > { %8758 = vst [vmem:[#allocation61_spill] sm:$0xff] %v7316_v18  ;;  %v5044_v52 = vpop.eup %5043  ;;  %5045 = vpow2.f32 %v2033_v49  ;;  %v2037_v9 = vmul.f32 1.442695, %v1857_v10  ;;  %v2212_v6 = vpack.c.bf16 %v5040_v33, %v5038_v19  ;;  %v7338_v15 = vadd.f32 1.0, %v2295_v54  ;;  %v1456_v49 = vpop.f32.mrf.mxu1 }
 0x1e0   : > { %8759 = vst [vmem:[#allocation62_spill] sm:$0xff] %v7318_v7  ;;  %5047 = vpow2.f32 %v2035_v42  ;;  %v2039_v30 = vmul.f32 1.442695, %v1858_v24  ;;  %v1859_v22 = vunpack.c.l.bf16 %v1768_v61  ;;  %v7335_v14 = vpack.c.bf16 %v5044_v52, %v5042_v38 }
 0x1e1   : > { %5049 = vpow2.f32 %v2037_v9  ;;  %v1860_v35 = vunpack.c.h.bf16 %v1768_v61  ;;  %8762 = vst [vmem:[#allocation63_spill] sm:$0xff] %v7338_v15  ;;  %v7341_v42 = vadd.f32 1.0, %v2296_v29  ;;  %v7343_v45 = vadd.f32 1.0, %v2297_v23 }
 0x1e2   : > { %5051 = vpow2.f32 %v2039_v30  ;;  %v2041_v33 = vmul.f32 1.442695, %v1859_v22  ;;  %v1769_v38 = vxor.u32 2147516416, %v7314_v37  ;;  %v7346_v24 = vadd.f32 1.0, %v2298_v57  ;;  %v8767_v57 = vld [vmem:[#allocation46_spill] sm:$0xff] }
 0x1e3   : > { %8763 = vst [vmem:[#allocation64_spill] sm:$0xff] %v7341_v42  ;;  %v2043_v10 = vmul.f32 1.442695, %v1860_v35  ;;  %v2299_v52 = vunpack.c.l.bf16 %v2212_v6  ;;  %v2300_v9 = vunpack.c.h.bf16 %v2212_v6  ;;  %v1038_v54 = vsel %vm7331_vm0, %v7057_v2, %v7131_v36  ;;  %v1545_v2 = vpop.f32.mrf.mxu2  ;;  %v1634_v36 = vpop.f32.mrf.mxu3 }
 0x1e4   : > { %8764 = vst [vmem:[#allocation65_spill] sm:$0xff] %v7343_v45  ;;  %v2301_v30 = vunpack.c.l.bf16 %v7335_v14  ;;  %v1861_v22 = vunpack.c.l.bf16 %v1769_v38  ;;  %v1862_v29 = vunpack.c.h.bf16 %v1769_v38  ;;  %v8766_v23 = vsub.f32 %v8708_v44, %v6951_v11 }
 0x1e5   : > { %8765 = vst [vmem:[#allocation66_spill] sm:$0xff] %v7346_v24  ;;  %v5046_v61 = vpop.eup %5045  ;;  %5053 = vpow2.f32 %v2041_v33  ;;  %v8768_v63 = vsub.f32 %v8713_v39, %v8767_v57  ;;  %v1544_v46 = vadd.f32 %v1543_v0, %v6699_v48  ;;  %v1633_v27 = vadd.f32 %v1632_v32, %v6701_v13 }
 0x1e6   : > { %v1101_v35 = vmul.f32 %v8766_v23, %v1028_v5  ;;  %v5048_v19 = vpop.eup %5047  ;;  %5055 = vpow2.f32 %v2043_v10  ;;  %v2045_v34 = vmul.f32 1.442695, %v1861_v22  ;;  %v2047_v38 = vmul.f32 1.442695, %v1862_v29 }
 0x1e7   : > { %v1102_v6 = vmul.f32 %v8768_v63, %v1038_v54  ;;  %v5050_v51 = vpop.eup %5049  ;;  %v1368_v42 = vadd.f32 %v1367_v4, %v6641_v47  ;;  %v2214_v44 = vpack.c.bf16 %v5048_v19, %v5046_v61  ;;  %v7362_v33 = vpack.c.bf16 %v1633_v27, %v1544_v46 }
 0x1e8   : > { %v5052_v11 = vpop.eup %5051  ;;  %v1457_v39 = vadd.f32 %v1456_v49, %v6647_v1  ;;  %v7365_v63 = vadd.f32 1.0, %v2299_v52  ;;  %v2302_v0 = vunpack.c.h.bf16 %v7335_v14  ;;  %v1546_v32 = vadd.f32 %v1545_v2, %v6699_v48  ;;  %v1370_v14 = vpop.f32.mrf.mxu0 }
 0x1e9   : > { %v1118_v5 = vpack.c.bf16 %v1102_v6, %v1101_v35  ;;  %8769 = vst [vmem:[#allocation46_spill] sm:$0xff] %v7362_v33  ;;  %v1635_v54 = vadd.f32 %v1634_v36, %v6701_v13  ;;  %v7370_v10 = vadd.f32 1.0, %v2300_v9  ;;  %v2215_v22 = vpack.c.bf16 %v5052_v11, %v5050_v51 }
 0x1ea   : > { %8770 = vst [vmem:[#allocation67_spill] sm:$0xff] %v7365_v63  ;;  %5057 = vpow2.f32 %v2045_v34  ;;  %v1770_v4 = vxor.u32 2147516416, %v7362_v33  ;;  %v7373_v46 = vadd.f32 1.0, %v2301_v30  ;;  %v2303_v61 = vunpack.c.l.bf16 %v2214_v44  ;;  %v1459_v34 = vpop.f32.mrf.mxu1 }
 0x1eb   : > { %8771 = vst [vmem:[#allocation68_spill] sm:$0xff] %v7370_v10  ;;  %1404 = vmatmul.bf16.gmra.mxu0 %v1118_v5  ;;  %1493 = vmatmul.bf16.gmra.mxu1 %v1118_v5  ;;  %5059 = vpow2.f32 %v2047_v38  ;;  %v5054_v52 = vpop.eup %5053  ;;  %v7377_v51 = vpack.c.bf16 %v1457_v39, %v1368_v42  ;;  %v7379_v35 = vadd.f32 1.0, %v2302_v0  ;;  %v2304_v30 = vunpack.c.h.bf16 %v2214_v44 }
 0x1ec   : > { %8772 = vst [vmem:[#allocation69_spill] sm:$0xff] %v7373_v46  ;;  %1582 = vmatmul.bf16.gmra.mxu2 %v1118_v5  ;;  %1671 = vmatmul.bf16.gmra.mxu3 %v1118_v5  ;;  %v1863_v9 = vunpack.c.l.bf16 %v1770_v4  ;;  %v1864_v29 = vunpack.c.h.bf16 %v1770_v4  ;;  %v5056_v23 = vpop.eup %5055  ;;  %v7382_v6 = vpack.c.bf16 %v1635_v54, %v1546_v32  ;;  %v2305_v27 = vunpack.c.l.bf16 %v2215_v22  ;;  %v1637_v32 = vpop.f32.mrf.mxu3 }
 0x1ed   : > { %8773 = vst [vmem:[#allocation70_spill] sm:$0xff] %v7377_v51  ;;  %v1371_v38 = vadd.f32 %v1370_v14, %v6641_v47  ;;  %v1771_v11 = vxor.u32 2147516416, %v7377_v51  ;;  %v1460_v42 = vadd.f32 %v1459_v34, %v6647_v1  ;;  %v8776_v39 = vunpack.c.h.bf16 %v6852_v17 }
 0x1ee   : > { %8774 = vst [vmem:[#allocation71_spill] sm:$0xff] %v7379_v35  ;;  %v2049_v2 = vmul.f32 1.442695, %v1863_v9  ;;  %v2051_v36 = vmul.f32 1.442695, %v1864_v29  ;;  %v1772_v5 = vxor.u32 2147516416, %v7382_v6  ;;  %v2306_v4 = vunpack.c.h.bf16 %v2215_v22 }
 0x1ef   : > { %8775 = vst [vmem:[#allocation72_spill] sm:$0xff] %v7382_v6  ;;  %5061 = vrcp.f32 %v8776_v39  ;;  %v7390_v44 = vadd.f32 1.0, %v2303_v61  ;;  %v2216_v9 = vpack.c.bf16 %v5056_v23, %v5054_v52  ;;  %v1865_v14 = vunpack.c.l.bf16 %v1771_v11  ;;  %v1548_v39 = vpop.f32.mrf.mxu2 }
 0x1f0   : > { %v5058_v0 = vpop.eup %5057  ;;  %5063 = vpow2.f32 %v2049_v2  ;;  %v1866_v29 = vunpack.c.h.bf16 %v1771_v11  ;;  %v1867_v57 = vunpack.c.l.bf16 %v1772_v5  ;;  %v1868_v49 = vunpack.c.h.bf16 %v1772_v5 }
 0x1f1   : > { %8777 = vst [vmem:[#allocation73_spill] sm:$0xff] %v7390_v44  ;;  %v5060_v54 = vpop.eup %5059  ;;  %5065 = vpow2.f32 %v2051_v36  ;;  %v7393_v19 = vpack.c.bf16 %v1460_v42, %v1371_v38  ;;  %v8779_v34 = vunpack.c.l.bf16 %v6852_v17  ;;  %v7397_v37 = vadd.f32 1.0, %v2304_v30  ;;  %v8783_v17 = vld [vmem:[#allocation31_spill] sm:$0xff] }
 0x1f2   : > { %v7399_v61 = vadd.f32 1.0, %v2305_v27  ;;  %v2053_v22 = vmul.f32 1.442695, %v1865_v14  ;;  %v2055_v2 = vmul.f32 1.442695, %v1866_v29  ;;  %v2217_v33 = vpack.c.bf16 %v5060_v54, %v5058_v0  ;;  %v8784_v29 = vld [vmem:[#allocation22_spill] sm:$0xff]  ;;  %v1461_v44 = vpop.f32.mrf.mxu1 }
 0x1f3   : > { %8778 = vst [vmem:[#allocation74_spill] sm:$0xff] %v7393_v19  ;;  %5067 = vrcp.f32 %v8779_v34  ;;  %v2057_v52 = vmul.f32 1.442695, %v1867_v57  ;;  %v2059_v23 = vmul.f32 1.442695, %v1868_v49  ;;  %v1773_v36 = vxor.u32 2147516416, %v7393_v19 }
 0x1f4   : > { %8780 = vst [vmem:[#allocation75_spill] sm:$0xff] %v7397_v37  ;;  %v7402_v5 = vadd.f32 1.0, %v2306_v4  ;;  %v2307_v38 = vunpack.c.l.bf16 %v2216_v9  ;;  %5069 = vpow2.f32 %v2053_v22  ;;  %v2596_v42 = vunpack.c.h.bf16 %v8783_v17  ;;  %v1372_v37 = vpop.f32.mrf.mxu0 }
 0x1f5   : > { %8781 = vst [vmem:[#allocation76_spill] sm:$0xff] %v7399_v61  ;;  %v5062_v11 = vpop.eup %5061  ;;  %v2308_v30 = vunpack.c.h.bf16 %v2216_v9  ;;  %5071 = vpow2.f32 %v2055_v2  ;;  %v1869_v27 = vunpack.c.l.bf16 %v1773_v36  ;;  %v1870_v6 = vunpack.c.h.bf16 %v1773_v36  ;;  %v8786_v2 = vld [vmem:[#allocation23_spill] sm:$0xff] }
 0x1f6   : > { %8782 = vst [vmem:[#allocation77_spill] sm:$0xff] %v7402_v5  ;;  %v5064_v34 = vpop.eup %5063  ;;  %5073 = vpow2.f32 %v2057_v52  ;;  %v2592_v0 = vmul.f32 %v5062_v11, %v8784_v29  ;;  %v1549_v49 = vadd.f32 %v1548_v39, %v6699_v48  ;;  %v1638_v57 = vadd.f32 %v1637_v32, %v6701_v13 }
 0x1f7   : > { %v5066_v14 = vpop.eup %5065  ;;  %v2309_v4 = vunpack.c.l.bf16 %v2217_v33  ;;  %v2310_v51 = vunpack.c.h.bf16 %v2217_v33  ;;  %5075 = vpow2.f32 %v2059_v23  ;;  %v2597_v22 = vunpack.c.l.bf16 %v8783_v17 }
 0x1f8   : > { %v7409_v9 = vadd.f32 1.0, %v2307_v38  ;;  %5077 = vrcp.f32 %v2596_v42  ;;  %v7412_v52 = vpack.c.bf16 %v1638_v57, %v1549_v49  ;;  %v7414_v11 = vadd.f32 1.0, %v2308_v30  ;;  %v1550_v30 = vpop.f32.mrf.mxu2  ;;  %v1639_v49 = vpop.f32.mrf.mxu3 }
 0x1f9   : > { %v5068_v54 = vpop.eup %5067  ;;  %v2218_v39 = vpack.c.bf16 %v5066_v14, %v5064_v34  ;;  %v2061_v5 = vmul.f32 1.442695, %v1869_v27  ;;  %v2063_v32 = vmul.f32 1.442695, %v1870_v6  ;;  %v1373_v23 = vadd.f32 %v1372_v37, %v6641_v47 }
 0x1fa   : > { %8785 = vst [vmem:[#allocation31_spill] sm:$0xff] %v7409_v9  ;;  %v2594_v36 = vmul.f32 %v5068_v54, %v8786_v2  ;;  %v5070_v61 = vpop.eup %5069  ;;  %v1774_v33 = vxor.u32 2147516416, %v7412_v52  ;;  %v1462_v17 = vadd.f32 %v1461_v44, %v6647_v1  ;;  %v7419_v9 = vadd.f32 1.0, %v2309_v4 }
 0x1fb   : > { %8787 = vst [vmem:[#allocation22_spill] sm:$0xff] %v7412_v52  ;;  %v5072_v38 = vpop.eup %5071  ;;  %v7421_v54 = vadd.f32 1.0, %v2310_v51  ;;  %5079 = vrcp.f32 %v2597_v22  ;;  %v2311_v37 = vunpack.c.l.bf16 %v2218_v39  ;;  %v8791_v51 = vld [vmem:[#allocation21_spill] sm:$0xff]  ;;  %v1551_v22 = vadd.f32 %v1550_v30, %v6699_v48  ;;  %v8796_v30 = vld [vmem:[#allocation38_spill] sm:$0xff] }
 0x1fc   : > { %8788 = vst [vmem:[#allocation23_spill] sm:$0xff] %v7414_v11  ;;  %v2595_v35 = vpack.c.bf16 %v2592_v0, %v2594_v36  ;;  %v5074_v34 = vpop.eup %5073  ;;  %v7424_v27 = vpack.c.bf16 %v5072_v38, %v5070_v61  ;;  %v1871_v0 = vunpack.c.l.bf16 %v1774_v33  ;;  %v2312_v36 = vunpack.c.h.bf16 %v2218_v39 }
 0x1fd   : > { %8789 = vst [vmem:[#allocation78_spill] sm:$0xff] %v7419_v9  ;;  %v5076_v57 = vpop.eup %5075  ;;  %5081 = vpow2.f32 %v2061_v5  ;;  %v1872_v44 = vunpack.c.h.bf16 %v1774_v33  ;;  %v7428_v42 = vpack.c.bf16 %v1462_v17, %v1373_v23  ;;  %v8794_v61 = vunpack.c.h.bf16 %v8791_v51  ;;  %v8801_v5 = vld [vmem:[#allocation33_spill] sm:$0xff] }
 0x1fe   : > { %8790 = vst [vmem:[#allocation79_spill] sm:$0xff] %v7421_v54  ;;  %v3155_v6 = vunpack.c.l.bf16 %v2595_v35  ;;  %v3156_v14 = vunpack.c.h.bf16 %v2595_v35  ;;  %v5078_v4 = vpop.eup %5077  ;;  %5083 = vpow2.f32 %v2063_v32  ;;  %v8792_v54 = vunpack.c.l.bf16 %v8791_v51  ;;  %v8797_v51 = vld [vmem:[#allocation39_spill] sm:$0xff] }
 0x1ff   : > { %8793 = vst [vmem:[#allocation21_spill] sm:$0xff] %v7428_v42  ;;  %v2065_v35 = vmul.f32 1.442695, %v1871_v0  ;;  %v2067_v11 = vmul.f32 1.442695, %v1872_v44  ;;  %v1640_v46 = vadd.f32 %v1639_v49, %v6701_v13  ;;  %v2313_v39 = vunpack.c.l.bf16 %v7424_v27  ;;  %v1375_v0 = vpop.f32.mrf.mxu0  ;;  %v1464_v44 = vpop.f32.mrf.mxu1 }
 0x200   : > { %v3283_v9 = vmul.f32 %v3155_v6, %v8792_v54  ;;  %v3284_v38 = vmul.f32 %v3156_v14, %v8794_v61  ;;  %v2599_v32 = vmul.f32 %v5078_v4, %v8784_v29  ;;  %v7438_v23 = vadd.f32 1.0, %v2311_v37 }
 0x201   : > { %v5080_v54 = vpop.eup %5079  ;;  %v2220_v17 = vpack.c.bf16 %v5076_v57, %v5074_v34  ;;  %v7442_v61 = vadd.f32 1.0, %v2312_v36  ;;  %5085 = vpow2.f32 %v2065_v35  ;;  %v2314_v33 = vunpack.c.h.bf16 %v7424_v27  ;;  %v8802_v27 = vld [vmem:[#allocation35_spill] sm:$0xff] }
 0x202   : > { %8795 = vst [vmem:[#allocation80_spill] sm:$0xff] %v7438_v23  ;;  %v3407_v6 = vpack.c.bf16 %v3283_v9, %v8796_v30  ;;  %v3408_v14 = vpack.c.bf16 %v3284_v38, %v8797_v51  ;;  %v2601_v49 = vmul.f32 %v5080_v54, %v8786_v2  ;;  %5087 = vpow2.f32 %v2067_v11 }
 0x203   : > { %8798 = vst [vmem:[#allocation38_spill] sm:$0xff] %v7442_v61  ;;  %v5082_v4 = vpop.eup %5081  ;;  %v1775_v34 = vxor.u32 2147516416, %v7428_v42  ;;  %v7448_v9 = vpack.c.bf16 %v1640_v46, %v1551_v22  ;;  %v7450_v37 = vadd.f32 1.0, %v2313_v39  ;;  %v1376_v38 = vadd.f32 %v1375_v0, %v6641_v47  ;;  %v8804_v0 = vld [vmem:[#allocation24_spill] sm:$0xff] }
 0x204   : > { %3739 = vmatmul.bf16.vlgmr.msrb.gmra.mxu0 %v3407_v6  ;;  %3828 = vmatmul.bf16.vlgmr.msrb.gmra.mxu1 %v3408_v14  ;;  %v5084_v57 = vpop.eup %5083  ;;  %v2602_v36 = vpack.c.bf16 %v2599_v32, %v2601_v49  ;;  %v1465_v35 = vadd.f32 %v1464_v44, %v6647_v1  ;;  %v2315_v54 = vunpack.c.l.bf16 %v2220_v17  ;;  %v2513_v6 = vpack.c.bf16 %v8802_v27, %v8801_v5  ;;  %v8807_v27 = vld [vmem:[#allocation48_spill] sm:$0xff] }
 0x205   : > { %8799 = vst [vmem:[#allocation39_spill] sm:$0xff] %v7448_v9  ;;  %v1873_v30 = vunpack.c.l.bf16 %v1775_v34  ;;  %v1874_v51 = vunpack.c.h.bf16 %v1775_v34  ;;  %v1776_v52 = vxor.u32 2147516416, %v7448_v9  ;;  %v2316_v22 = vunpack.c.h.bf16 %v2220_v17 }
 0x206   : > { %8800 = vst [vmem:[#allocation81_spill] sm:$0xff] %v7450_v37  ;;  %v3157_v14 = vunpack.c.l.bf16 %v2602_v36  ;;  %v3158_v11 = vunpack.c.h.bf16 %v2602_v36  ;;  %v7457_v46 = vpack.c.bf16 %v1465_v35, %v1376_v38  ;;  %v2221_v39 = vpack.c.bf16 %v5084_v57, %v5082_v4  ;;  %v8808_v38 = vld [vmem:[#allocation49_spill] sm:$0xff]  ;;  %v8809_v4 = vld [vmem:[#allocation40_spill] sm:$0xff] }
 0x207   : > { %v2069_v19 = vmul.f32 1.442695, %v1873_v30  ;;  %v2071_v32 = vmul.f32 1.442695, %v1874_v51  ;;  %v5086_v49 = vpop.eup %5085  ;;  %v8805_v42 = vunpack.c.l.bf16 %v8804_v0  ;;  %v8806_v61 = vunpack.c.h.bf16 %v8804_v0  ;;  %v8810_v30 = vld [vmem:[#allocation42_spill] sm:$0xff] }
 0x208   : > { %8803 = vst [vmem:[#allocation33_spill] sm:$0xff] %v7457_v46  ;;  %v1875_v23 = vunpack.c.l.bf16 %v1776_v52  ;;  %v1876_v37 = vunpack.c.h.bf16 %v1776_v52  ;;  %v5088_v5 = vpop.eup %5087  ;;  %v1777_v36 = vxor.u32 2147516416, %v7457_v46  ;;  %v2515_v35 = vpack.c.bf16 %v8808_v38, %v8807_v27 }
 0x209   : > { %v3285_v44 = vmul.f32 %v3157_v14, %v8805_v42  ;;  %v3286_v34 = vmul.f32 %v3158_v11, %v8806_v61  ;;  %5089 = vpow2.f32 %v2069_v19  ;;  %v2603_v17 = vunpack.c.h.bf16 %v2513_v6 }
 0x20a   : > { %5091 = vpow2.f32 %v2071_v32  ;;  %v2073_v9 = vmul.f32 1.442695, %v1875_v23  ;;  %v7468_v42 = vadd.f32 1.0, %v2314_v33  ;;  %v2317_v14 = vunpack.c.l.bf16 %v2221_v39  ;;  %v1553_v23 = vpop.f32.mrf.mxu2 }
 0x20b   : > { %v3409_v57 = vpack.c.bf16 %v3285_v44, %v8809_v4  ;;  %v3410_v51 = vpack.c.bf16 %v3286_v34, %v8810_v30  ;;  %v2075_v61 = vmul.f32 1.442695, %v1876_v37  ;;  %v1877_v11 = vunpack.c.l.bf16 %v1777_v36  ;;  %v8815_v4 = vld [vmem:[#allocation43_spill] sm:$0xff]  ;;  %v1642_v30 = vpop.f32.mrf.mxu3 }
 0x20c   : > { %8811 = vst [vmem:[#allocation35_spill] sm:$0xff] %v7468_v42  ;;  %v2318_v52 = vunpack.c.h.bf16 %v2221_v39  ;;  %v2222_v19 = vpack.c.bf16 %v5088_v5, %v5086_v49  ;;  %5093 = vpow2.f32 %v2073_v9  ;;  %v1878_v0 = vunpack.c.h.bf16 %v1777_v36  ;;  %v8816_v49 = vld [vmem:[#allocation44_spill] sm:$0xff] }
 0x20d   : > { %3917 = vmatmul.bf16.vlgmr.msrb.gmra.mxu2 %v3409_v57  ;;  %4006 = vmatmul.bf16.vlgmr.msrb.gmra.mxu3 %v3410_v51  ;;  %v7470_v10 = vadd.f32 1.0, %v2315_v54  ;;  %5095 = vpow2.f32 %v2075_v61  ;;  %v2077_v27 = vmul.f32 1.442695, %v1877_v11  ;;  %v2604_v44 = vunpack.c.l.bf16 %v2513_v6  ;;  %v8818_v6 = vld [vmem:[#allocation50_spill] sm:$0xff] }
 0x20e   : > { %v7472_v38 = vadd.f32 1.0, %v2316_v22  ;;  %v2079_v32 = vmul.f32 1.442695, %v1878_v0  ;;  %5097 = vrcp.f32 %v2603_v17  ;;  %v2617_v33 = vunpack.c.h.bf16 %v2515_v35  ;;  %v8819_v22 = vld [vmem:[#allocation18_spill] sm:$0xff] }
 0x20f   : > { %8812 = vst [vmem:[#allocation24_spill] sm:$0xff] %v7470_v10  ;;  %v5090_v34 = vpop.eup %5089  ;;  %v7474_v37 = vadd.f32 1.0, %v2317_v14  ;;  %5099 = vpow2.f32 %v2077_v27  ;;  %v2618_v39 = vunpack.c.l.bf16 %v2515_v35  ;;  %v2514_v9 = vpack.c.bf16 %v8816_v49, %v8815_v4  ;;  %v1377_v27 = vpop.f32.mrf.mxu0 }
 0x210   : > { %8813 = vst [vmem:[#allocation48_spill] sm:$0xff] %v7472_v38  ;;  %v5092_v5 = vpop.eup %5091  ;;  %v7478_v54 = vadd.f32 1.0, %v2318_v52  ;;  %v2319_v36 = vunpack.c.l.bf16 %v2222_v19  ;;  %5101 = vpow2.f32 %v2079_v32  ;;  %v2516_v57 = vpack.c.bf16 %v8819_v22, %v8818_v6  ;;  %v1466_v52 = vpop.f32.mrf.mxu1 }
 0x211   : > { %8814 = vst [vmem:[#allocation49_spill] sm:$0xff] %v7474_v37  ;;  %v7482_v17 = vpack.c.bf16 %v5092_v5, %v5090_v34  ;;  %5103 = vrcp.f32 %v2604_v44  ;;  %v2610_v51 = vunpack.c.h.bf16 %v2514_v9  ;;  %v2611_v14 = vunpack.c.l.bf16 %v2514_v9 }
 0x212   : > { %8817 = vst [vmem:[#allocation40_spill] sm:$0xff] %v7478_v54  ;;  %v5094_v61 = vpop.eup %5093  ;;  %v2320_v11 = vunpack.c.h.bf16 %v2222_v19  ;;  %5105 = vrcp.f32 %v2617_v33  ;;  %v2624_v35 = vunpack.c.h.bf16 %v2516_v57  ;;  %v1554_v0 = vadd.f32 %v1553_v23, %v6699_v48 }
 0x213   : > { %v5096_v4 = vpop.eup %5095  ;;  %5107 = vrcp.f32 %v2618_v39  ;;  %v2625_v49 = vunpack.c.l.bf16 %v2516_v57  ;;  %v1643_v6 = vadd.f32 %v1642_v30, %v6701_v13  ;;  %v7487_v5 = vadd.f32 1.0, %v2319_v36 }
 0x214   : > { %v5098_v34 = vpop.eup %5097  ;;  %v2321_v44 = vunpack.c.l.bf16 %v7482_v17  ;;  %5109 = vrcp.f32 %v2610_v51  ;;  %v7491_v9 = vpack.c.bf16 %v5096_v4, %v5094_v61  ;;  %v1378_v23 = vadd.f32 %v1377_v27, %v6641_v47  ;;  %v8824_v61 = vld [vmem:[#allocation28_spill] sm:$0xff] }
 0x215   : > { %8820 = vst [vmem:[#allocation42_spill] sm:$0xff] %v7487_v5  ;;  %v5100_v33 = vpop.eup %5099  ;;  %5111 = vrcp.f32 %v2611_v14  ;;  %v1467_v22 = vadd.f32 %v1466_v52, %v6647_v1  ;;  %v7495_v57 = vadd.f32 1.0, %v2320_v11  ;;  %v2606_v30 = vmul.f32 %v5098_v34, %v8784_v29  ;;  %v8823_v5 = vld [vmem:[#allocation27_spill] sm:$0xff] }
 0x216   : > { %v5102_v39 = vpop.eup %5101  ;;  %5113 = vrcp.f32 %v2624_v35  ;;  %v7498_v36 = vpack.c.bf16 %v1643_v6, %v1554_v0  ;;  %v3035_v19 = vunpack.c.l.bf16 %v8823_v5  ;;  %v3036_v51 = vunpack.c.h.bf16 %v8823_v5  ;;  %v1555_v35 = vpop.f32.mrf.mxu2 }
 0x217   : > { %8821 = vst [vmem:[#allocation43_spill] sm:$0xff] %v7495_v57  ;;  %v5104_v32 = vpop.eup %5103  ;;  %5115 = vrcp.f32 %v2625_v49  ;;  %v7507_v6 = vadd.f32 1.0, %v2321_v44  ;;  %v7511_v49 = vpack.c.bf16 %v1467_v22, %v1378_v23  ;;  %v7515_v38 = vpack.c.bf16 %v5102_v39, %v5100_v33  ;;  %v8827_v33 = vld [vmem:[#allocation25_spill] sm:$0xff]  ;;  %v1380_v18 = vpop.f32.mrf.mxu0 }
 0x218   : > { %8822 = vst [vmem:[#allocation44_spill] sm:$0xff] %v7498_v36  ;;  %v5106_v4 = vpop.eup %5105  ;;  %v2608_v52 = vmul.f32 %v5104_v32, %v8786_v2  ;;  %v1778_v34 = vxor.u32 2147516416, %v7498_v36  ;;  %v8828_v39 = vunpack.c.l.bf16 %v8827_v33 }
 0x219   : > { %v5108_v0 = vpop.eup %5107  ;;  %8825 = vst [vmem:[#allocation50_spill] sm:$0xff] %v7507_v6  ;;  %v2620_v5 = vmul.f32 %v5106_v4, %v8784_v29  ;;  %v1556_v6 = vadd.f32 %v1555_v35, %v6699_v48  ;;  %v1779_v42 = vxor.u32 2147516416, %v7511_v49  ;;  %v8829_v35 = vunpack.c.h.bf16 %v8827_v33 }
 0x21a   : > { %8826 = vst [vmem:[#allocation18_spill] sm:$0xff] %v7511_v49  ;;  %v5110_v14 = vpop.eup %5109  ;;  %v2609_v57 = vpack.c.bf16 %v2606_v30, %v2608_v52  ;;  %v2622_v27 = vmul.f32 %v5108_v0, %v8786_v2  ;;  %v1879_v54 = vunpack.c.l.bf16 %v1778_v34  ;;  %v1880_v32 = vunpack.c.h.bf16 %v1778_v34 }
 0x21b   : > { %v5112_v37 = vpop.eup %5111  ;;  %v2613_v44 = vmul.f32 %v5110_v14, %v8784_v29 }
 0x21c   : > { %v5114_v46 = vpop.eup %5113  ;;  %v2623_v10 = vpack.c.bf16 %v2620_v5, %v2622_v27  ;;  %v3159_v4 = vunpack.c.l.bf16 %v2609_v57  ;;  %v3160_v23 = vunpack.c.h.bf16 %v2609_v57  ;;  %v2615_v22 = vmul.f32 %v5112_v37, %v8786_v2  ;;  %v1644_v27 = vpop.f32.mrf.mxu3 }
 0x21d   : > { %v5116_v30 = vpop.eup %5115  ;;  %v2627_v52 = vmul.f32 %v5114_v46, %v8784_v29  ;;  %v2081_v0 = vmul.f32 1.442695, %v1879_v54  ;;  %v2083_v34 = vmul.f32 1.442695, %v1880_v32  ;;  %v1881_v37 = vunpack.c.l.bf16 %v1779_v42 }
 0x21e   : > { %v3163_v11 = vunpack.c.l.bf16 %v2623_v10  ;;  %v3287_v63 = vmul.f32 %v3159_v4, %v8828_v39  ;;  %v3164_v14 = vunpack.c.h.bf16 %v2623_v10  ;;  %v3288_v15 = vmul.f32 %v3160_v23, %v8829_v35  ;;  %v1469_v4 = vpop.f32.mrf.mxu1 }
 0x21f   : > { %v2616_v5 = vpack.c.bf16 %v2613_v44, %v2615_v22  ;;  %v2629_v57 = vmul.f32 %v5116_v30, %v8786_v2  ;;  %5117 = vpow2.f32 %v2081_v0  ;;  %v1882_v54 = vunpack.c.h.bf16 %v1779_v42  ;;  %v8830_v22 = vld [vmem:[#allocation26_spill] sm:$0xff] }
 0x220   : > { %v3291_v24 = vmul.f32 %v3163_v11, %v3035_v19  ;;  %v3292_v46 = vmul.f32 %v3164_v14, %v3036_v51  ;;  %5119 = vpow2.f32 %v2083_v34  ;;  %v2085_v7 = vmul.f32 1.442695, %v1881_v37  ;;  %v8836_v14 = vld [vmem:[#allocation51_spill] sm:$0xff] }
 0x221   : > { %v2630_v32 = vpack.c.bf16 %v2627_v52, %v2629_v57  ;;  %v3161_v49 = vunpack.c.l.bf16 %v2616_v5  ;;  %v3162_v45 = vunpack.c.h.bf16 %v2616_v5  ;;  %v2087_v33 = vmul.f32 1.442695, %v1882_v54 }
 0x222   : > { %v3411_v10 = vpack.c.bf16 %v3291_v24, %v3287_v63  ;;  %v3412_v39 = vpack.c.bf16 %v3292_v46, %v3288_v15  ;;  %v1645_v23 = vadd.f32 %v1644_v27, %v6701_v13  ;;  %v8831_v30 = vunpack.c.l.bf16 %v8830_v22  ;;  %v8837_v27 = vld [vmem:[#allocation52_spill] sm:$0xff] }
 0x223   : > { %v3165_v44 = vunpack.c.l.bf16 %v2630_v32  ;;  %v3166_v35 = vunpack.c.h.bf16 %v2630_v32  ;;  %v8832_v19 = vunpack.c.h.bf16 %v8830_v22  ;;  %5121 = vpow2.f32 %v2085_v7 }
 0x224   : > { %v3289_v0 = vmul.f32 %v3161_v49, %v8831_v30  ;;  %3744 = vmatmul.bf16.gmra.mxu0 %v3411_v10  ;;  %3833 = vmatmul.bf16.gmra.mxu1 %v3412_v39  ;;  %v7532_v42 = vpack.c.bf16 %v1645_v23, %v1556_v6  ;;  %v1381_v11 = vadd.f32 %v1380_v18, %v6641_v47  ;;  %v8834_v63 = vunpack.c.l.bf16 %v8824_v61  ;;  %v1558_v23 = vpop.f32.mrf.mxu2 }
 0x225   : > { %v3290_v51 = vmul.f32 %v3162_v45, %v8832_v19  ;;  %v1470_v15 = vadd.f32 %v1469_v4, %v6647_v1  ;;  %v5118_v24 = vpop.eup %5117  ;;  %v8835_v34 = vunpack.c.h.bf16 %v8824_v61  ;;  %5123 = vpow2.f32 %v2087_v33 }
 0x226   : > { %8833 = vst [vmem:[#allocation27_spill] sm:$0xff] %v7532_v42  ;;  %v3293_v52 = vmul.f32 %v3165_v44, %v8834_v63  ;;  %v2517_v45 = vpack.c.bf16 %v8837_v27, %v8836_v14  ;;  %v5120_v5 = vpop.eup %5119  ;;  %v8838_v7 = vunpack.c.h.bf16 %v7482_v17  ;;  %v2325_v18 = vunpack.c.l.bf16 %v7515_v38  ;;  %v1647_v44 = vpop.f32.mrf.mxu3 }
 0x227   : > { %v3294_v49 = vmul.f32 %v3166_v35, %v8835_v34  ;;  %v1780_v57 = vxor.u32 2147516416, %v7532_v42  ;;  %v7548_v37 = vpack.c.bf16 %v1470_v15, %v1381_v11  ;;  %v2326_v46 = vunpack.c.h.bf16 %v7515_v38  ;;  %v1382_v14 = vpop.f32.mrf.mxu0 }
 0x228   : > { %v7544_v6 = vadd.f32 1.0, %v8838_v7  ;;  %v3413_v54 = vpack.c.bf16 %v3293_v52, %v3289_v0  ;;  %v2631_v32 = vunpack.c.h.bf16 %v2517_v45  ;;  %v8840_v4 = vunpack.c.l.bf16 %v7491_v9 }
 0x229   : > { %8839 = vst [vmem:[#allocation28_spill] sm:$0xff] %v7548_v37  ;;  %v3414_v61 = vpack.c.bf16 %v3294_v49, %v3290_v51  ;;  %v1883_v39 = vunpack.c.l.bf16 %v1780_v57  ;;  %v1884_v33 = vunpack.c.h.bf16 %v1780_v57  ;;  %v1781_v17 = vxor.u32 2147516416, %v7548_v37  ;;  %v5122_v19 = vpop.eup %5121  ;;  %v8843_v57 = vld [vmem:[#allocation55_spill] sm:$0xff] }
 0x22a   : > { %v7553_v10 = vadd.f32 1.0, %v8840_v4  ;;  %v8841_v22 = vunpack.c.h.bf16 %v7491_v9  ;;  %3922 = vmatmul.bf16.gmra.mxu2 %v3413_v54  ;;  %v2226_v38 = vpack.c.bf16 %v5120_v5, %v5118_v24  ;;  %v2519_v35 = vpack.c.bf16 %v7041_v58, %v7039_v20  ;;  %v1471_v24 = vpop.f32.mrf.mxu1  ;;  %v8844_v4 = vld [vmem:[#allocation37_spill] sm:$0xff] }
 0x22b   : > { %4011 = vmatmul.bf16.gmra.mxu3 %v3414_v61  ;;  %v2089_v51 = vmul.f32 1.442695, %v1883_v39  ;;  %v2091_v11 = vmul.f32 1.442695, %v1884_v33  ;;  %v1885_v15 = vunpack.c.l.bf16 %v1781_v17  ;;  %v1886_v63 = vunpack.c.h.bf16 %v1781_v17  ;;  %v5124_v52 = vpop.eup %5123 }
 0x22c   : > { %v7558_v30 = vadd.f32 1.0, %v8841_v22  ;;  %v7563_v34 = vadd.f32 1.0, %v2325_v18  ;;  %v7565_v49 = vadd.f32 1.0, %v2326_v46  ;;  %5125 = vrcp.f32 %v2631_v32 }
 0x22d   : > { %5127 = vpow2.f32 %v2089_v51  ;;  %v2093_v27 = vmul.f32 1.442695, %v1885_v15  ;;  %v2095_v5 = vmul.f32 1.442695, %v1886_v63  ;;  %v2632_v7 = vunpack.c.l.bf16 %v2517_v45 }
 0x22e   : > { %8842 = vst [vmem:[#allocation25_spill] sm:$0xff] %v7565_v49  ;;  %v2327_v58 = vunpack.c.l.bf16 %v2226_v38  ;;  %5129 = vpow2.f32 %v2091_v11  ;;  %v2645_v20 = vunpack.c.h.bf16 %v2519_v35  ;;  %v2518_v54 = vpack.c.bf16 %v8843_v57, %v7028_v25 }
 0x22f   : > { %v2227_v61 = vpack.c.bf16 %v5124_v52, %v5122_v19  ;;  %5131 = vpow2.f32 %v2093_v27  ;;  %v2646_v18 = vunpack.c.l.bf16 %v2519_v35  ;;  %v2520_v46 = vpack.c.bf16 %v7105_v43, %v7097_v41  ;;  %v1560_v19 = vpop.f32.mrf.mxu2  ;;  %v1649_v41 = vpop.f32.mrf.mxu3 }
 0x230   : > { %5133 = vpow2.f32 %v2095_v5  ;;  %v2638_v33 = vunpack.c.h.bf16 %v2518_v54  ;;  %v2328_v17 = vunpack.c.h.bf16 %v2226_v38  ;;  %v2639_v22 = vunpack.c.l.bf16 %v2518_v54 }
 0x231   : > { %5135 = vrcp.f32 %v2632_v7  ;;  %v7575_v11 = vadd.f32 1.0, %v2327_v58  ;;  %v2652_v25 = vunpack.c.h.bf16 %v2520_v46  ;;  %v1559_v35 = vadd.f32 %v1558_v23, %v6699_v48 }
 0x232   : > { %v5126_v51 = vpop.eup %5125  ;;  %5137 = vrcp.f32 %v2645_v20  ;;  %v2329_v15 = vunpack.c.l.bf16 %v2227_v61  ;;  %v2653_v63 = vunpack.c.l.bf16 %v2520_v46  ;;  %v1648_v52 = vadd.f32 %v1647_v44, %v6701_v13  ;;  %v1385_v46 = vpop.f32.mrf.mxu0 }
 0x233   : > { %8845 = vst [vmem:[#allocation26_spill] sm:$0xff] %v7575_v11  ;;  %v5128_v43 = vpop.eup %5127  ;;  %5139 = vrcp.f32 %v2646_v18  ;;  %v2330_v27 = vunpack.c.h.bf16 %v2227_v61  ;;  %v1383_v5 = vadd.f32 %v1382_v14, %v6641_v47  ;;  %v1472_v7 = vadd.f32 %v1471_v24, %v6647_v1  ;;  %v1474_v14 = vpop.f32.mrf.mxu1 }
 0x234   : > { %v5130_v38 = vpop.eup %5129  ;;  %5141 = vrcp.f32 %v2638_v33  ;;  %v7581_v20 = vpack.c.bf16 %v1648_v52, %v1559_v35  ;;  %v1561_v23 = vadd.f32 %v1560_v19, %v6699_v48  ;;  %v1650_v57 = vadd.f32 %v1649_v41, %v6701_v13  ;;  %v8849_v35 = vld [vmem:[#allocation45_spill] sm:$0xff] }
 0x235   : > { %v5132_v58 = vpop.eup %5131  ;;  %5143 = vrcp.f32 %v2639_v22  ;;  %v7585_v18 = vadd.f32 1.0, %v2328_v17  ;;  %v2634_v44 = vmul.f32 %v5126_v51, %v8784_v29  ;;  %v3044_v61 = vunpack.c.h.bf16 %v8844_v4 }
 0x236   : > { %8846 = vst [vmem:[#allocation51_spill] sm:$0xff] %v7581_v20  ;;  %v5134_v54 = vpop.eup %5133  ;;  %5145 = vrcp.f32 %v2652_v25  ;;  %v7589_v24 = vadd.f32 1.0, %v2329_v15  ;;  %v7591_v22 = vpack.c.bf16 %v5130_v38, %v5128_v43  ;;  %v3045_v19 = vunpack.c.l.bf16 %v8849_v35 }
 0x237   : > { %8847 = vst [vmem:[#allocation52_spill] sm:$0xff] %v7585_v18  ;;  %v5136_v33 = vpop.eup %5135  ;;  %5147 = vrcp.f32 %v2653_v63  ;;  %v7594_v41 = vadd.f32 1.0, %v2330_v27  ;;  %v3046_v51 = vunpack.c.h.bf16 %v8849_v35  ;;  %v1782_v45 = vxor.u32 2147516416, %v7581_v20  ;;  %v8853_v35 = vld [vmem:[#allocation32_spill] sm:$0xff] }
 0x238   : > { %8848 = vst [vmem:[#allocation55_spill] sm:$0xff] %v7589_v24  ;;  %v5138_v52 = vpop.eup %5137  ;;  %v2636_v17 = vmul.f32 %v5136_v33, %v8786_v2  ;;  %v7599_v32 = vpack.c.bf16 %v1472_v7, %v1383_v5  ;;  %v7601_v9 = vpack.c.bf16 %v1650_v57, %v1561_v23  ;;  %v1386_v43 = vadd.f32 %v1385_v46, %v6641_v47 }
 0x239   : > { %8850 = vst [vmem:[#allocation37_spill] sm:$0xff] %v7594_v41  ;;  %v5140_v25 = vpop.eup %5139  ;;  %v1475_v15 = vadd.f32 %v1474_v14, %v6647_v1  ;;  %v2648_v27 = vmul.f32 %v5138_v52, %v8784_v29  ;;  %v1887_v33 = vunpack.c.l.bf16 %v1782_v45  ;;  %v7608_v37 = vpack.c.bf16 %v5134_v54, %v5132_v58 }
 0x23a   : > { %8851 = vst [vmem:[#allocation45_spill] sm:$0xff] %v7599_v32  ;;  %v5142_v63 = vpop.eup %5141  ;;  %v2637_v38 = vpack.c.bf16 %v2634_v44, %v2636_v17  ;;  %v2650_v0 = vmul.f32 %v5140_v25, %v8786_v2  ;;  %v1888_v7 = vunpack.c.h.bf16 %v1782_v45  ;;  %v1783_v42 = vxor.u32 2147516416, %v7599_v32 }
 0x23b   : > { %8852 = vst [vmem:[#allocation82_spill] sm:$0xff] %v7601_v9  ;;  %v5144_v39 = vpop.eup %5143  ;;  %v2641_v5 = vmul.f32 %v5142_v63, %v8784_v29  ;;  %v2097_v17 = vmul.f32 1.442695, %v1887_v33  ;;  %v8854_v58 = vunpack.c.l.bf16 %v8853_v35  ;;  %v8855_v45 = vunpack.c.h.bf16 %v8853_v35 }
 0x23c   : > { %v5146_v23 = vpop.eup %5145  ;;  %v2651_v57 = vpack.c.bf16 %v2648_v27, %v2650_v0  ;;  %v3167_v46 = vunpack.c.l.bf16 %v2637_v38  ;;  %v3168_v36 = vunpack.c.h.bf16 %v2637_v38  ;;  %v2643_v14 = vmul.f32 %v5144_v39, %v8786_v2 }
 0x23d   : > { %v5148_v44 = vpop.eup %5147  ;;  %v2655_v52 = vmul.f32 %v5146_v23, %v8784_v29  ;;  %v2099_v25 = vmul.f32 1.442695, %v1888_v7  ;;  %5149 = vpow2.f32 %v2097_v17  ;;  %v1889_v39 = vunpack.c.l.bf16 %v1783_v42 }
 0x23e   : > { %v3171_v18 = vunpack.c.l.bf16 %v2651_v57  ;;  %v3295_v54 = vmul.f32 %v3167_v46, %v8854_v58  ;;  %v3172_v11 = vunpack.c.h.bf16 %v2651_v57  ;;  %v3296_v63 = vmul.f32 %v3168_v36, %v8855_v45 }
 0x23f   : > { %v2644_v0 = vpack.c.bf16 %v2641_v5, %v2643_v14  ;;  %v2657_v38 = vmul.f32 %v5148_v44, %v8786_v2  ;;  %v8856_v27 = vunpack.c.l.bf16 %v8844_v4  ;;  %5151 = vpow2.f32 %v2099_v25  ;;  %v8857_v5 = vld [vmem:[#allocation34_spill] sm:$0xff] }
 0x240   : > { %v3300_v33 = vmul.f32 %v3172_v11, %v3044_v61  ;;  %v1890_v7 = vunpack.c.h.bf16 %v1783_v42  ;;  %v2101_v49 = vmul.f32 1.442695, %v1889_v39  ;;  %v1784_v36 = vxor.u32 2147516416, %v7601_v9 }
 0x241   : > { %v3299_v23 = vmul.f32 %v3171_v18, %v8856_v27  ;;  %v2658_v32 = vpack.c.bf16 %v2655_v52, %v2657_v38  ;;  %v3169_v41 = vunpack.c.l.bf16 %v2644_v0  ;;  %v3170_v24 = vunpack.c.h.bf16 %v2644_v0 }
 0x242   : > { %v3416_v57 = vpack.c.bf16 %v3300_v33, %v3296_v63  ;;  %v2103_v58 = vmul.f32 1.442695, %v1890_v7  ;;  %v8858_v14 = vunpack.c.l.bf16 %v8857_v5  ;;  %v8859_v4 = vunpack.c.h.bf16 %v8857_v5 }
 0x243   : > { %v3415_v46 = vpack.c.bf16 %v3299_v23, %v3295_v54  ;;  %v3173_v35 = vunpack.c.l.bf16 %v2658_v32  ;;  %v3174_v17 = vunpack.c.h.bf16 %v2658_v32  ;;  %5153 = vpow2.f32 %v2101_v49  ;;  %v5150_v52 = vpop.eup %5149 }
 0x244   : > { %v3297_v44 = vmul.f32 %v3169_v41, %v8858_v14  ;;  %v3298_v18 = vmul.f32 %v3170_v24, %v8859_v4  ;;  %3838 = vmatmul.bf16.gmra.mxu1 %v3416_v57  ;;  %v1891_v42 = vunpack.c.l.bf16 %v1784_v36  ;;  %v1892_v11 = vunpack.c.h.bf16 %v1784_v36 }
 0x245   : > { %3749 = vmatmul.bf16.gmra.mxu0 %v3415_v46  ;;  %v7626_v61 = vpack.c.bf16 %v1475_v15, %v1386_v43  ;;  %v3301_v25 = vmul.f32 %v3173_v35, %v3045_v19  ;;  %v3302_v54 = vmul.f32 %v3174_v17, %v3046_v51  ;;  %5155 = vpow2.f32 %v2103_v58  ;;  %v5152_v63 = vpop.eup %5151  ;;  %v8862_v17 = vld [vmem:[#allocation58_spill] sm:$0xff]  ;;  %v8868_v43 = vld [vmem:[#allocation47_spill] sm:$0xff] }
 0x246   : > { %v2521_v45 = vpack.c.bf16 %v7109_v40, %v7107_v59  ;;  %v2332_v32 = vunpack.c.h.bf16 %v7591_v22  ;;  %v2105_v41 = vmul.f32 1.442695, %v1891_v42  ;;  %v2107_v0 = vmul.f32 1.442695, %v1892_v11 }
 0x247   : > { %8860 = vst [vmem:[#allocation32_spill] sm:$0xff] %v7626_v61  ;;  %v1785_v24 = vxor.u32 2147516416, %v7626_v61  ;;  %v3417_v38 = vpack.c.bf16 %v3301_v25, %v3297_v44  ;;  %v3418_v49 = vpack.c.bf16 %v3302_v54, %v3298_v18  ;;  %v2230_v15 = vpack.c.bf16 %v5152_v63, %v5150_v52  ;;  %v1563_v52 = vpop.f32.mrf.mxu2  ;;  %v1652_v25 = vpop.f32.mrf.mxu3 }
 0x248   : > { %v2523_v27 = vpack.c.bf16 %v7176_v16, %v7174_v31  ;;  %v2333_v59 = vunpack.c.l.bf16 %v7608_v37  ;;  %v2334_v40 = vunpack.c.h.bf16 %v7608_v37  ;;  %5157 = vpow2.f32 %v2105_v41 }
 0x249   : > { %v1893_v19 = vunpack.c.l.bf16 %v1785_v24  ;;  %v1894_v51 = vunpack.c.h.bf16 %v1785_v24  ;;  %3927 = vmatmul.bf16.gmra.mxu2 %v3417_v38  ;;  %4016 = vmatmul.bf16.gmra.mxu3 %v3418_v49  ;;  %v2659_v23 = vunpack.c.h.bf16 %v2521_v45  ;;  %v5154_v33 = vpop.eup %5153  ;;  %5159 = vpow2.f32 %v2107_v0  ;;  %v1476_v24 = vpop.f32.mrf.mxu1 }
 0x24a   : > { %v2660_v57 = vunpack.c.l.bf16 %v2521_v45  ;;  %v8861_v36 = vunpack.c.l.bf16 %v7591_v22  ;;  %v7642_v5 = vadd.f32 1.0, %v2332_v32  ;;  %v2673_v31 = vunpack.c.h.bf16 %v2523_v27 }
 0x24b   : > { %v2109_v7 = vmul.f32 1.442695, %v1893_v19  ;;  %v2111_v46 = vmul.f32 1.442695, %v1894_v51  ;;  %v5156_v58 = vpop.eup %5155  ;;  %5161 = vrcp.f32 %v2659_v23  ;;  %v2335_v16 = vunpack.c.l.bf16 %v2230_v15 }
 0x24c   : > { %v7640_v35 = vadd.f32 1.0, %v8861_v36  ;;  %v2336_v37 = vunpack.c.h.bf16 %v2230_v15  ;;  %v2674_v14 = vunpack.c.l.bf16 %v2523_v27  ;;  %v7644_v44 = vadd.f32 1.0, %v2333_v59  ;;  %v8865_v36 = vld [vmem:[#allocation19_spill] sm:$0xff] }
 0x24d   : > { %5163 = vpow2.f32 %v2109_v7  ;;  %v2522_v4 = vpack.c.bf16 %v8862_v17, %v7137_v56  ;;  %v2524_v18 = vpack.c.bf16 %v7211_v60, %v7209_v50  ;;  %v7650_v22 = vadd.f32 1.0, %v2334_v40  ;;  %v1387_v60 = vpop.f32.mrf.mxu0  ;;  %v8866_v17 = vld [vmem:[#allocation54_spill] sm:$0xff] }
 0x24e   : > { %5165 = vpow2.f32 %v2111_v46  ;;  %v2231_v42 = vpack.c.bf16 %v5156_v58, %v5154_v33  ;;  %v5158_v54 = vpop.eup %5157  ;;  %v7653_v0 = vadd.f32 1.0, %v2335_v16  ;;  %v7655_v56 = vadd.f32 1.0, %v2336_v37 }
 0x24f   : > { %5167 = vrcp.f32 %v2660_v57  ;;  %v2666_v45 = vunpack.c.h.bf16 %v2522_v4  ;;  %v2667_v63 = vunpack.c.l.bf16 %v2522_v4  ;;  %v2680_v32 = vunpack.c.h.bf16 %v2524_v18  ;;  %v5160_v41 = vpop.eup %5159  ;;  %v1565_v61 = vpop.f32.mrf.mxu2 }
 0x250   : > { %5169 = vrcp.f32 %v2673_v31  ;;  %8863 = vst [vmem:[#allocation34_spill] sm:$0xff] %v7655_v56  ;;  %v2681_v49 = vunpack.c.l.bf16 %v2524_v18  ;;  %v1564_v15 = vadd.f32 %v1563_v52, %v6699_v48  ;;  %v1653_v19 = vadd.f32 %v1652_v25, %v6701_v13 }
 0x251   : > { %5171 = vrcp.f32 %v2674_v14  ;;  %v5162_v38 = vpop.eup %5161  ;;  %v2337_v27 = vunpack.c.l.bf16 %v2231_v42  ;;  %v2338_v59 = vunpack.c.h.bf16 %v2231_v42  ;;  %v1388_v7 = vadd.f32 %v1387_v60, %v6641_v47 }
 0x252   : > { %5173 = vrcp.f32 %v2666_v45  ;;  %v2662_v40 = vmul.f32 %v5162_v38, %v8784_v29  ;;  %v7663_v33 = vpack.c.bf16 %v1653_v19, %v1564_v15  ;;  %v1477_v46 = vadd.f32 %v1476_v24, %v6647_v1 }
 0x253   : > { %v7660_v51 = vpop.eup %5163  ;;  %5175 = vrcp.f32 %v2667_v63  ;;  %v7667_v58 = vpack.c.bf16 %v5160_v41, %v5158_v54  ;;  %v3051_v31 = vunpack.c.l.bf16 %v8865_v36  ;;  %v3052_v16 = vunpack.c.h.bf16 %v8865_v36 }
 0x254   : > { %v5166_v23 = vpop.eup %5165  ;;  %5177 = vrcp.f32 %v2680_v32  ;;  %8864 = vst [vmem:[#allocation58_spill] sm:$0xff] %v7663_v33  ;;  %v1786_v42 = vxor.u32 2147516416, %v7663_v33  ;;  %v7675_v25 = vadd.f32 1.0, %v2337_v27  ;;  %v7677_v45 = vadd.f32 1.0, %v2338_v59 }
 0x255   : > { %v5168_v57 = vpop.eup %5167  ;;  %5179 = vrcp.f32 %v2681_v49  ;;  %v7680_v63 = vpack.c.bf16 %v1477_v46, %v1388_v7  ;;  %v2339_v15 = vunpack.c.l.bf16 %v7667_v58  ;;  %v2340_v19 = vunpack.c.h.bf16 %v7667_v58 }
 0x256   : > { %v5170_v37 = vpop.eup %5169  ;;  %v2664_v14 = vmul.f32 %v5168_v57, %v8786_v2  ;;  %v1895_v24 = vunpack.c.l.bf16 %v1786_v42  ;;  %v1896_v38 = vunpack.c.h.bf16 %v1786_v42  ;;  %v8869_v39 = vunpack.c.l.bf16 %v8868_v43 }
 0x257   : > { %v5172_v52 = vpop.eup %5171  ;;  %v2676_v54 = vmul.f32 %v5170_v37, %v8784_v29  ;;  %8867 = vst [vmem:[#allocation19_spill] sm:$0xff] %v7680_v63  ;;  %v1787_v59 = vxor.u32 2147516416, %v7680_v63 }
 0x258   : > { %v5174_v32 = vpop.eup %5173  ;;  %v2665_v41 = vpack.c.bf16 %v2662_v40, %v2664_v14  ;;  %v2678_v60 = vmul.f32 %v5172_v52, %v8786_v2  ;;  %v2113_v52 = vmul.f32 1.442695, %v1895_v24  ;;  %v2115_v42 = vmul.f32 1.442695, %v1896_v38 }
 0x259   : > { %v5176_v49 = vpop.eup %5175  ;;  %v2669_v27 = vmul.f32 %v5174_v32, %v8784_v29  ;;  %v1897_v50 = vunpack.c.l.bf16 %v1787_v59  ;;  %v8870_v32 = vunpack.c.h.bf16 %v8868_v43  ;;  %v2233_v43 = vpack.c.bf16 %v5166_v23, %v7660_v51 }
 0x25a   : > { %v5178_v57 = vpop.eup %5177  ;;  %v2679_v36 = vpack.c.bf16 %v2676_v54, %v2678_v60  ;;  %v3175_v37 = vunpack.c.l.bf16 %v2665_v41  ;;  %v3176_v7 = vunpack.c.h.bf16 %v2665_v41  ;;  %v2671_v46 = vmul.f32 %v5176_v49, %v8786_v2  ;;  %v1654_v54 = vpop.f32.mrf.mxu3 }
 0x25b   : > { %v5180_v40 = vpop.eup %5179  ;;  %v2683_v14 = vmul.f32 %v5178_v57, %v8784_v29  ;;  %5181 = vpow2.f32 %v2113_v52  ;;  %v1898_v49 = vunpack.c.h.bf16 %v1787_v59  ;;  %v2117_v24 = vmul.f32 1.442695, %v1897_v50 }
 0x25c   : > { %v3179_v11 = vunpack.c.l.bf16 %v2679_v36  ;;  %v3303_v58 = vmul.f32 %v3175_v37, %v8869_v39  ;;  %v3180_v18 = vunpack.c.h.bf16 %v2679_v36  ;;  %v3304_v4 = vmul.f32 %v3176_v7, %v8870_v32  ;;  %v1390_v39 = vpop.f32.mrf.mxu0  ;;  %v1479_v36 = vpop.f32.mrf.mxu1 }
 0x25d   : > { %v2672_v60 = vpack.c.bf16 %v2669_v27, %v2671_v46  ;;  %v2685_v41 = vmul.f32 %v5180_v40, %v8786_v2  ;;  %5183 = vpow2.f32 %v2115_v42  ;;  %v2119_v56 = vmul.f32 1.442695, %v1898_v49  ;;  %v8871_v40 = vld [vmem:[#allocation53_spill] sm:$0xff] }
 0x25e   : > { %v3307_v63 = vmul.f32 %v3179_v11, %v3051_v31  ;;  %v3308_v57 = vmul.f32 %v3180_v18, %v3052_v16  ;;  %v1566_v27 = vadd.f32 %v1565_v61, %v6699_v48  ;;  %v8872_v52 = vunpack.c.l.bf16 %v8871_v40 }
 0x25f   : > { %v2686_v38 = vpack.c.bf16 %v2683_v14, %v2685_v41  ;;  %v3177_v20 = vunpack.c.l.bf16 %v2672_v60  ;;  %v3178_v9 = vunpack.c.h.bf16 %v2672_v60  ;;  %5185 = vpow2.f32 %v2117_v24 }
 0x260   : > { %v3419_v37 = vpack.c.bf16 %v3307_v63, %v3303_v58  ;;  %v3420_v7 = vpack.c.bf16 %v3308_v57, %v3304_v4  ;;  %5187 = vpow2.f32 %v2119_v56  ;;  %v1655_v50 = vadd.f32 %v1654_v54, %v6701_v13 }
 0x261   : > { %v3181_v46 = vunpack.c.l.bf16 %v2686_v38  ;;  %v3305_v59 = vmul.f32 %v3177_v20, %v8872_v52  ;;  %v3182_v11 = vunpack.c.h.bf16 %v2686_v38  ;;  %v1391_v31 = vadd.f32 %v1390_v39, %v6641_v47  ;;  %v5182_v51 = vpop.eup %5181 }
 0x262   : > { %3754 = vmatmul.bf16.gmra.mxu0 %v3419_v37  ;;  %3843 = vmatmul.bf16.gmra.mxu1 %v3420_v7  ;;  %v1480_v16 = vadd.f32 %v1479_v36, %v6647_v1  ;;  %v8873_v23 = vunpack.c.l.bf16 %v8866_v17  ;;  %v8874_v61 = vunpack.c.h.bf16 %v8871_v40  ;;  %v8875_v20 = vunpack.c.h.bf16 %v8866_v17 }
 0x263   : > { %v2525_v14 = vpack.c.bf16 %v7227_v53, %v7225_v21  ;;  %v5184_v56 = vpop.eup %5183  ;;  %v7709_v42 = vadd.f32 1.0, %v2339_v15  ;;  %v2341_v58 = vunpack.c.l.bf16 %v2233_v43  ;;  %v7711_v32 = vpack.c.bf16 %v1655_v50, %v1566_v27  ;;  %v1568_v53 = vpop.f32.mrf.mxu2 }
 0x264   : > { %v3309_v4 = vmul.f32 %v3181_v46, %v8873_v23  ;;  %v3306_v18 = vmul.f32 %v3178_v9, %v8874_v61  ;;  %v3310_v63 = vmul.f32 %v3182_v11, %v8875_v20  ;;  %v7713_v54 = vpack.c.bf16 %v1480_v16, %v1391_v31  ;;  %v1657_v15 = vpop.f32.mrf.mxu3 }
 0x265   : > { %8876 = vst [vmem:[#allocation54_spill] sm:$0xff] %v7711_v32  ;;  %v2342_v60 = vunpack.c.h.bf16 %v2233_v43  ;;  %v2687_v57 = vunpack.c.h.bf16 %v2525_v14  ;;  %v7715_v24 = vadd.f32 1.0, %v2340_v19  ;;  %v7717_v9 = vpack.c.bf16 %v5184_v56, %v5182_v51  ;;  %v5186_v38 = vpop.eup %5185 }
 0x266   : > { %8877 = vst [vmem:[#allocation47_spill] sm:$0xff] %v7713_v54  ;;  %v3421_v41 = vpack.c.bf16 %v3309_v4, %v3305_v59  ;;  %v3422_v49 = vpack.c.bf16 %v3310_v63, %v3306_v18  ;;  %v1788_v17 = vxor.u32 2147516416, %v7711_v32  ;;  %v1789_v21 = vxor.u32 2147516416, %v7713_v54  ;;  %v5188_v37 = vpop.eup %5187  ;;  %v8878_v59 = vld [vmem:[#allocation57_spill] sm:$0xff] }
 0x267   : > { %v2688_v43 = vunpack.c.l.bf16 %v2525_v14  ;;  %5189 = vrcp.f32 %v2687_v57  ;;  %v2527_v46 = vpack.c.bf16 %v7296_v26, %v7260_v62  ;;  %v7725_v40 = vadd.f32 1.0, %v2341_v58  ;;  %v1392_v62 = vpop.f32.mrf.mxu0  ;;  %v1481_v26 = vpop.f32.mrf.mxu1 }
 0x268   : > { %3932 = vmatmul.bf16.gmra.mxu2 %v3421_v41  ;;  %4021 = vmatmul.bf16.gmra.mxu3 %v3422_v49  ;;  %v1899_v19 = vunpack.c.l.bf16 %v1788_v17  ;;  %v1900_v7 = vunpack.c.h.bf16 %v1788_v17  ;;  %v1901_v27 = vunpack.c.l.bf16 %v1789_v21  ;;  %v7727_v52 = vadd.f32 1.0, %v2342_v60 }
 0x269   : > { %5191 = vrcp.f32 %v2688_v43  ;;  %v2343_v50 = vunpack.c.l.bf16 %v7717_v9  ;;  %v2235_v31 = vpack.c.bf16 %v5188_v37, %v5186_v38  ;;  %v2701_v20 = vunpack.c.h.bf16 %v2527_v46 }
 0x26a   : > { %v2121_v16 = vmul.f32 1.442695, %v1899_v19  ;;  %v2123_v51 = vmul.f32 1.442695, %v1900_v7  ;;  %v2125_v23 = vmul.f32 1.442695, %v1901_v27  ;;  %v2526_v63 = vpack.c.bf16 %v7249_v3, %v7247_v28 }
 0x26b   : > { %v2528_v14 = vpack.c.bf16 %v7309_v8, %v7298_v12  ;;  %v2344_v58 = vunpack.c.h.bf16 %v7717_v9  ;;  %v1902_v60 = vunpack.c.h.bf16 %v1789_v21  ;;  %v2702_v41 = vunpack.c.l.bf16 %v2527_v46  ;;  %v1570_v9 = vpop.f32.mrf.mxu2 }
 0x26c   : > { %5193 = vpow2.f32 %v2121_v16  ;;  %v7739_v49 = vadd.f32 1.0, %v2343_v50  ;;  %v2345_v57 = vunpack.c.l.bf16 %v2235_v31  ;;  %v2694_v38 = vunpack.c.h.bf16 %v2526_v63  ;;  %v1659_v21 = vpop.f32.mrf.mxu3 }
 0x26d   : > { %v5190_v56 = vpop.eup %5189  ;;  %5195 = vpow2.f32 %v2123_v51  ;;  %v2346_v37 = vunpack.c.h.bf16 %v2235_v31  ;;  %v2695_v19 = vunpack.c.l.bf16 %v2526_v63  ;;  %v1569_v3 = vadd.f32 %v1568_v53, %v6699_v48 }
 0x26e   : > { %v2690_v17 = vmul.f32 %v5190_v56, %v8784_v29  ;;  %5197 = vpow2.f32 %v2125_v23  ;;  %v2708_v12 = vunpack.c.h.bf16 %v2528_v14  ;;  %v1658_v8 = vadd.f32 %v1657_v15, %v6701_v13 }
 0x26f   : > { %v5192_v43 = vpop.eup %5191  ;;  %5199 = vrcp.f32 %v2701_v20  ;;  %v2127_v7 = vmul.f32 1.442695, %v1902_v60  ;;  %v2709_v27 = vunpack.c.l.bf16 %v2528_v14  ;;  %v1393_v46 = vadd.f32 %v1392_v62, %v6641_v47  ;;  %v8881_v62 = vld [vmem:[#allocation59_spill] sm:$0xff] }
 0x270   : > { %v2692_v28 = vmul.f32 %v5192_v43, %v8786_v2  ;;  %5201 = vrcp.f32 %v2702_v41  ;;  %v7746_v31 = vpack.c.bf16 %v1658_v8, %v1569_v3  ;;  %v1482_v53 = vadd.f32 %v1481_v26, %v6647_v1 }
 0x271   : > { %5203 = vrcp.f32 %v2694_v38  ;;  %v7749_v23 = vadd.f32 1.0, %v2344_v58  ;;  %v1571_v15 = vadd.f32 %v1570_v9, %v6699_v48  ;;  %v1660_v20 = vadd.f32 %v1659_v21, %v6701_v13  ;;  %v1484_v38 = vpop.f32.mrf.mxu1 }
 0x272   : > { %v5194_v50 = vpop.eup %5193  ;;  %v2693_v16 = vpack.c.bf16 %v2690_v17, %v2692_v28  ;;  %8879 = vst [vmem:[#allocation53_spill] sm:$0xff] %v7746_v31  ;;  %5205 = vrcp.f32 %v2695_v19  ;;  %v7753_v63 = vadd.f32 1.0, %v2345_v57  ;;  %v7760_v41 = vadd.f32 1.0, %v2346_v37  ;;  %v1395_v17 = vpop.f32.mrf.mxu0 }
 0x273   : > { %v5196_v51 = vpop.eup %5195  ;;  %8880 = vst [vmem:[#allocation57_spill] sm:$0xff] %v7749_v23  ;;  %5207 = vrcp.f32 %v2708_v12  ;;  %v3062_v26 = vunpack.c.h.bf16 %v8881_v62  ;;  %v1790_v58 = vxor.u32 2147516416, %v7746_v31  ;;  %v7764_v3 = vpack.c.bf16 %v1482_v53, %v1393_v46 }
 0x274   : > { %v7755_v14 = vpack.c.bf16 %v5196_v51, %v5194_v50  ;;  %v7758_v60 = vpop.eup %5197  ;;  %5209 = vrcp.f32 %v2709_v27  ;;  %v3183_v57 = vunpack.c.l.bf16 %v2693_v16  ;;  %v3184_v19 = vunpack.c.h.bf16 %v2693_v16 }
 0x275   : > { %v5200_v43 = vpop.eup %5199  ;;  %5211 = vpow2.f32 %v2127_v7  ;;  %8882 = vst [vmem:[#allocation59_spill] sm:$0xff] %v7764_v3  ;;  %v1903_v8 = vunpack.c.l.bf16 %v1790_v58  ;;  %v1904_v9 = vunpack.c.h.bf16 %v1790_v58  ;;  %v7767_v37 = vpack.c.bf16 %v1660_v20, %v1571_v15  ;;  %v8884_v58 = vld [vmem:[#allocation56_spill] sm:$0xff] }
 0x276   : > { %v5202_v28 = vpop.eup %5201  ;;  %v2704_v12 = vmul.f32 %v5200_v43, %v8784_v29  ;;  %v2347_v27 = vunpack.c.l.bf16 %v7755_v14  ;;  %v1396_v51 = vadd.f32 %v1395_v17, %v6641_v47  ;;  %v1485_v7 = vadd.f32 %v1484_v38, %v6647_v1 }
 0x277   : > { %8883 = vst [vmem:[#allocation83_spill] sm:$0xff] %v7767_v37  ;;  %v5204_v21 = vpop.eup %5203  ;;  %v2706_v46 = vmul.f32 %v5202_v28, %v8786_v2  ;;  %v2129_v53 = vmul.f32 1.442695, %v1903_v8  ;;  %v2131_v43 = vmul.f32 1.442695, %v1904_v9  ;;  %v8885_v15 = vunpack.c.l.bf16 %v8884_v58 }
 0x278   : > { %v5206_v61 = vpop.eup %5205  ;;  %v2697_v16 = vmul.f32 %v5204_v21, %v8784_v29  ;;  %v8886_v36 = vunpack.c.h.bf16 %v8884_v58  ;;  %v1791_v17 = vxor.u32 2147516416, %v7764_v3  ;;  %v1792_v28 = vxor.u32 2147516416, %v7767_v37 }
 0x279   : > { %v5208_v4 = vpop.eup %5207  ;;  %v3311_v20 = vmul.f32 %v3183_v57, %v8885_v15  ;;  %v2699_v50 = vmul.f32 %v5206_v61, %v8786_v2  ;;  %v2707_v38 = vpack.c.bf16 %v2704_v12, %v2706_v46  ;;  %5213 = vpow2.f32 %v2129_v53 }
 0x27a   : > { %v3312_v39 = vmul.f32 %v3184_v19, %v8886_v36  ;;  %v5210_v56 = vpop.eup %5209  ;;  %v2711_v18 = vmul.f32 %v5208_v4, %v8784_v29  ;;  %5215 = vpow2.f32 %v2131_v43  ;;  %v1905_v57 = vunpack.c.l.bf16 %v1791_v17 }
 0x27b   : > { %v5212_v8 = vpop.eup %5211  ;;  %v2700_v9 = vpack.c.bf16 %v2697_v16, %v2699_v50  ;;  %v2713_v21 = vmul.f32 %v5210_v56, %v8786_v2  ;;  %v3187_v15 = vunpack.c.l.bf16 %v2707_v38  ;;  %v3188_v58 = vunpack.c.h.bf16 %v2707_v38 }
 0x27c   : > { %v1906_v36 = vunpack.c.h.bf16 %v1791_v17  ;;  %v1907_v19 = vunpack.c.l.bf16 %v1792_v28  ;;  %v2133_v3 = vmul.f32 1.442695, %v1905_v57  ;;  %v8887_v12 = vunpack.c.l.bf16 %v8878_v59 }
 0x27d   : > { %v2714_v61 = vpack.c.bf16 %v2711_v18, %v2713_v21  ;;  %v3185_v11 = vunpack.c.l.bf16 %v2700_v9  ;;  %v3186_v54 = vunpack.c.h.bf16 %v2700_v9  ;;  %v8888_v46 = vunpack.c.h.bf16 %v8878_v59 }
 0x27e   : > { %v3315_v4 = vmul.f32 %v3187_v15, %v8887_v12  ;;  %v2135_v37 = vmul.f32 1.442695, %v1906_v36  ;;  %v1908_v50 = vunpack.c.h.bf16 %v1792_v28  ;;  %v8889_v56 = vunpack.c.l.bf16 %v7118_v55  ;;  %v8895_v12 = vld [vmem:[#allocation65_spill] sm:$0xff] }
 0x27f   : > { %v3316_v53 = vmul.f32 %v3188_v58, %v8888_v46  ;;  %v3189_v16 = vunpack.c.l.bf16 %v2714_v61  ;;  %v3190_v33 = vunpack.c.h.bf16 %v2714_v61  ;;  %v8890_v17 = vunpack.c.h.bf16 %v7118_v55  ;;  %v5214_v18 = vpop.eup %5213 }
 0x280   : > { %v3313_v43 = vmul.f32 %v3185_v11, %v8889_v56  ;;  %v3423_v21 = vpack.c.bf16 %v3315_v4, %v3311_v20  ;;  %5217 = vpow2.f32 %v2133_v3  ;;  %v2137_v57 = vmul.f32 1.442695, %v1907_v19  ;;  %v5216_v32 = vpop.eup %5215  ;;  %v8894_v20 = vld [vmem:[#allocation62_spill] sm:$0xff] }
 0x281   : > { %v3314_v38 = vmul.f32 %v3186_v54, %v8890_v17  ;;  %v3424_v9 = vpack.c.bf16 %v3316_v53, %v3312_v39  ;;  %v8891_v15 = vunpack.c.l.bf16 %v8881_v62  ;;  %v3318_v58 = vmul.f32 %v3190_v33, %v3062_v26  ;;  %v8893_v54 = vld [vmem:[#allocation61_spill] sm:$0xff]  ;;  %v8896_v62 = vld [vmem:[#allocation66_spill] sm:$0xff]  ;;  %v1662_v17 = vpop.f32.mrf.mxu3 }
 0x282   : > { %5219 = vpow2.f32 %v2135_v37  ;;  %v2139_v28 = vmul.f32 1.442695, %v1908_v50  ;;  %v2348_v36 = vunpack.c.h.bf16 %v7755_v14  ;;  %v2237_v11 = vpack.c.bf16 %v5212_v8, %v7758_v60  ;;  %3759 = vmatmul.bf16.gmra.mxu0 %v3423_v21 }
 0x283   : > { %v3317_v59 = vmul.f32 %v3189_v16, %v8891_v15  ;;  %3848 = vmatmul.bf16.gmra.mxu1 %v3424_v9  ;;  %v7796_v55 = vpack.c.bf16 %v1485_v7, %v1396_v51  ;;  %v2529_v39 = vpack.c.bf16 %v8894_v20, %v8893_v54  ;;  %v3426_v19 = vpack.c.bf16 %v3318_v58, %v3314_v38  ;;  %v1397_v9 = vpop.f32.mrf.mxu0  ;;  %v8899_v15 = vld [vmem:[#allocation63_spill] sm:$0xff] }
 0x284   : > { %v2238_v61 = vpack.c.bf16 %v5216_v32, %v5214_v18  ;;  %v2531_v4 = vpack.c.bf16 %v8896_v62, %v8895_v12  ;;  %v7802_v33 = vadd.f32 1.0, %v2347_v27  ;;  %5221 = vpow2.f32 %v2137_v57 }
 0x285   : > { %8892 = vst [vmem:[#allocation56_spill] sm:$0xff] %v7796_v55  ;;  %v3425_v3 = vpack.c.bf16 %v3317_v59, %v3313_v43  ;;  %v1793_v14 = vxor.u32 2147516416, %v7796_v55  ;;  %4026 = vmatmul.bf16.gmra.mxu3 %v3426_v19  ;;  %5223 = vpow2.f32 %v2139_v28  ;;  %v2715_v60 = vunpack.c.h.bf16 %v2529_v39  ;;  %v1573_v43 = vpop.f32.mrf.mxu2  ;;  %v8900_v59 = vld [vmem:[#allocation64_spill] sm:$0xff]  ;;  %v8901_v28 = vld [vmem:[#allocation67_spill] sm:$0xff] }
 0x286   : > { %8897 = vst [vmem:[#allocation61_spill] sm:$0xff] %v7802_v33  ;;  %v2716_v37 = vunpack.c.l.bf16 %v2529_v39  ;;  %v2729_v51 = vunpack.c.h.bf16 %v2531_v4  ;;  %v5218_v7 = vpop.eup %5217  ;;  %v2349_v8 = vunpack.c.l.bf16 %v2237_v11  ;;  %v2350_v46 = vunpack.c.h.bf16 %v2237_v11  ;;  %v8902_v11 = vld [vmem:[#allocation68_spill] sm:$0xff] }
 0x287   : > { %3937 = vmatmul.bf16.gmra.mxu2 %v3425_v3  ;;  %v1909_v32 = vunpack.c.l.bf16 %v1793_v14  ;;  %v1910_v53 = vunpack.c.h.bf16 %v1793_v14  ;;  %v7806_v16 = vadd.f32 1.0, %v2348_v36  ;;  %v2351_v27 = vunpack.c.l.bf16 %v2238_v61  ;;  %v1486_v36 = vpop.f32.mrf.mxu1 }
 0x288   : > { %v5220_v50 = vpop.eup %5219  ;;  %v2352_v56 = vunpack.c.h.bf16 %v2238_v61  ;;  %5225 = vrcp.f32 %v2715_v60  ;;  %v2730_v21 = vunpack.c.l.bf16 %v2531_v4  ;;  %v2530_v58 = vpack.c.bf16 %v8900_v59, %v8899_v15 }
 0x289   : > { %8898 = vst [vmem:[#allocation62_spill] sm:$0xff] %v7806_v16  ;;  %v2141_v38 = vmul.f32 1.442695, %v1909_v32  ;;  %v2143_v18 = vmul.f32 1.442695, %v1910_v53  ;;  %5227 = vrcp.f32 %v2716_v37  ;;  %v2239_v57 = vpack.c.bf16 %v5220_v50, %v5218_v7  ;;  %v8907_v37 = vld [vmem:[#allocation15_spill] sm:$0xff] }
 0x28a   : > { %5229 = vrcp.f32 %v2729_v51  ;;  %v2532_v54 = vpack.c.bf16 %v8902_v11, %v8901_v28  ;;  %v5222_v20 = vpop.eup %5221  ;;  %v7812_v39 = vadd.f32 1.0, %v2349_v8  ;;  %v7814_v3 = vadd.f32 1.0, %v2350_v46 }
 0x28b   : > { %5231 = vpow2.f32 %v2141_v38  ;;  %v5224_v61 = vpop.eup %5223  ;;  %v2722_v62 = vunpack.c.h.bf16 %v2530_v58  ;;  %v2723_v4 = vunpack.c.l.bf16 %v2530_v58  ;;  %v7818_v14 = vadd.f32 1.0, %v2351_v27  ;;  %v1400_v12 = vpop.f32.mrf.mxu0 }
 0x28c   : > { %8903 = vst [vmem:[#allocation65_spill] sm:$0xff] %v7812_v39  ;;  %5233 = vpow2.f32 %v2143_v18  ;;  %v7820_v60 = vadd.f32 1.0, %v2352_v56  ;;  %v2736_v7 = vunpack.c.h.bf16 %v2532_v54  ;;  %v2353_v32 = vunpack.c.l.bf16 %v2239_v57 }
 0x28d   : > { %8904 = vst [vmem:[#allocation66_spill] sm:$0xff] %v7814_v3  ;;  %5235 = vrcp.f32 %v2730_v21  ;;  %v2737_v46 = vunpack.c.l.bf16 %v2532_v54  ;;  %v1574_v53 = vadd.f32 %v1573_v43, %v6699_v48  ;;  %v2354_v38 = vunpack.c.h.bf16 %v2239_v57  ;;  %v8908_v43 = vld [vmem:[#allocation20_spill] sm:$0xff] }
 0x28e   : > { %8905 = vst [vmem:[#allocation63_spill] sm:$0xff] %v7818_v14  ;;  %v5226_v8 = vpop.eup %5225  ;;  %v7824_v18 = vpack.c.bf16 %v5224_v61, %v5222_v20  ;;  %5237 = vrcp.f32 %v2722_v62  ;;  %v1663_v59 = vadd.f32 %v1662_v17, %v6701_v13  ;;  %v1398_v58 = vadd.f32 %v1397_v9, %v6641_v47 }
 0x28f   : > { %8906 = vst [vmem:[#allocation64_spill] sm:$0xff] %v7820_v60  ;;  %v5228_v50 = vpop.eup %5227  ;;  %v2718_v15 = vmul.f32 %v5226_v8, %v8784_v29  ;;  %5239 = vrcp.f32 %v2723_v4  ;;  %v3068_v21 = vunpack.c.h.bf16 %v8907_v37  ;;  %v1487_v57 = vadd.f32 %v1486_v36, %v6647_v1  ;;  %v1575_v4 = vpop.f32.mrf.mxu2 }
 0x290   : > { %v5230_v27 = vpop.eup %5229  ;;  %v2720_v56 = vmul.f32 %v5228_v50, %v8786_v2  ;;  %5241 = vrcp.f32 %v2736_v7  ;;  %v7833_v20 = vadd.f32 1.0, %v2353_v32  ;;  %v7835_v62 = vpack.c.bf16 %v1663_v59, %v1574_v53  ;;  %v1664_v8 = vpop.f32.mrf.mxu3 }
 0x291   : > { %v5232_v28 = vpop.eup %5231  ;;  %5243 = vrcp.f32 %v2737_v46  ;;  %v7837_v17 = vadd.f32 1.0, %v2354_v38  ;;  %v2355_v9 = vunpack.c.l.bf16 %v7824_v18  ;;  %v2732_v7 = vmul.f32 %v5230_v27, %v8784_v29  ;;  %v1489_v53 = vpop.f32.mrf.mxu1 }
 0x292   : > { %v5234_v54 = vpop.eup %5233  ;;  %8909 = vst [vmem:[#allocation67_spill] sm:$0xff] %v7833_v20  ;;  %v2721_v61 = vpack.c.bf16 %v2718_v15, %v2720_v56  ;;  %v3070_v32 = vunpack.c.h.bf16 %v8908_v43  ;;  %v1794_v15 = vxor.u32 2147516416, %v7835_v62  ;;  %v7844_v46 = vpack.c.bf16 %v1487_v57, %v1398_v58  ;;  %v8913_v57 = vld [vmem:[#allocation60_spill] sm:$0xff] }
 0x293   : > { %8910 = vst [vmem:[#allocation68_spill] sm:$0xff] %v7835_v62  ;;  %v5236_v19 = vpop.eup %5235  ;;  %v7846_v59 = vpack.c.bf16 %v5234_v54, %v5232_v28  ;;  %v1576_v26 = vadd.f32 %v1575_v4, %v6699_v48  ;;  %v1665_v50 = vadd.f32 %v1664_v8, %v6701_v13  ;;  %v1401_v31 = vadd.f32 %v1400_v12, %v6641_v47 }
 0x294   : > { %8911 = vst [vmem:[#allocation15_spill] sm:$0xff] %v7837_v17  ;;  %v3191_v36 = vunpack.c.l.bf16 %v2721_v61  ;;  %v5238_v56 = vpop.eup %5237  ;;  %v2734_v38 = vmul.f32 %v5236_v19, %v8786_v2  ;;  %v3192_v11 = vunpack.c.h.bf16 %v2721_v61  ;;  %v1911_v55 = vunpack.c.l.bf16 %v1794_v15 }
 0x295   : > { %8912 = vst [vmem:[#allocation20_spill] sm:$0xff] %v7844_v46  ;;  %v5240_v27 = vpop.eup %5239  ;;  %v2725_v51 = vmul.f32 %v5238_v56, %v8784_v29  ;;  %v8914_v14 = vunpack.c.l.bf16 %v8913_v57  ;;  %v1490_v19 = vadd.f32 %v1489_v53, %v6647_v1  ;;  %v1912_v8 = vunpack.c.h.bf16 %v1794_v15 }
 0x296   : > { %v5242_v60 = vpop.eup %5241  ;;  %v2735_v58 = vpack.c.bf16 %v2732_v7, %v2734_v38  ;;  %v2727_v28 = vmul.f32 %v5240_v27, %v8786_v2  ;;  %v2145_v20 = vmul.f32 1.442695, %v1911_v55  ;;  %v1795_v61 = vxor.u32 2147516416, %v7844_v46 }
 0x297   : > { %v3319_v17 = vmul.f32 %v3191_v36, %v8914_v14  ;;  %v5244_v54 = vpop.eup %5243  ;;  %v2739_v4 = vmul.f32 %v5242_v60, %v8784_v29  ;;  %v8915_v7 = vunpack.c.h.bf16 %v8913_v57  ;;  %v2147_v14 = vmul.f32 1.442695, %v1912_v8 }
 0x298   : > { %v3195_v56 = vunpack.c.l.bf16 %v2735_v58  ;;  %v3196_v3 = vunpack.c.h.bf16 %v2735_v58  ;;  %v2728_v39 = vpack.c.bf16 %v2725_v51, %v2727_v28  ;;  %v2741_v12 = vmul.f32 %v5244_v54, %v8786_v2  ;;  %v8917_v54 = vld [vmem:[#allocation41_spill] sm:$0xff] }
 0x299   : > { %v3320_v38 = vmul.f32 %v3192_v11, %v8915_v7  ;;  %v1913_v36 = vunpack.c.l.bf16 %v1795_v61  ;;  %v1914_v27 = vunpack.c.h.bf16 %v1795_v61  ;;  %v8916_v53 = vunpack.c.l.bf16 %v8907_v37 }
 0x29a   : > { %v3324_v33 = vmul.f32 %v3196_v3, %v3068_v21  ;;  %v2742_v60 = vpack.c.bf16 %v2739_v4, %v2741_v12  ;;  %v3193_v15 = vunpack.c.l.bf16 %v2728_v39  ;;  %v3194_v55 = vunpack.c.h.bf16 %v2728_v39  ;;  %v8922_v21 = vld [vmem:[#allocation69_spill] sm:$0xff] }
 0x29b   : > { %v3323_v16 = vmul.f32 %v3195_v56, %v8916_v53  ;;  %5245 = vpow2.f32 %v2145_v20  ;;  %v2149_v46 = vmul.f32 1.442695, %v1913_v36  ;;  %v2151_v23 = vmul.f32 1.442695, %v1914_v27 }
 0x29c   : > { %v3428_v51 = vpack.c.bf16 %v3324_v33, %v3320_v38  ;;  %v3197_v28 = vunpack.c.l.bf16 %v2742_v60  ;;  %5247 = vpow2.f32 %v2147_v14  ;;  %v8918_v57 = vunpack.c.l.bf16 %v8917_v54  ;;  %v1667_v14 = vpop.f32.mrf.mxu3 }
 0x29d   : > { %v3427_v58 = vpack.c.bf16 %v3323_v16, %v3319_v17  ;;  %v3198_v8 = vunpack.c.h.bf16 %v2742_v60  ;;  %5249 = vpow2.f32 %v2149_v46  ;;  %v7866_v61 = vpack.c.bf16 %v1665_v50, %v1576_v26  ;;  %v8923_v16 = vld [vmem:[#allocation71_spill] sm:$0xff] }
 0x29e   : > { %v3321_v11 = vmul.f32 %v3193_v15, %v8918_v57  ;;  %3853 = vmatmul.bf16.gmra.mxu1 %v3428_v51  ;;  %v8920_v3 = vunpack.c.l.bf16 %v8908_v43  ;;  %5251 = vpow2.f32 %v2151_v23  ;;  %v7870_v39 = vpack.c.bf16 %v1490_v19, %v1401_v31  ;;  %v8926_v15 = vld [vmem:[#allocation76_spill] sm:$0xff] }
 0x29f   : > { %8919 = vst [vmem:[#allocation60_spill] sm:$0xff] %v7866_v61  ;;  %3764 = vmatmul.bf16.gmra.mxu0 %v3427_v58  ;;  %v2533_v33 = vpack.c.bf16 %v8923_v16, %v8922_v21  ;;  %v7874_v20 = vadd.f32 1.0, %v2355_v9  ;;  %v8924_v17 = vunpack.c.h.bf16 %v8917_v54  ;;  %v3326_v56 = vmul.f32 %v3198_v8, %v3070_v32  ;;  %v1578_v9 = vpop.f32.mrf.mxu2  ;;  %v1491_v21 = vpop.f32.mrf.mxu1 }
 0x2a0   : > { %v3325_v37 = vmul.f32 %v3197_v28, %v8920_v3  ;;  %8921 = vst [vmem:[#allocation41_spill] sm:$0xff] %v7870_v39  ;;  %v1796_v26 = vxor.u32 2147516416, %v7866_v61  ;;  %v2357_v50 = vunpack.c.l.bf16 %v7846_v59  ;;  %v2358_v46 = vunpack.c.h.bf16 %v7846_v59  ;;  %v8927_v59 = vld [vmem:[#allocation77_spill] sm:$0xff] }
 0x2a1   : > { %v3322_v4 = vmul.f32 %v3194_v55, %v8924_v17  ;;  %v1797_v23 = vxor.u32 2147516416, %v7870_v39  ;;  %v5246_v31 = vpop.eup %5245  ;;  %v2743_v38 = vunpack.c.h.bf16 %v2533_v33  ;;  %v8925_v27 = vunpack.c.h.bf16 %v7824_v18 }
 0x2a2   : > { %v3429_v43 = vpack.c.bf16 %v3325_v37, %v3321_v11  ;;  %v1915_v12 = vunpack.c.l.bf16 %v1796_v26  ;;  %v1916_v7 = vunpack.c.h.bf16 %v1796_v26  ;;  %v5248_v36 = vpop.eup %5247  ;;  %v2535_v55 = vpack.c.bf16 %v8927_v59, %v8926_v15  ;;  %v1402_v37 = vpop.f32.mrf.mxu0 }
 0x2a3   : > { %v3430_v19 = vpack.c.bf16 %v3326_v56, %v3322_v4  ;;  %v7884_v32 = vadd.f32 1.0, %v8925_v27  ;;  %v1917_v53 = vunpack.c.l.bf16 %v1797_v23  ;;  %v1918_v60 = vunpack.c.h.bf16 %v1797_v23  ;;  %v5250_v58 = vpop.eup %5249  ;;  %v8930_v23 = vld [vmem:[#allocation75_spill] sm:$0xff] }
 0x2a4   : > { %3942 = vmatmul.bf16.gmra.mxu2 %v3429_v43  ;;  %v2153_v54 = vmul.f32 1.442695, %v1915_v12  ;;  %v2155_v57 = vmul.f32 1.442695, %v1916_v7  ;;  %v5252_v11 = vpop.eup %5251  ;;  %v7890_v8 = vadd.f32 1.0, %v2357_v50  ;;  %5253 = vrcp.f32 %v2743_v38  ;;  %v8929_v43 = vld [vmem:[#allocation73_spill] sm:$0xff] }
 0x2a5   : > { %4031 = vmatmul.bf16.gmra.mxu3 %v3430_v19  ;;  %v2157_v18 = vmul.f32 1.442695, %v1917_v53  ;;  %v2159_v3 = vmul.f32 1.442695, %v1918_v60  ;;  %v7892_v16 = vadd.f32 1.0, %v2358_v46  ;;  %v2242_v17 = vpack.c.bf16 %v5248_v36, %v5246_v31  ;;  %v8931_v50 = vld [vmem:[#allocation30_spill] sm:$0xff] }
 0x2a6   : > { %5255 = vpow2.f32 %v2153_v54  ;;  %v2744_v4 = vunpack.c.l.bf16 %v2533_v33  ;;  %v2243_v56 = vpack.c.bf16 %v5252_v11, %v5250_v58  ;;  %v2757_v26 = vunpack.c.h.bf16 %v2535_v55  ;;  %v8932_v27 = vld [vmem:[#allocation31_spill] sm:$0xff]  ;;  %v1669_v11 = vpop.f32.mrf.mxu3 }
 0x2a7   : > { %8928 = vst [vmem:[#allocation69_spill] sm:$0xff] %v7892_v16  ;;  %5257 = vpow2.f32 %v2155_v57  ;;  %v2534_v19 = vpack.c.bf16 %v8930_v23, %v8929_v43  ;;  %v2758_v12 = vunpack.c.l.bf16 %v2535_v55  ;;  %v8933_v53 = vld [vmem:[#allocation23_spill] sm:$0xff]  ;;  %v2359_v33 = vunpack.c.l.bf16 %v2242_v17  ;;  %v1580_v57 = vpop.f32.mrf.mxu2 }
 0x2a8   : > { %5259 = vpow2.f32 %v2157_v18  ;;  %v2536_v38 = vpack.c.bf16 %v8933_v53, %v8932_v27  ;;  %v2360_v60 = vunpack.c.h.bf16 %v2242_v17  ;;  %v2361_v58 = vunpack.c.l.bf16 %v2243_v56 }
 0x2a9   : > { %5261 = vpow2.f32 %v2159_v3  ;;  %v2750_v36 = vunpack.c.h.bf16 %v2534_v19  ;;  %v2751_v15 = vunpack.c.l.bf16 %v2534_v19  ;;  %v1579_v43 = vadd.f32 %v1578_v9, %v6699_v48 }
 0x2aa   : > { %5263 = vrcp.f32 %v2744_v4  ;;  %v5254_v59 = vpop.eup %5253  ;;  %v2764_v54 = vunpack.c.h.bf16 %v2536_v38  ;;  %v2765_v3 = vunpack.c.l.bf16 %v2536_v38  ;;  %v1668_v23 = vadd.f32 %v1667_v14, %v6701_v13 }
 0x2ab   : > { %5265 = vrcp.f32 %v2757_v26  ;;  %v2362_v53 = vunpack.c.h.bf16 %v2243_v56  ;;  %v1403_v17 = vadd.f32 %v1402_v37, %v6641_v47  ;;  %v1492_v4 = vadd.f32 %v1491_v21, %v6647_v1  ;;  %v1405_v56 = vpop.f32.mrf.mxu0  ;;  %v1494_v37 = vpop.f32.mrf.mxu1 }
 0x2ac   : > { %v5256_v18 = vpop.eup %5255  ;;  %5267 = vrcp.f32 %v2758_v12  ;;  %v7906_v19 = vpack.c.bf16 %v1668_v23, %v1579_v43  ;;  %v1581_v31 = vadd.f32 %v1580_v57, %v6699_v48  ;;  %v1670_v12 = vadd.f32 %v1669_v11, %v6701_v13  ;;  %v8938_v43 = vld [vmem:[#allocation17_spill] sm:$0xff] }
 0x2ad   : > { %v5258_v27 = vpop.eup %5257  ;;  %5269 = vrcp.f32 %v2750_v36  ;;  %v7910_v46 = vadd.f32 1.0, %v2359_v33  ;;  %v7912_v9 = vadd.f32 1.0, %v2360_v60  ;;  %v2746_v14 = vmul.f32 %v5254_v59, %v8784_v29 }
 0x2ae   : > { %v5260_v26 = vpop.eup %5259  ;;  %5271 = vrcp.f32 %v2751_v15  ;;  %8934 = vst [vmem:[#allocation71_spill] sm:$0xff] %v7906_v19  ;;  %v7915_v21 = vadd.f32 1.0, %v2361_v58  ;;  %v7917_v15 = vpack.c.bf16 %v5258_v27, %v5256_v18  ;;  %v3077_v57 = vunpack.c.l.bf16 %v8938_v43 }
 0x2af   : > { %v5262_v38 = vpop.eup %5261  ;;  %8935 = vst [vmem:[#allocation76_spill] sm:$0xff] %v7910_v46  ;;  %5273 = vrcp.f32 %v2764_v54  ;;  %v7920_v11 = vadd.f32 1.0, %v2362_v53  ;;  %v3078_v60 = vunpack.c.h.bf16 %v8938_v43  ;;  %v1798_v59 = vxor.u32 2147516416, %v7906_v19  ;;  %v8942_v43 = vld [vmem:[#allocation36_spill] sm:$0xff] }
 0x2b0   : > { %8936 = vst [vmem:[#allocation77_spill] sm:$0xff] %v7912_v9  ;;  %v5264_v36 = vpop.eup %5263  ;;  %5275 = vrcp.f32 %v2765_v3  ;;  %v7925_v28 = vpack.c.bf16 %v1492_v4, %v1403_v17  ;;  %v7927_v51 = vpack.c.bf16 %v1670_v12, %v1581_v31  ;;  %v1406_v58 = vadd.f32 %v1405_v56, %v6641_v47 }
 0x2b1   : > { %8937 = vst [vmem:[#allocation73_spill] sm:$0xff] %v7915_v21  ;;  %v5266_v23 = vpop.eup %5265  ;;  %v2748_v33 = vmul.f32 %v5264_v36, %v8786_v2  ;;  %v1495_v18 = vadd.f32 %v1494_v37, %v6647_v1  ;;  %v1919_v36 = vunpack.c.l.bf16 %v1798_v59  ;;  %v7934_v39 = vpack.c.bf16 %v5262_v38, %v5260_v26 }
 0x2b2   : > { %8939 = vst [vmem:[#allocation75_spill] sm:$0xff] %v7920_v11  ;;  %v5268_v54 = vpop.eup %5267  ;;  %v2760_v53 = vmul.f32 %v5266_v23, %v8784_v29  ;;  %v1920_v31 = vunpack.c.h.bf16 %v1798_v59  ;;  %v1799_v61 = vxor.u32 2147516416, %v7925_v28  ;;  %v8943_v26 = vunpack.c.l.bf16 %v8942_v43 }
 0x2b3   : > { %8940 = vst [vmem:[#allocation30_spill] sm:$0xff] %v7925_v28  ;;  %v5270_v3 = vpop.eup %5269  ;;  %v2749_v27 = vpack.c.bf16 %v2746_v14, %v2748_v33  ;;  %v2762_v55 = vmul.f32 %v5268_v54, %v8786_v2  ;;  %v2161_v33 = vmul.f32 1.442695, %v1919_v36  ;;  %v8944_v59 = vunpack.c.h.bf16 %v8942_v43 }
 0x2b4   : > { %8941 = vst [vmem:[#allocation31_spill] sm:$0xff] %v7927_v51  ;;  %v5272_v7 = vpop.eup %5271  ;;  %v2753_v17 = vmul.f32 %v5270_v3, %v8784_v29  ;;  %v2163_v54 = vmul.f32 1.442695, %v1920_v31  ;;  %v8946_v36 = vunpack.c.h.bf16 %v8931_v50  ;;  %v1922_v28 = vunpack.c.h.bf16 %v1799_v61 }
 0x2b5   : > { %v5274_v4 = vpop.eup %5273  ;;  %v2763_v12 = vpack.c.bf16 %v2760_v53, %v2762_v55  ;;  %v3199_v56 = vunpack.c.l.bf16 %v2749_v27  ;;  %v3200_v62 = vunpack.c.h.bf16 %v2749_v27  ;;  %v2755_v37 = vmul.f32 %v5272_v7, %v8786_v2 }
 0x2b6   : > { %v5276_v14 = vpop.eup %5275  ;;  %v2767_v23 = vmul.f32 %v5274_v4, %v8784_v29  ;;  %5277 = vpow2.f32 %v2161_v33  ;;  %v1921_v7 = vunpack.c.l.bf16 %v1799_v61  ;;  %v8945_v53 = vunpack.c.l.bf16 %v8931_v50 }
 0x2b7   : > { %v3203_v9 = vunpack.c.l.bf16 %v2763_v12  ;;  %v3327_v38 = vmul.f32 %v3199_v56, %v8943_v26  ;;  %v3204_v46 = vunpack.c.h.bf16 %v2763_v12  ;;  %v3328_v3 = vmul.f32 %v3200_v62, %v8944_v59 }
 0x2b8   : > { %v2756_v55 = vpack.c.bf16 %v2753_v17, %v2755_v37  ;;  %v2769_v27 = vmul.f32 %v5276_v14, %v8786_v2  ;;  %5279 = vpow2.f32 %v2163_v54  ;;  %v2165_v12 = vmul.f32 1.442695, %v1921_v7  ;;  %v8947_v14 = vld [vmem:[#allocation16_spill] sm:$0xff] }
 0x2b9   : > { %v3331_v4 = vmul.f32 %v3203_v9, %v8945_v53  ;;  %v3332_v31 = vmul.f32 %v3204_v46, %v8946_v36  ;;  %v2167_v62 = vmul.f32 1.442695, %v1922_v28  ;;  %v1800_v17 = vxor.u32 2147516416, %v7927_v51 }
 0x2ba   : > { %v2770_v11 = vpack.c.bf16 %v2767_v23, %v2769_v27  ;;  %v3201_v21 = vunpack.c.l.bf16 %v2756_v55  ;;  %v3202_v56 = vunpack.c.h.bf16 %v2756_v55  ;;  %v8948_v33 = vunpack.c.l.bf16 %v8947_v14  ;;  %v8952_v55 = vld [vmem:[#allocation79_spill] sm:$0xff] }
 0x2bb   : > { %v3431_v26 = vpack.c.bf16 %v3331_v4, %v3327_v38  ;;  %v3432_v43 = vpack.c.bf16 %v3332_v31, %v3328_v3  ;;  %v8949_v9 = vunpack.c.h.bf16 %v8947_v14  ;;  %5281 = vpow2.f32 %v2165_v12  ;;  %v8951_v3 = vld [vmem:[#allocation78_spill] sm:$0xff] }
 0x2bc   : > { %v3205_v37 = vunpack.c.l.bf16 %v2770_v11  ;;  %v3329_v59 = vmul.f32 %v3201_v21, %v8948_v33  ;;  %v3206_v16 = vunpack.c.h.bf16 %v2770_v11  ;;  %v1923_v61 = vunpack.c.l.bf16 %v1800_v17  ;;  %v5278_v54 = vpop.eup %5277 }
 0x2bd   : > { %v3330_v50 = vmul.f32 %v3202_v56, %v8949_v9  ;;  %3769 = vmatmul.bf16.gmra.mxu0 %v3431_v26  ;;  %3858 = vmatmul.bf16.gmra.mxu1 %v3432_v43  ;;  %v1924_v46 = vunpack.c.h.bf16 %v1800_v17  ;;  %v7954_v23 = vpack.c.bf16 %v1495_v18, %v1406_v58  ;;  %5283 = vpow2.f32 %v2167_v62 }
 0x2be   : > { %v3333_v38 = vmul.f32 %v3205_v37, %v3077_v57  ;;  %v3334_v28 = vmul.f32 %v3206_v16, %v3078_v60  ;;  %v2537_v27 = vpack.c.bf16 %v8952_v55, %v8951_v3  ;;  %v5280_v7 = vpop.eup %5279  ;;  %v2364_v21 = vunpack.c.h.bf16 %v7917_v15  ;;  %v8953_v16 = vld [vmem:[#allocation81_spill] sm:$0xff]  ;;  %v8954_v60 = vld [vmem:[#allocation35_spill] sm:$0xff]  ;;  %v8959_v55 = vld [vmem:[#allocation80_spill] sm:$0xff] }
 0x2bf   : > { %8950 = vst [vmem:[#allocation23_spill] sm:$0xff] %v7954_v23  ;;  %v2169_v11 = vmul.f32 1.442695, %v1923_v61  ;;  %v2171_v53 = vmul.f32 1.442695, %v1924_v46  ;;  %v1801_v4 = vxor.u32 2147516416, %v7954_v23  ;;  %v2365_v36 = vunpack.c.l.bf16 %v7934_v39 }
 0x2c0   : > { %v3433_v31 = vpack.c.bf16 %v3333_v38, %v3329_v59  ;;  %v3434_v56 = vpack.c.bf16 %v3334_v28, %v3330_v50  ;;  %v2246_v58 = vpack.c.bf16 %v5280_v7, %v5278_v54  ;;  %v2539_v12 = vpack.c.bf16 %v8954_v60, %v8953_v16  ;;  %v8960_v7 = vld [vmem:[#allocation38_spill] sm:$0xff] }
 0x2c1   : > { %5285 = vpow2.f32 %v2169_v11  ;;  %v1925_v18 = vunpack.c.l.bf16 %v1801_v4  ;;  %v1926_v57 = vunpack.c.h.bf16 %v1801_v4  ;;  %v2366_v26 = vunpack.c.h.bf16 %v7934_v39  ;;  %v5282_v17 = vpop.eup %5281  ;;  %v8961_v11 = vld [vmem:[#allocation24_spill] sm:$0xff] }
 0x2c2   : > { %3947 = vmatmul.bf16.gmra.mxu2 %v3433_v31  ;;  %4036 = vmatmul.bf16.gmra.mxu3 %v3434_v56  ;;  %v2367_v43 = vunpack.c.l.bf16 %v2246_v58  ;;  %5287 = vpow2.f32 %v2171_v53  ;;  %v2771_v62 = vunpack.c.h.bf16 %v2537_v27  ;;  %v2368_v37 = vunpack.c.h.bf16 %v2246_v58  ;;  %v8962_v53 = vld [vmem:[#allocation48_spill] sm:$0xff] }
 0x2c3   : > { %v2173_v14 = vmul.f32 1.442695, %v1925_v18  ;;  %v2175_v33 = vmul.f32 1.442695, %v1926_v57  ;;  %v2772_v59 = vunpack.c.l.bf16 %v2537_v27  ;;  %v5284_v9 = vpop.eup %5283  ;;  %v8955_v50 = vunpack.c.l.bf16 %v7917_v15  ;;  %v1672_v18 = vpop.f32.mrf.mxu3 }
 0x2c4   : > { %5289 = vrcp.f32 %v2771_v62  ;;  %v2785_v54 = vunpack.c.h.bf16 %v2539_v12  ;;  %v7969_v39 = vadd.f32 1.0, %v2364_v21  ;;  %v2247_v38 = vpack.c.bf16 %v5284_v9, %v5282_v17  ;;  %v1583_v21 = vpop.f32.mrf.mxu2  ;;  %v1496_v62 = vpop.f32.mrf.mxu1 }
 0x2c5   : > { %v7966_v61 = vadd.f32 1.0, %v8955_v50  ;;  %5291 = vpow2.f32 %v2173_v14  ;;  %v2786_v28 = vunpack.c.l.bf16 %v2539_v12  ;;  %v7971_v3 = vadd.f32 1.0, %v2365_v36  ;;  %v1407_v12 = vpop.f32.mrf.mxu0 }
 0x2c6   : > { %8957 = vst [vmem:[#allocation36_spill] sm:$0xff] %v7969_v39  ;;  %5293 = vpow2.f32 %v2175_v33  ;;  %v2538_v27 = vpack.c.bf16 %v8960_v7, %v8959_v55  ;;  %v2540_v15 = vpack.c.bf16 %v8962_v53, %v8961_v11  ;;  %v7977_v31 = vadd.f32 1.0, %v2366_v26  ;;  %v8966_v26 = vld [vmem:[#allocation70_spill] sm:$0xff] }
 0x2c7   : > { %8956 = vst [vmem:[#allocation17_spill] sm:$0xff] %v7966_v61  ;;  %v5286_v4 = vpop.eup %5285  ;;  %v7979_v56 = vadd.f32 1.0, %v2367_v43  ;;  %v7981_v58 = vadd.f32 1.0, %v2368_v37  ;;  %5295 = vrcp.f32 %v2772_v59  ;;  %v2369_v17 = vunpack.c.l.bf16 %v2247_v38 }
 0x2c8   : > { %8958 = vst [vmem:[#allocation16_spill] sm:$0xff] %v7971_v3  ;;  %v5288_v57 = vpop.eup %5287  ;;  %5297 = vrcp.f32 %v2785_v54  ;;  %v2778_v36 = vunpack.c.h.bf16 %v2538_v27  ;;  %v2779_v16 = vunpack.c.l.bf16 %v2538_v27  ;;  %v2792_v60 = vunpack.c.h.bf16 %v2540_v15 }
 0x2c9   : > { %8963 = vst [vmem:[#allocation78_spill] sm:$0xff] %v7977_v31  ;;  %v7983_v14 = vpack.c.bf16 %v5288_v57, %v5286_v4  ;;  %5299 = vrcp.f32 %v2786_v28  ;;  %v2793_v37 = vunpack.c.l.bf16 %v2540_v15  ;;  %v1584_v59 = vadd.f32 %v1583_v21, %v6699_v48 }
 0x2ca   : > { %8964 = vst [vmem:[#allocation79_spill] sm:$0xff] %v7979_v56  ;;  %v5290_v43 = vpop.eup %5289  ;;  %5301 = vrcp.f32 %v2778_v36  ;;  %v1673_v9 = vadd.f32 %v1672_v18, %v6701_v13  ;;  %v2370_v54 = vunpack.c.h.bf16 %v2247_v38  ;;  %v3084_v7 = vunpack.c.h.bf16 %v8966_v26  ;;  %v8968_v38 = vld [vmem:[#allocation72_spill] sm:$0xff] }
 0x2cb   : > { %8965 = vst [vmem:[#allocation81_spill] sm:$0xff] %v7981_v58  ;;  %v5292_v50 = vpop.eup %5291  ;;  %v2774_v55 = vmul.f32 %v5290_v43, %v8784_v29  ;;  %5303 = vrcp.f32 %v2779_v16  ;;  %v1408_v28 = vadd.f32 %v1407_v12, %v6641_v47  ;;  %v1497_v53 = vadd.f32 %v1496_v62, %v6647_v1  ;;  %v1674_v33 = vpop.f32.mrf.mxu3 }
 0x2cc   : > { %v5294_v27 = vpop.eup %5293  ;;  %5305 = vrcp.f32 %v2792_v60  ;;  %v7990_v11 = vpack.c.bf16 %v1673_v9, %v1584_v59  ;;  %v2371_v4 = vunpack.c.l.bf16 %v7983_v14  ;;  %v7998_v36 = vadd.f32 1.0, %v2369_v17 }
 0x2cd   : > { %v5296_v15 = vpop.eup %5295  ;;  %v7995_v21 = vpack.c.bf16 %v5294_v27, %v5292_v50  ;;  %5307 = vrcp.f32 %v2793_v37  ;;  %v8003_v12 = vadd.f32 1.0, %v2370_v54  ;;  %v2372_v1 = vunpack.c.h.bf16 %v7983_v14  ;;  %v1585_v14 = vpop.f32.mrf.mxu2 }
 0x2ce   : > { %8967 = vst [vmem:[#allocation35_spill] sm:$0xff] %v7990_v11  ;;  %v5298_v57 = vpop.eup %5297  ;;  %v2776_v16 = vmul.f32 %v5296_v15, %v8786_v2  ;;  %v1802_v43 = vxor.u32 2147516416, %v7990_v11  ;;  %v8007_v59 = vpack.c.bf16 %v1497_v53, %v1408_v28  ;;  %v8010_v46 = vadd.f32 1.0, %v2371_v4 }
 0x2cf   : > { %8969 = vst [vmem:[#allocation80_spill] sm:$0xff] %v7998_v36  ;;  %v5300_v47 = vpop.eup %5299  ;;  %v2788_v62 = vmul.f32 %v5298_v57, %v8784_v29  ;;  %v2373_v60 = vunpack.c.l.bf16 %v7995_v21  ;;  %v8976_v36 = vunpack.c.l.bf16 %v8966_v26  ;;  %v1675_v26 = vadd.f32 %v1674_v33, %v6701_v13 }
 0x2d0   : > { %8970 = vst [vmem:[#allocation38_spill] sm:$0xff] %v8003_v12  ;;  %v5302_v37 = vpop.eup %5301  ;;  %v2777_v9 = vpack.c.bf16 %v2774_v55, %v2776_v16  ;;  %v2790_v17 = vmul.f32 %v5300_v47, %v8786_v2  ;;  %v1927_v50 = vunpack.c.l.bf16 %v1802_v43  ;;  %v1928_v27 = vunpack.c.h.bf16 %v1802_v43  ;;  %v3740_v16 = vpop.f32.mrf.mxu0 }
 0x2d1   : > { %8971 = vst [vmem:[#allocation24_spill] sm:$0xff] %v8007_v59  ;;  %v5304_v15 = vpop.eup %5303  ;;  %v2781_v54 = vmul.f32 %v5302_v37, %v8784_v29  ;;  %v1803_v18 = vxor.u32 2147516416, %v8007_v59  ;;  %v8016_v47 = vpop.f32.mrf.mxu1 }
 0x2d2   : > { %8972 = vst [vmem:[#allocation48_spill] sm:$0xff] %v8010_v46  ;;  %v5306_v57 = vpop.eup %5305  ;;  %v2791_v28 = vpack.c.bf16 %v2788_v62, %v2790_v17  ;;  %v3207_v53 = vunpack.c.l.bf16 %v2777_v9  ;;  %v3208_v11 = vunpack.c.h.bf16 %v2777_v9  ;;  %v2783_v55 = vmul.f32 %v5304_v15, %v8786_v2  ;;  %v8973_v46 = vld [vmem:[#allocation29_spill] sm:$0xff] }
 0x2d3   : > { %v5308_v43 = vpop.eup %5307  ;;  %v2795_v4 = vmul.f32 %v5306_v57, %v8784_v29  ;;  %v2177_v23 = vmul.f32 1.442695, %v1927_v50  ;;  %v2179_v19 = vmul.f32 1.442695, %v1928_v27  ;;  %v1929_v51 = vunpack.c.l.bf16 %v1803_v18 }
 0x2d4   : > { %v3211_v37 = vunpack.c.l.bf16 %v2791_v28  ;;  %v8974_v59 = vunpack.c.l.bf16 %v8973_v46  ;;  %v3212_v56 = vunpack.c.h.bf16 %v2791_v28  ;;  %v8975_v62 = vunpack.c.h.bf16 %v8973_v46 }
 0x2d5   : > { %v2784_v9 = vpack.c.bf16 %v2781_v54, %v2783_v55  ;;  %v2797_v15 = vmul.f32 %v5308_v43, %v8786_v2  ;;  %5309 = vpow2.f32 %v2177_v23  ;;  %v1930_v12 = vunpack.c.h.bf16 %v1803_v18  ;;  %v3918_v33 = vpop.f32.mrf.mxu2  ;;  %v8048_v55 = vpop.f32.mrf.mxu3 }
 0x2d6   : > { %v3335_v58 = vmul.f32 %v3207_v53, %v8974_v59  ;;  %v3336_v17 = vmul.f32 %v3208_v11, %v8975_v62  ;;  %v3339_v31 = vmul.f32 %v3211_v37, %v8976_v36  ;;  %v3340_v57 = vmul.f32 %v3212_v56, %v3084_v7  ;;  %v8977_v56 = vld [vmem:[#allocation46_spill] sm:$0xff] }
 0x2d7   : > { %5311 = vpow2.f32 %v2179_v19  ;;  %v2181_v50 = vmul.f32 1.442695, %v1929_v51  ;;  %v2798_v27 = vpack.c.bf16 %v2795_v4, %v2797_v15  ;;  %v3209_v3 = vunpack.c.l.bf16 %v2784_v9  ;;  %v8984_v53 = vld [vmem:[#allocation50_spill] sm:$0xff] }
 0x2d8   : > { %v3210_v39 = vunpack.c.h.bf16 %v2784_v9  ;;  %v2183_v61 = vmul.f32 1.442695, %v1930_v12  ;;  %v3435_v59 = vpack.c.bf16 %v3339_v31, %v3335_v58  ;;  %v3436_v28 = vpack.c.bf16 %v3340_v57, %v3336_v17  ;;  %v8036_v31 = vld [vmem:[%s8468_s4] ss:$0 sm:$0xff]  ;;  %v8980_v58 = vld [vmem:[#allocation40_spill] sm:$0xff]  ;;  %v3742_v9 = vpop.f32.mrf.mxu0 }
 0x2d9   : > { %5313 = vpow2.f32 %v2181_v50  ;;  %v1586_v46 = vadd.f32 %v1585_v14, %v6699_v48  ;;  %v8027_v11 = vadd.f32 1.0, %v2372_v1  ;;  %v2374_v23 = vunpack.c.h.bf16 %v7995_v21  ;;  %v8979_v48 = vld [vmem:[#allocation49_spill] sm:$0xff]  ;;  %v3831_v15 = vpop.f32.mrf.mxu1 }
 0x2da   : > { %v3213_v18 = vunpack.c.l.bf16 %v2798_v27  ;;  %v3214_v54 = vunpack.c.h.bf16 %v2798_v27  ;;  %3774 = vmatmul.bf16.gmra.mxu0 %v3435_v59  ;;  %3863 = vmatmul.bf16.gmra.mxu1 %v3436_v28  ;;  %v8978_v19 = vunpack.c.l.bf16 %v8977_v56  ;;  %5315 = vpow2.f32 %v2183_v61 }
 0x2db   : > { %v2541_v7 = vpack.c.bf16 %v8980_v58, %v8979_v48  ;;  %v5310_v36 = vpop.eup %5309  ;;  %v8981_v21 = vunpack.c.l.bf16 %v8968_v38  ;;  %v8982_v1 = vunpack.c.h.bf16 %v8977_v56  ;;  %v2543_v13 = vpack.c.bf16 %v7544_v6, %v8984_v53 }
 0x2dc   : > { %v3337_v51 = vmul.f32 %v3209_v3, %v8978_v19  ;;  %v8983_v3 = vunpack.c.h.bf16 %v8968_v38  ;;  %v8050_v4 = vadd.f32 1.0, %v2373_v60  ;;  %v8052_v37 = vpack.c.bf16 %v1675_v26, %v1586_v46 }
 0x2dd   : > { %v3341_v12 = vmul.f32 %v3213_v18, %v8981_v21  ;;  %v3338_v14 = vmul.f32 %v3210_v39, %v8982_v1  ;;  %v5312_v43 = vpop.eup %5311  ;;  %v2799_v62 = vunpack.c.h.bf16 %v2541_v7  ;;  %v2800_v17 = vunpack.c.l.bf16 %v2541_v7  ;;  %v8986_v18 = vld [vmem:[#allocation42_spill] sm:$0xff]  ;;  %v8988_v7 = vld [vmem:[#allocation21_spill] sm:$0xff] }
 0x2de   : > { %v3342_v61 = vmul.f32 %v3214_v54, %v8983_v3  ;;  %8985 = vst [vmem:[#allocation70_spill] sm:$0xff] %v8052_v37  ;;  %v2250_v50 = vpack.c.bf16 %v5312_v43, %v5310_v36  ;;  %v2813_v38 = vunpack.c.h.bf16 %v2543_v13  ;;  %v1804_v59 = vxor.u32 2147516416, %v8052_v37  ;;  %v8987_v54 = vld [vmem:[#allocation43_spill] sm:$0xff] }
 0x2df   : > { %v3437_v57 = vpack.c.bf16 %v3341_v12, %v3337_v51  ;;  %v5314_v27 = vpop.eup %5313  ;;  %v3741_v6 = vadd.f32 %v8036_v31, %v3740_v16  ;;  %5317 = vrcp.f32 %v2799_v62  ;;  %v2814_v28 = vunpack.c.l.bf16 %v2543_v13 }
 0x2e0   : > { %v3438_v39 = vpack.c.bf16 %v3342_v61, %v3338_v14  ;;  %v2375_v60 = vunpack.c.l.bf16 %v2250_v50  ;;  %v2376_v46 = vunpack.c.h.bf16 %v2250_v50  ;;  %5319 = vrcp.f32 %v2800_v17  ;;  %v5316_v19 = vpop.eup %5315 }
 0x2e1   : > { %3952 = vmatmul.bf16.gmra.mxu2 %v3437_v57  ;;  %v2542_v56 = vpack.c.bf16 %v8987_v54, %v8986_v18  ;;  %v1931_v51 = vunpack.c.l.bf16 %v1804_v59  ;;  %v1932_v26 = vunpack.c.h.bf16 %v1804_v59  ;;  %5321 = vrcp.f32 %v2813_v38  ;;  %v3745_v57 = vpop.f32.mrf.mxu0 }
 0x2e2   : > { %4041 = vmatmul.bf16.gmra.mxu3 %v3438_v39  ;;  %v2544_v48 = vpack.c.bf16 %v7558_v30, %v7553_v10  ;;  %v8060_v58 = vadd.f32 1.0, %v2374_v23  ;;  %v8062_v16 = vpack.c.bf16 %v5316_v19, %v5314_v27  ;;  %5323 = vrcp.f32 %v2814_v28  ;;  %v3920_v10 = vpop.f32.mrf.mxu2  ;;  %v4009_v30 = vpop.f32.mrf.mxu3  ;;  %v8989_v28 = vld [vmem:[#allocation39_spill] sm:$0xff]  ;;  %v8990_v19 = vld [vmem:[#allocation25_spill] sm:$0xff] }
 0x2e3   : > { %v3091_v36 = vunpack.c.l.bf16 %v8988_v7  ;;  %v2185_v21 = vmul.f32 1.442695, %v1931_v51  ;;  %v2187_v12 = vmul.f32 1.442695, %v1932_v26  ;;  %v3830_v1 = vadd.f32 %v8016_v47, %v3741_v6  ;;  %v8073_v39 = vpop.f32.mrf.mxu1 }
 0x2e4   : > { %v2806_v14 = vunpack.c.h.bf16 %v2542_v56  ;;  %v8066_v3 = vadd.f32 1.0, %v2375_v60  ;;  %v8068_v61 = vadd.f32 1.0, %v2376_v46  ;;  %v3092_v53 = vunpack.c.h.bf16 %v8988_v7 }
 0x2e5   : > { %v2807_v13 = vunpack.c.l.bf16 %v2542_v56  ;;  %v5318_v23 = vpop.eup %5317  ;;  %v2377_v43 = vunpack.c.l.bf16 %v8062_v16  ;;  %v2378_v62 = vunpack.c.h.bf16 %v8062_v16  ;;  %5325 = vpow2.f32 %v2185_v21  ;;  %v8991_v21 = vld [vmem:[#allocation55_spill] sm:$0xff] }
 0x2e6   : > { %v2820_v17 = vunpack.c.h.bf16 %v2544_v48  ;;  %v5320_v47 = vpop.eup %5319  ;;  %5327 = vpow2.f32 %v2187_v12  ;;  %v2802_v50 = vmul.f32 %v5318_v23, %v8784_v29  ;;  %v2821_v38 = vunpack.c.l.bf16 %v2544_v48  ;;  %v8992_v12 = vld [vmem:[#allocation37_spill] sm:$0xff] }
 0x2e7   : > { %v3919_v27 = vadd.f32 %v3918_v33, %v3830_v1  ;;  %v5322_v59 = vpop.eup %5321  ;;  %v2804_v6 = vmul.f32 %v5320_v47, %v8786_v2  ;;  %5329 = vrcp.f32 %v2806_v14  ;;  %v3743_v46 = vadd.f32 %v8036_v31, %v3742_v9 }
 0x2e8   : > { %v5324_v18 = vpop.eup %5323  ;;  %v2816_v54 = vmul.f32 %v5322_v59, %v8784_v29  ;;  %5331 = vrcp.f32 %v2807_v13  ;;  %v2545_v51 = vpack.c.bf16 %v8990_v19, %v7563_v34  ;;  %v2547_v9 = vpack.c.bf16 %v8992_v12, %v8991_v21 }
 0x2e9   : > { %v2805_v26 = vpack.c.bf16 %v2802_v50, %v2804_v6  ;;  %v2818_v33 = vmul.f32 %v5324_v18, %v8786_v2  ;;  %5333 = vrcp.f32 %v2820_v17  ;;  %v3832_v48 = vadd.f32 %v3831_v15, %v3743_v46 }
 0x2ea   : > { %5335 = vrcp.f32 %v2821_v38  ;;  %v4008_v16 = vadd.f32 %v8048_v55, %v3919_v27  ;;  %v2827_v1 = vunpack.c.h.bf16 %v2545_v51  ;;  %v3746_v34 = vadd.f32 %v8036_v31, %v3745_v57  ;;  %v8088_v17 = vpop.f32.mrf.mxu2  ;;  %v8090_v15 = vpop.f32.mrf.mxu3 }
 0x2eb   : > { %v5326_v14 = vpop.eup %5325  ;;  %v2819_v23 = vpack.c.bf16 %v2816_v54, %v2818_v33  ;;  %v3215_v13 = vunpack.c.l.bf16 %v2805_v26  ;;  %v3216_v47 = vunpack.c.h.bf16 %v2805_v26  ;;  %v3921_v59 = vadd.f32 %v3920_v10, %v3832_v48  ;;  %v8094_v54 = vpop.f32.mrf.mxu0  ;;  %v8993_v26 = vld [vmem:[#allocation74_spill] sm:$0xff] }
 0x2ec   : > { %v5328_v56 = vpop.eup %5327  ;;  %v2828_v50 = vunpack.c.l.bf16 %v2545_v51  ;;  %5337 = vrcp.f32 %v2827_v1  ;;  %v2841_v6 = vunpack.c.h.bf16 %v2547_v9  ;;  %v2842_v18 = vunpack.c.l.bf16 %v2547_v9  ;;  %v8096_v19 = vpop.f32.mrf.mxu1 }
 0x2ed   : > { %v5330_v55 = vpop.eup %5329  ;;  %v8092_v38 = vpack.c.bf16 %v5328_v56, %v5326_v14  ;;  %v3219_v27 = vunpack.c.l.bf16 %v2819_v23  ;;  %v3220_v46 = vunpack.c.h.bf16 %v2819_v23  ;;  %v8994_v57 = vunpack.c.l.bf16 %v8993_v26 }
 0x2ee   : > { %v5332_v10 = vpop.eup %5331  ;;  %v2809_v33 = vmul.f32 %v5330_v55, %v8784_v29  ;;  %v4010_v48 = vadd.f32 %v4009_v30, %v3921_v59  ;;  %5339 = vrcp.f32 %v2828_v50  ;;  %v8995_v9 = vunpack.c.h.bf16 %v8993_v26 }
 0x2ef   : > { %v3343_v51 = vmul.f32 %v3215_v13, %v8994_v57  ;;  %v5334_v21 = vpop.eup %5333  ;;  %v2379_v12 = vunpack.c.l.bf16 %v8092_v38  ;;  %v3347_v56 = vmul.f32 %v3219_v27, %v3091_v36  ;;  %v3348_v14 = vmul.f32 %v3220_v46, %v3092_v53 }
 0x2f0   : > { %v3344_v1 = vmul.f32 %v3216_v47, %v8995_v9  ;;  %v5336_v23 = vpop.eup %5335  ;;  %v2811_v60 = vmul.f32 %v5332_v10, %v8786_v2  ;;  %v2823_v13 = vmul.f32 %v5334_v21, %v8784_v29  ;;  %v4678_v57 = vpack.c.bf16 %v4010_v48, %v4008_v16  ;;  %v8997_v47 = vld [vmem:[#allocation52_spill] sm:$0xff] }
 0x2f1   : > { %5341 = vrcp.f32 %v2841_v6  ;;  %v8108_v30 = vadd.f32 1.0, %v2377_v43  ;;  %v8110_v59 = vadd.f32 1.0, %v2378_v62  ;;  %v3439_v50 = vpack.c.bf16 %v3347_v56, %v3343_v51  ;;  %v8996_v62 = vld [vmem:[#allocation26_spill] sm:$0xff] }
 0x2f2   : > { %v3440_v55 = vpack.c.bf16 %v3348_v14, %v3344_v1  ;;  %v5338_v7 = vpop.eup %5337  ;;  %v2812_v37 = vpack.c.bf16 %v2809_v33, %v2811_v60  ;;  %v2825_v36 = vmul.f32 %v5336_v23, %v8786_v2  ;;  %4679 = vst [vmem:[%s8115_s28] sm:$0xff] %v4678_v57   ;;  %v3835_v53 = vadd.f32 %v8073_v39, %v3746_v34  ;;  %v3925_v39 = vpop.f32.mrf.mxu2 }
 0x2f3   : > { %5343 = vrcp.f32 %v2842_v18  ;;  %3779 = vmatmul.bf16.gmra.mxu0 %v3439_v50  ;;  %v2830_v43 = vmul.f32 %v5338_v7, %v8784_v29  ;;  %v2546_v6 = vpack.c.bf16 %v8997_v47, %v8996_v62  ;;  %v2548_v60 = vpack.c.bf16 %v7642_v5, %v7640_v35  ;;  %v8127_v34 = vpop.f32.mrf.mxu3  ;;  %v3750_v56 = vpop.f32.mrf.mxu0  ;;  %v8998_v35 = vld [vmem:[#allocation22_spill] sm:$0xff] }
 0x2f4   : > { %3868 = vmatmul.bf16.gmra.mxu1 %v3440_v55  ;;  %v5340_v27 = vpop.eup %5339  ;;  %v8125_v46 = vadd.f32 1.0, %v2379_v12  ;;  %v2826_v10 = vpack.c.bf16 %v2823_v13, %v2825_v36  ;;  %v3217_v26 = vunpack.c.l.bf16 %v2812_v37  ;;  %v3218_v51 = vunpack.c.h.bf16 %v2812_v37  ;;  %v8130_v9 = vpop.f32.mrf.mxu1  ;;  %v9000_v13 = vld [vmem:[#allocation18_spill] sm:$0xff] }
 0x2f5   : > { %v2832_v18 = vmul.f32 %v5340_v27, %v8786_v2  ;;  %v2834_v33 = vunpack.c.h.bf16 %v2546_v6  ;;  %v2835_v48 = vunpack.c.l.bf16 %v2546_v6  ;;  %v2848_v21 = vunpack.c.h.bf16 %v2548_v60 }
 0x2f6   : > { %v3221_v14 = vunpack.c.l.bf16 %v2826_v10  ;;  %v8999_v5 = vunpack.c.l.bf16 %v8998_v35  ;;  %v3222_v23 = vunpack.c.h.bf16 %v2826_v10  ;;  %v3099_v57 = vunpack.c.l.bf16 %v9000_v13 }
 0x2f7   : > { %v5342_v1 = vpop.eup %5341  ;;  %v2833_v37 = vpack.c.bf16 %v2830_v43, %v2832_v18  ;;  %5345 = vrcp.f32 %v2834_v33  ;;  %v2849_v55 = vunpack.c.l.bf16 %v2548_v60  ;;  %v9001_v36 = vunpack.c.l.bf16 %v8989_v28 }
 0x2f8   : > { %v3345_v12 = vmul.f32 %v3217_v26, %v8999_v5  ;;  %v2844_v50 = vmul.f32 %v5342_v1, %v8784_v29  ;;  %v9002_v47 = vunpack.c.h.bf16 %v8998_v35  ;;  %v9003_v27 = vunpack.c.h.bf16 %v8989_v28  ;;  %v9004_v1 = vld [vmem:[#allocation27_spill] sm:$0xff] }
 0x2f9   : > { %v5344_v7 = vpop.eup %5343  ;;  %v3349_v62 = vmul.f32 %v3221_v14, %v9001_v36  ;;  %5347 = vrcp.f32 %v2835_v48  ;;  %v3223_v26 = vunpack.c.l.bf16 %v2833_v37  ;;  %v3224_v5 = vunpack.c.h.bf16 %v2833_v37 }
 0x2fa   : > { %v3346_v6 = vmul.f32 %v3218_v51, %v9002_v47  ;;  %v3350_v16 = vmul.f32 %v3222_v23, %v9003_v27  ;;  %v2846_v10 = vmul.f32 %v5344_v7, %v8786_v2  ;;  %5349 = vrcp.f32 %v2848_v21  ;;  %v9005_v51 = vld [vmem:[#allocation33_spill] sm:$0xff]  ;;  %v8155_v37 = vpop.f32.mrf.mxu2 }
 0x2fb   : > { %v3441_v43 = vpack.c.bf16 %v3349_v62, %v3345_v12  ;;  %v3100_v60 = vunpack.c.h.bf16 %v9000_v13  ;;  %5351 = vrcp.f32 %v2849_v55  ;;  %v3101_v14 = vunpack.c.l.bf16 %v9004_v1  ;;  %v3752_v36 = vpop.f32.mrf.mxu0 }
 0x2fc   : > { %v3442_v18 = vpack.c.bf16 %v3350_v16, %v3346_v6  ;;  %v2847_v33 = vpack.c.bf16 %v2844_v50, %v2846_v10  ;;  %v3924_v35 = vadd.f32 %v8088_v17, %v3835_v53  ;;  %v3748_v28 = vadd.f32 %v8036_v31, %v8094_v54  ;;  %v8157_v50 = vpop.f32.mrf.mxu3  ;;  %v8162_v62 = vpop.f32.mrf.mxu1 }
 0x2fd   : > { %3957 = vmatmul.bf16.gmra.mxu2 %v3441_v43  ;;  %v9006_v48 = vunpack.c.l.bf16 %v9005_v51  ;;  %v9007_v21 = vunpack.c.h.bf16 %v9005_v51  ;;  %v3102_v16 = vunpack.c.h.bf16 %v9004_v1  ;;  %v2549_v13 = vpack.c.bf16 %v7650_v22, %v7644_v44  ;;  %v5346_v17 = vpop.eup %5345 }
 0x2fe   : > { %4046 = vmatmul.bf16.gmra.mxu3 %v3442_v18  ;;  %v3227_v53 = vunpack.c.l.bf16 %v2847_v33  ;;  %v3228_v54 = vunpack.c.h.bf16 %v2847_v33  ;;  %v3837_v55 = vadd.f32 %v8096_v19, %v3748_v28  ;;  %v2551_v7 = vpack.c.bf16 %v7677_v45, %v7675_v25 }
 0x2ff   : > { %v3351_v23 = vmul.f32 %v3223_v26, %v9006_v48  ;;  %v3352_v12 = vmul.f32 %v3224_v5, %v9007_v21  ;;  %v5348_v47 = vpop.eup %5347  ;;  %v2837_v6 = vmul.f32 %v5346_v17, %v8784_v29  ;;  %v3751_v44 = vadd.f32 %v8036_v31, %v3750_v56 }
 0x300   : > { %v2855_v22 = vunpack.c.h.bf16 %v2549_v13  ;;  %v2856_v27 = vunpack.c.l.bf16 %v2549_v13  ;;  %v5350_v10 = vpop.eup %5349  ;;  %v3355_v26 = vmul.f32 %v3227_v53, %v3099_v57  ;;  %v3356_v5 = vmul.f32 %v3228_v54, %v3100_v60  ;;  %v9008_v57 = vld [vmem:[#allocation34_spill] sm:$0xff] }
 0x301   : > { %v2839_v43 = vmul.f32 %v5348_v47, %v8786_v2  ;;  %v3926_v18 = vadd.f32 %v3925_v39, %v3837_v55  ;;  %v5352_v19 = vpop.eup %5351  ;;  %v2851_v33 = vmul.f32 %v5350_v10, %v8784_v29  ;;  %v2869_v25 = vunpack.c.h.bf16 %v2551_v7 }
 0x302   : > { %5353 = vrcp.f32 %v2855_v22  ;;  %v2870_v45 = vunpack.c.l.bf16 %v2551_v7  ;;  %v3443_v28 = vpack.c.bf16 %v3355_v26, %v3351_v23  ;;  %v3444_v51 = vpack.c.bf16 %v3356_v5, %v3352_v12 }
 0x303   : > { %v2840_v48 = vpack.c.bf16 %v2837_v6, %v2839_v43  ;;  %v2853_v21 = vmul.f32 %v5352_v19, %v8786_v2  ;;  %v4013_v56 = vadd.f32 %v8090_v15, %v3924_v35  ;;  %v4015_v13 = vadd.f32 %v8127_v34, %v3926_v18  ;;  %v3930_v15 = vpop.f32.mrf.mxu2  ;;  %v3755_v6 = vpop.f32.mrf.mxu0  ;;  %v9010_v43 = vld [vmem:[#allocation44_spill] sm:$0xff] }
 0x304   : > { %5355 = vrcp.f32 %v2856_v27  ;;  %v2550_v60 = vpack.c.bf16 %v9008_v57, %v7653_v0  ;;  %3784 = vmatmul.bf16.gmra.mxu0 %v3443_v28  ;;  %3873 = vmatmul.bf16.gmra.mxu1 %v3444_v51  ;;  %v2552_v12 = vpack.c.bf16 %v7715_v24, %v7709_v42  ;;  %v4019_v35 = vpop.f32.mrf.mxu3  ;;  %v3840_v7 = vadd.f32 %v8130_v9, %v3751_v44  ;;  %v9009_v0 = vld [vmem:[#allocation45_spill] sm:$0xff]  ;;  %v8178_v5 = vpop.f32.mrf.mxu1 }
 0x305   : > { %v2854_v39 = vpack.c.bf16 %v2851_v33, %v2853_v21  ;;  %v3225_v17 = vunpack.c.l.bf16 %v2840_v48  ;;  %v3226_v53 = vunpack.c.h.bf16 %v2840_v48  ;;  %5357 = vrcp.f32 %v2869_v25 }
 0x306   : > { %v4683_v23 = vpack.c.bf16 %v4015_v13, %v4013_v56  ;;  %5359 = vrcp.f32 %v2870_v45  ;;  %v2862_v54 = vunpack.c.h.bf16 %v2550_v60  ;;  %v3107_v47 = vunpack.c.l.bf16 %v9009_v0 }
 0x307   : > { %v3229_v34 = vunpack.c.l.bf16 %v2854_v39  ;;  %v3230_v55 = vunpack.c.h.bf16 %v2854_v39  ;;  %v2863_v27 = vunpack.c.l.bf16 %v2550_v60  ;;  %v2876_v10 = vunpack.c.h.bf16 %v2552_v12 }
 0x308   : > { %v5354_v22 = vpop.eup %5353  ;;  %4770 = vst [vmem:[%s8115_s28 + $0x8] sm:$0xff] %v4683_v23   ;;  %5361 = vrcp.f32 %v2862_v54  ;;  %v2877_v26 = vunpack.c.l.bf16 %v2552_v12  ;;  %v9011_v42 = vunpack.c.l.bf16 %v9010_v43  ;;  %v9012_v33 = vunpack.c.h.bf16 %v9010_v43  ;;  %v9014_v43 = vld [vmem:[#allocation28_spill] sm:$0xff] }
 0x309   : > { %v3357_v18 = vmul.f32 %v3229_v34, %v3101_v14  ;;  %v3358_v19 = vmul.f32 %v3230_v55, %v3102_v16  ;;  %v2858_v9 = vmul.f32 %v5354_v22, %v8784_v29  ;;  %5363 = vrcp.f32 %v2863_v27 }
 0x30a   : > { %v3353_v24 = vmul.f32 %v3225_v17, %v9011_v42  ;;  %v5356_v44 = vpop.eup %5355  ;;  %v3354_v25 = vmul.f32 %v3226_v53, %v9012_v33  ;;  %v3929_v45 = vadd.f32 %v8155_v37, %v3840_v7  ;;  %v3753_v28 = vadd.f32 %v8036_v31, %v3752_v36  ;;  %v9013_v37 = vld [vmem:[#allocation82_spill] sm:$0xff] }
 0x30b   : > { %v5358_v51 = vpop.eup %5357  ;;  %v2860_v21 = vmul.f32 %v5356_v44, %v8786_v2  ;;  %v3108_v56 = vunpack.c.h.bf16 %v9009_v0  ;;  %5365 = vrcp.f32 %v2876_v10  ;;  %v3109_v39 = vunpack.c.l.bf16 %v9013_v37  ;;  %v8200_v34 = vpop.f32.mrf.mxu2 }
 0x30c   : > { %v3445_v48 = vpack.c.bf16 %v3357_v18, %v3353_v24  ;;  %v5360_v1 = vpop.eup %5359  ;;  %v3446_v14 = vpack.c.bf16 %v3358_v19, %v3354_v25  ;;  %v2872_v16 = vmul.f32 %v5358_v51, %v8784_v29  ;;  %5367 = vrcp.f32 %v2877_v26 }
 0x30d   : > { %v3842_v13 = vadd.f32 %v8162_v62, %v3753_v28  ;;  %v2861_v57 = vpack.c.bf16 %v2858_v9, %v2860_v21  ;;  %v2874_v60 = vmul.f32 %v5360_v1, %v8786_v2  ;;  %v2553_v36 = vpack.c.bf16 %v7727_v52, %v7725_v40  ;;  %v8202_v62 = vpop.f32.mrf.mxu3  ;;  %v8206_v52 = vpop.f32.mrf.mxu0  ;;  %v9017_v1 = vld [vmem:[#allocation57_spill] sm:$0xff] }
 0x30e   : > { %v5362_v17 = vpop.eup %5361  ;;  %3962 = vmatmul.bf16.gmra.mxu2 %v3445_v48  ;;  %4051 = vmatmul.bf16.gmra.mxu3 %v3446_v14  ;;  %v3110_v53 = vunpack.c.h.bf16 %v9013_v37  ;;  %v4018_v23 = vadd.f32 %v8157_v50, %v3929_v45  ;;  %v3756_v54 = vadd.f32 %v8036_v31, %v3755_v6  ;;  %v2555_v40 = vpack.c.bf16 %v7760_v41, %v7753_v63 }
 0x30f   : > { %v3931_v12 = vadd.f32 %v3930_v15, %v3842_v13  ;;  %v2875_v55 = vpack.c.bf16 %v2872_v16, %v2874_v60  ;;  %v3231_v7 = vunpack.c.l.bf16 %v2861_v57  ;;  %v3232_v0 = vunpack.c.h.bf16 %v2861_v57  ;;  %v5364_v22 = vpop.eup %5363  ;;  %v9018_v60 = vld [vmem:[#allocation61_spill] sm:$0xff] }
 0x310   : > { %v2865_v27 = vmul.f32 %v5362_v17, %v8784_v29  ;;  %v2883_v50 = vunpack.c.h.bf16 %v2553_v36  ;;  %v2884_v15 = vunpack.c.l.bf16 %v2553_v36  ;;  %v9015_v42 = vunpack.c.l.bf16 %v9014_v43  ;;  %v9019_v36 = vld [vmem:[#allocation62_spill] sm:$0xff] }
 0x311   : > { %v4020_v10 = vadd.f32 %v4019_v35, %v3931_v12  ;;  %v5366_v26 = vpop.eup %5365  ;;  %v3235_v6 = vunpack.c.l.bf16 %v2875_v55  ;;  %v3236_v18 = vunpack.c.h.bf16 %v2875_v55  ;;  %v9016_v19 = vunpack.c.h.bf16 %v9014_v43  ;;  %v8215_v35 = vpop.f32.mrf.mxu1 }
 0x312   : > { %v3359_v24 = vmul.f32 %v3231_v7, %v9015_v42  ;;  %v5368_v44 = vpop.eup %5367  ;;  %v2867_v63 = vmul.f32 %v5364_v22, %v8786_v2  ;;  %v2879_v41 = vmul.f32 %v5366_v26, %v8784_v29  ;;  %5369 = vrcp.f32 %v2883_v50  ;;  %v9020_v22 = vld [vmem:[#allocation51_spill] sm:$0xff] }
 0x313   : > { %v3360_v9 = vmul.f32 %v3232_v0, %v9016_v19  ;;  %v4688_v33 = vpack.c.bf16 %v4020_v10, %v4018_v23  ;;  %v3363_v25 = vmul.f32 %v3235_v6, %v3107_v47  ;;  %v3364_v45 = vmul.f32 %v3236_v18, %v3108_v56  ;;  %v3935_v56 = vpop.f32.mrf.mxu2 }
 0x314   : > { %v2881_v28 = vmul.f32 %v5368_v44, %v8786_v2  ;;  %5371 = vrcp.f32 %v2884_v15  ;;  %v2868_v51 = vpack.c.bf16 %v2865_v27, %v2867_v63  ;;  %v2897_v48 = vunpack.c.h.bf16 %v2555_v40 }
 0x315   : > { %4771 = vst [vmem:[%s8115_s28 + $0x10] sm:$0xff] %v4688_v33   ;;  %v2898_v21 = vunpack.c.l.bf16 %v2555_v40  ;;  %v2554_v14 = vpack.c.bf16 %v9017_v1, %v7739_v49  ;;  %v3447_v16 = vpack.c.bf16 %v3363_v25, %v3359_v24  ;;  %v3448_v13 = vpack.c.bf16 %v3364_v45, %v3360_v9  ;;  %v8223_v55 = vpop.f32.mrf.mxu3  ;;  %v3760_v26 = vpop.f32.mrf.mxu0  ;;  %v9025_v1 = vld [vmem:[#allocation66_spill] sm:$0xff] }
 0x316   : > { %v2882_v57 = vpack.c.bf16 %v2879_v41, %v2881_v28  ;;  %v2556_v17 = vpack.c.bf16 %v9019_v36, %v9018_v60  ;;  %v3233_v23 = vunpack.c.l.bf16 %v2868_v51  ;;  %v3234_v12 = vunpack.c.h.bf16 %v2868_v51 }
 0x317   : > { %5373 = vrcp.f32 %v2897_v48  ;;  %v2890_v47 = vunpack.c.h.bf16 %v2554_v14  ;;  %3789 = vmatmul.bf16.gmra.mxu0 %v3447_v16  ;;  %3878 = vmatmul.bf16.gmra.mxu1 %v3448_v13  ;;  %v2891_v40 = vunpack.c.l.bf16 %v2554_v14  ;;  %v9021_v27 = vunpack.c.l.bf16 %v9020_v22  ;;  %v9026_v16 = vld [vmem:[#allocation67_spill] sm:$0xff] }
 0x318   : > { %v3237_v7 = vunpack.c.l.bf16 %v2882_v57  ;;  %v3238_v0 = vunpack.c.h.bf16 %v2882_v57  ;;  %5375 = vrcp.f32 %v2898_v21  ;;  %v5370_v49 = vpop.eup %5369  ;;  %v3845_v50 = vadd.f32 %v8178_v5, %v3756_v54  ;;  %v9023_v5 = vld [vmem:[#allocation19_spill] sm:$0xff]  ;;  %v9024_v21 = vld [vmem:[#allocation65_spill] sm:$0xff] }
 0x319   : > { %v3361_v10 = vmul.f32 %v3233_v23, %v9021_v27  ;;  %5377 = vrcp.f32 %v2890_v47  ;;  %v2904_v15 = vunpack.c.h.bf16 %v2556_v17  ;;  %v2886_v24 = vmul.f32 %v5370_v49, %v8784_v29  ;;  %v3849_v45 = vpop.f32.mrf.mxu1  ;;  %v9027_v13 = vld [vmem:[#allocation15_spill] sm:$0xff]  ;;  %v9028_v27 = vld [vmem:[#allocation32_spill] sm:$0xff] }
 0x31a   : > { %v5372_v6 = vpop.eup %5371  ;;  %v3365_v43 = vmul.f32 %v3237_v7, %v3109_v39  ;;  %v3366_v42 = vmul.f32 %v3238_v0, %v3110_v53  ;;  %5379 = vrcp.f32 %v2891_v40  ;;  %v9022_v18 = vunpack.c.h.bf16 %v9020_v22 }
 0x31b   : > { %v2888_v9 = vmul.f32 %v5372_v6, %v8786_v2  ;;  %v2905_v44 = vunpack.c.l.bf16 %v2556_v17  ;;  %5381 = vrcp.f32 %v2904_v15  ;;  %v3115_v54 = vunpack.c.l.bf16 %v9023_v5  ;;  %v8249_v40 = vpop.f32.mrf.mxu2 }
 0x31c   : > { %v3362_v19 = vmul.f32 %v3234_v12, %v9022_v18  ;;  %v3449_v63 = vpack.c.bf16 %v3365_v43, %v3361_v10  ;;  %v3116_v41 = vunpack.c.h.bf16 %v9023_v5  ;;  %v3934_v33 = vadd.f32 %v8200_v34, %v3845_v50 }
 0x31d   : > { %v5374_v37 = vpop.eup %5373  ;;  %v2889_v53 = vpack.c.bf16 %v2886_v24, %v2888_v9  ;;  %5383 = vrcp.f32 %v2905_v44  ;;  %v3758_v25 = vadd.f32 %v8036_v31, %v8206_v52  ;;  %v3761_v48 = vadd.f32 %v8036_v31, %v3760_v26  ;;  %v3762_v44 = vpop.f32.mrf.mxu0 }
 0x31e   : > { %v3450_v39 = vpack.c.bf16 %v3366_v42, %v3362_v19  ;;  %v5376_v28 = vpop.eup %5375  ;;  %v2900_v51 = vmul.f32 %v5374_v37, %v8784_v29  ;;  %v2557_v14 = vpack.c.bf16 %v9025_v1, %v9024_v21  ;;  %v2559_v57 = vpack.c.bf16 %v9027_v13, %v9026_v16  ;;  %3967 = vmatmul.bf16.gmra.mxu2 %v3449_v63 }
 0x31f   : > { %v5378_v34 = vpop.eup %5377  ;;  %v2902_v60 = vmul.f32 %v5376_v28, %v8786_v2  ;;  %v3239_v36 = vunpack.c.l.bf16 %v2889_v53  ;;  %v3240_v17 = vunpack.c.h.bf16 %v2889_v53  ;;  %v4023_v52 = vadd.f32 %v8202_v62, %v3934_v33  ;;  %v8256_v62 = vpop.f32.mrf.mxu3  ;;  %v9031_v28 = vld [vmem:[#allocation54_spill] sm:$0xff] }
 0x320   : > { %4056 = vmatmul.bf16.gmra.mxu3 %v3450_v39  ;;  %v5380_v23 = vpop.eup %5379  ;;  %v2893_v12 = vmul.f32 %v5378_v34, %v8784_v29  ;;  %v3847_v47 = vadd.f32 %v8215_v35, %v3758_v25  ;;  %v2911_v7 = vunpack.c.h.bf16 %v2557_v14  ;;  %v2912_v0 = vunpack.c.l.bf16 %v2557_v14 }
 0x321   : > { %v5382_v49 = vpop.eup %5381  ;;  %v2903_v22 = vpack.c.bf16 %v2900_v51, %v2902_v60  ;;  %v9029_v10 = vunpack.c.l.bf16 %v9028_v27  ;;  %v9030_v15 = vunpack.c.h.bf16 %v9028_v27  ;;  %v2895_v6 = vmul.f32 %v5380_v23, %v8786_v2  ;;  %v3851_v34 = vpop.f32.mrf.mxu1  ;;  %v9035_v23 = vld [vmem:[#allocation64_spill] sm:$0xff] }
 0x322   : > { %v2907_v43 = vmul.f32 %v5382_v49, %v8784_v29  ;;  %v3936_v42 = vadd.f32 %v3935_v56, %v3847_v47  ;;  %5385 = vrcp.f32 %v2911_v7  ;;  %v2925_v35 = vunpack.c.h.bf16 %v2559_v57 }
 0x323   : > { %v3367_v50 = vmul.f32 %v3239_v36, %v9029_v10  ;;  %v3368_v26 = vmul.f32 %v3240_v17, %v9030_v15  ;;  %v5384_v24 = vpop.eup %5383  ;;  %v3243_v18 = vunpack.c.l.bf16 %v2903_v22  ;;  %v3244_v19 = vunpack.c.h.bf16 %v2903_v22  ;;  %v9034_v17 = vld [vmem:[#allocation63_spill] sm:$0xff]  ;;  %v3940_v47 = vpop.f32.mrf.mxu2 }
 0x324   : > { %v2896_v9 = vpack.c.bf16 %v2893_v12, %v2895_v6  ;;  %5387 = vrcp.f32 %v2912_v0  ;;  %v2909_v63 = vmul.f32 %v5384_v24, %v8786_v2  ;;  %v4025_v5 = vadd.f32 %v8223_v55, %v3936_v42 }
 0x325   : > { %v2926_v33 = vunpack.c.l.bf16 %v2559_v57  ;;  %5389 = vrcp.f32 %v2925_v35  ;;  %v3371_v37 = vmul.f32 %v3243_v18, %v3115_v54  ;;  %v3372_v39 = vmul.f32 %v3244_v19, %v3116_v41  ;;  %v9032_v57 = vld [vmem:[#allocation58_spill] sm:$0xff] }
 0x326   : > { %v3241_v53 = vunpack.c.l.bf16 %v2896_v9  ;;  %v3242_v25 = vunpack.c.h.bf16 %v2896_v9  ;;  %v2910_v56 = vpack.c.bf16 %v2907_v43, %v2909_v63  ;;  %v3117_v51 = vunpack.c.l.bf16 %v9031_v28 }
 0x327   : > { %v4693_v21 = vpack.c.bf16 %v4025_v5, %v4023_v52  ;;  %5391 = vrcp.f32 %v2926_v33  ;;  %v3451_v1 = vpack.c.bf16 %v3371_v37, %v3367_v50  ;;  %v3452_v14 = vpack.c.bf16 %v3372_v39, %v3368_v26  ;;  %v4029_v24 = vpop.f32.mrf.mxu3  ;;  %v3765_v33 = vpop.f32.mrf.mxu0 }
 0x328   : > { %v3118_v16 = vunpack.c.h.bf16 %v9031_v28  ;;  %v3850_v13 = vadd.f32 %v3849_v45, %v3761_v48  ;;  %v5386_v60 = vpop.eup %5385  ;;  %v3245_v55 = vunpack.c.l.bf16 %v2910_v56  ;;  %v9033_v36 = vunpack.c.l.bf16 %v9032_v57  ;;  %v9037_v48 = vld [vmem:[#allocation59_spill] sm:$0xff] }
 0x329   : > { %v3246_v41 = vunpack.c.h.bf16 %v2910_v56  ;;  %4772 = vst [vmem:[%s8115_s28 + $0x18] sm:$0xff] %v4693_v21   ;;  %v2558_v12 = vpack.c.bf16 %v9035_v23, %v9034_v17  ;;  %3794 = vmatmul.bf16.gmra.mxu0 %v3451_v1  ;;  %3883 = vmatmul.bf16.gmra.mxu1 %v3452_v14  ;;  %v9036_v52 = vunpack.c.h.bf16 %v9032_v57  ;;  %v2914_v45 = vmul.f32 %v5386_v60, %v8784_v29  ;;  %v9038_v56 = vld [vmem:[#allocation83_spill] sm:$0xff]  ;;  %v9040_v57 = vld [vmem:[#allocation73_spill] sm:$0xff] }
 0x32a   : > { %v3369_v54 = vmul.f32 %v3241_v53, %v9033_v36  ;;  %v5388_v7 = vpop.eup %5387  ;;  %v3123_v49 = vunpack.c.l.bf16 %v9037_v48  ;;  %v2560_v22 = vpack.c.bf16 %v7884_v32, %v7874_v20  ;;  %v3373_v10 = vmul.f32 %v3245_v55, %v3117_v51  ;;  %v3854_v55 = vpop.f32.mrf.mxu1  ;;  %v9041_v36 = vld [vmem:[#allocation75_spill] sm:$0xff] }
 0x32b   : > { %v3370_v0 = vmul.f32 %v3242_v25, %v9036_v52  ;;  %v5390_v27 = vpop.eup %5389  ;;  %v3374_v50 = vmul.f32 %v3246_v41, %v3118_v16  ;;  %v2916_v15 = vmul.f32 %v5388_v7, %v8786_v2  ;;  %v2918_v26 = vunpack.c.h.bf16 %v2558_v12  ;;  %v9042_v17 = vld [vmem:[#allocation47_spill] sm:$0xff] }
 0x32c   : > { %v2928_v6 = vmul.f32 %v5390_v27, %v8784_v29  ;;  %v2919_v43 = vunpack.c.l.bf16 %v2558_v12  ;;  %v2932_v42 = vunpack.c.h.bf16 %v2560_v22  ;;  %v2933_v35 = vunpack.c.l.bf16 %v2560_v22 }
 0x32d   : > { %v5392_v18 = vpop.eup %5391  ;;  %v3453_v19 = vpack.c.bf16 %v3373_v10, %v3369_v54  ;;  %v3454_v9 = vpack.c.bf16 %v3374_v50, %v3370_v0  ;;  %v2917_v63 = vpack.c.bf16 %v2914_v45, %v2916_v15  ;;  %5393 = vrcp.f32 %v2918_v26  ;;  %v3943_v0 = vpop.f32.mrf.mxu2 }
 0x32e   : > { %v2930_v5 = vmul.f32 %v5392_v18, %v8786_v2  ;;  %5395 = vrcp.f32 %v2919_v43  ;;  %v3939_v20 = vadd.f32 %v8249_v40, %v3850_v13  ;;  %v3763_v32 = vadd.f32 %v8036_v31, %v3762_v44  ;;  %v9039_v44 = vld [vmem:[#allocation69_spill] sm:$0xff] }
 0x32f   : > { %v3247_v37 = vunpack.c.l.bf16 %v2917_v63  ;;  %v3124_v39 = vunpack.c.h.bf16 %v9037_v48  ;;  %v3248_v53 = vunpack.c.h.bf16 %v2917_v63  ;;  %5397 = vrcp.f32 %v2932_v42  ;;  %3972 = vmatmul.bf16.gmra.mxu2 %v3453_v19  ;;  %v8296_v19 = vpop.f32.mrf.mxu3  ;;  %v9047_v63 = vld [vmem:[#allocation77_spill] sm:$0xff] }
 0x330   : > { %4061 = vmatmul.bf16.gmra.mxu3 %v3454_v9  ;;  %v2931_v25 = vpack.c.bf16 %v2928_v6, %v2930_v5  ;;  %5399 = vrcp.f32 %v2933_v35  ;;  %v3125_v28 = vunpack.c.l.bf16 %v9038_v56  ;;  %v3852_v51 = vadd.f32 %v3851_v34, %v3763_v32  ;;  %v9045_v35 = vld [vmem:[#allocation20_spill] sm:$0xff] }
 0x331   : > { %v3126_v21 = vunpack.c.h.bf16 %v9038_v56  ;;  %v4028_v1 = vadd.f32 %v8256_v62, %v3939_v20  ;;  %v3766_v40 = vadd.f32 %v8036_v31, %v3765_v33  ;;  %v2561_v14 = vpack.c.bf16 %v9039_v44, %v7890_v8  ;;  %v9048_v33 = vld [vmem:[#allocation17_spill] sm:$0xff] }
 0x332   : > { %v3251_v16 = vunpack.c.l.bf16 %v2931_v25  ;;  %v3252_v13 = vunpack.c.h.bf16 %v2931_v25  ;;  %v3941_v60 = vadd.f32 %v3940_v47, %v3852_v51  ;;  %v2563_v54 = vpack.c.bf16 %v9041_v36, %v9040_v57 }
 0x333   : > { %v5394_v41 = vpop.eup %5393  ;;  %v9043_v23 = vunpack.c.l.bf16 %v9042_v17  ;;  %v9044_v12 = vunpack.c.h.bf16 %v9042_v17  ;;  %v2939_v62 = vunpack.c.h.bf16 %v2561_v14  ;;  %v2940_v52 = vunpack.c.l.bf16 %v2561_v14 }
 0x334   : > { %v5396_v45 = vpop.eup %5395  ;;  %v3379_v48 = vmul.f32 %v3251_v16, %v3123_v49  ;;  %v3380_v8 = vmul.f32 %v3252_v13, %v3124_v39  ;;  %v2921_v22 = vmul.f32 %v5394_v41, %v8784_v29  ;;  %v4030_v47 = vadd.f32 %v4029_v24, %v3941_v60  ;;  %v9046_v24 = vld [vmem:[#allocation76_spill] sm:$0xff] }
 0x335   : > { %v3375_v34 = vmul.f32 %v3247_v37, %v9043_v23  ;;  %v3376_v7 = vmul.f32 %v3248_v53, %v9044_v12  ;;  %v5398_v27 = vpop.eup %5397  ;;  %v2923_v10 = vmul.f32 %v5396_v45, %v8786_v2  ;;  %5401 = vrcp.f32 %v2939_v62  ;;  %v9049_v37 = vld [vmem:[#allocation36_spill] sm:$0xff]  ;;  %v3767_v53 = vpop.f32.mrf.mxu0 }
 0x336   : > { %v2953_v50 = vunpack.c.h.bf16 %v2563_v54  ;;  %v2954_v15 = vunpack.c.l.bf16 %v2563_v54  ;;  %v5400_v26 = vpop.eup %5399  ;;  %v2935_v6 = vmul.f32 %v5398_v27, %v8784_v29  ;;  %v4698_v43 = vpack.c.bf16 %v4030_v47, %v4028_v1 }
 0x337   : > { %v3855_v42 = vadd.f32 %v3854_v55, %v3766_v40  ;;  %v3131_v18 = vunpack.c.l.bf16 %v9045_v35  ;;  %v2924_v49 = vpack.c.bf16 %v2921_v22, %v2923_v10  ;;  %v2937_v9 = vmul.f32 %v5400_v26, %v8786_v2  ;;  %v9050_v55 = vld [vmem:[#allocation53_spill] sm:$0xff]  ;;  %v9054_v22 = vld [vmem:[#allocation78_spill] sm:$0xff] }
 0x338   : > { %5403 = vrcp.f32 %v2940_v52  ;;  %v2562_v5 = vpack.c.bf16 %v9047_v63, %v9046_v24  ;;  %v3455_v20 = vpack.c.bf16 %v3379_v48, %v3375_v34  ;;  %v3456_v32 = vpack.c.bf16 %v3380_v8, %v3376_v7  ;;  %4773 = vst [vmem:[%s8115_s28 + $0x20] sm:$0xff] %v4698_v43   ;;  %v3856_v7 = vpop.f32.mrf.mxu1  ;;  %v3945_v48 = vpop.f32.mrf.mxu2  ;;  %v9053_v8 = vld [vmem:[#allocation16_spill] sm:$0xff] }
 0x339   : > { %5405 = vrcp.f32 %v2953_v50  ;;  %v2564_v39 = vpack.c.bf16 %v9049_v37, %v9048_v33  ;;  %v2938_v25 = vpack.c.bf16 %v2935_v6, %v2937_v9  ;;  %v3249_v51 = vunpack.c.l.bf16 %v2924_v49  ;;  %v4034_v24 = vpop.f32.mrf.mxu3 }
 0x33a   : > { %v3250_v1 = vunpack.c.h.bf16 %v2924_v49  ;;  %5407 = vrcp.f32 %v2954_v15  ;;  %3799 = vmatmul.bf16.gmra.mxu0 %v3455_v20  ;;  %3888 = vmatmul.bf16.gmra.mxu1 %v3456_v32  ;;  %v3132_v40 = vunpack.c.h.bf16 %v9045_v35  ;;  %v2946_v44 = vunpack.c.h.bf16 %v2562_v5 }
 0x33b   : > { %v2947_v14 = vunpack.c.l.bf16 %v2562_v5  ;;  %v2960_v16 = vunpack.c.h.bf16 %v2564_v39  ;;  %v5402_v13 = vpop.eup %5401  ;;  %v3253_v60 = vunpack.c.l.bf16 %v2938_v25  ;;  %v9051_v57 = vunpack.c.l.bf16 %v9050_v55  ;;  %v9056_v5 = vld [vmem:[#allocation80_spill] sm:$0xff] }
 0x33c   : > { %v3254_v54 = vunpack.c.h.bf16 %v2938_v25  ;;  %v2961_v41 = vunpack.c.l.bf16 %v2564_v39  ;;  %v9052_v17 = vunpack.c.h.bf16 %v9050_v55  ;;  %v2942_v34 = vmul.f32 %v5402_v13, %v8784_v29  ;;  %v9058_v55 = vld [vmem:[#allocation56_spill] sm:$0xff] }
 0x33d   : > { %v3377_v36 = vmul.f32 %v3249_v51, %v9051_v57  ;;  %5409 = vrcp.f32 %v2946_v44  ;;  %v3768_v12 = vadd.f32 %v8036_v31, %v3767_v53  ;;  %v3381_v52 = vmul.f32 %v3253_v60, %v3125_v28  ;;  %v3770_v51 = vpop.f32.mrf.mxu0 }
 0x33e   : > { %v3378_v23 = vmul.f32 %v3250_v1, %v9052_v17  ;;  %v5404_v62 = vpop.eup %5403  ;;  %v3382_v45 = vmul.f32 %v3254_v54, %v3126_v21  ;;  %5411 = vrcp.f32 %v2947_v14  ;;  %v2565_v47 = vpack.c.bf16 %v9054_v22, %v9053_v8  ;;  %v9055_v21 = vld [vmem:[#allocation60_spill] sm:$0xff]  ;;  %v8341_v22 = vld [vmem:[%s8468_s4] ss:$0 sm:$0xff] }
 0x33f   : > { %v5406_v27 = vpop.eup %5405  ;;  %v2944_v10 = vmul.f32 %v5404_v62, %v8786_v2  ;;  %5413 = vrcp.f32 %v2960_v16  ;;  %v3944_v50 = vadd.f32 %v3943_v0, %v3855_v42  ;;  %v3857_v15 = vadd.f32 %v3856_v7, %v3768_v12  ;;  %v9057_v0 = vld [vmem:[#allocation38_spill] sm:$0xff] }
 0x340   : > { %v5408_v31 = vpop.eup %5407  ;;  %v3457_v26 = vpack.c.bf16 %v3381_v52, %v3377_v36  ;;  %v3458_v6 = vpack.c.bf16 %v3382_v45, %v3378_v23  ;;  %v2956_v43 = vmul.f32 %v5406_v27, %v8784_v29  ;;  %5415 = vrcp.f32 %v2961_v41  ;;  %v3859_v45 = vpop.f32.mrf.mxu1  ;;  %v9061_v27 = vld [vmem:[#allocation79_spill] sm:$0xff] }
 0x341   : > { %v2945_v28 = vpack.c.bf16 %v2942_v34, %v2944_v10  ;;  %v2958_v56 = vmul.f32 %v5408_v31, %v8786_v2  ;;  %v3133_v49 = vunpack.c.l.bf16 %v9055_v21  ;;  %v3946_v9 = vadd.f32 %v3945_v48, %v3857_v15  ;;  %v9062_v10 = vld [vmem:[#allocation81_spill] sm:$0xff] }
 0x342   : > { %3977 = vmatmul.bf16.gmra.mxu2 %v3457_v26  ;;  %4066 = vmatmul.bf16.gmra.mxu3 %v3458_v6  ;;  %v3134_v63 = vunpack.c.h.bf16 %v9055_v21  ;;  %v2567_v42 = vpack.c.bf16 %v9057_v0, %v9056_v5  ;;  %v2967_v20 = vunpack.c.h.bf16 %v2565_v47  ;;  %v2968_v32 = vunpack.c.l.bf16 %v2565_v47  ;;  %v9063_v6 = vld [vmem:[#allocation48_spill] sm:$0xff] }
 0x343   : > { %v5410_v33 = vpop.eup %5409  ;;  %v2959_v37 = vpack.c.bf16 %v2956_v43, %v2958_v56  ;;  %v3255_v39 = vunpack.c.l.bf16 %v2945_v28  ;;  %v3256_v53 = vunpack.c.h.bf16 %v2945_v28  ;;  %v4035_v25 = vadd.f32 %v4034_v24, %v3946_v9 }
 0x344   : > { %v5412_v1 = vpop.eup %5411  ;;  %v2949_v44 = vmul.f32 %v5410_v33, %v8784_v29  ;;  %v4033_v14 = vadd.f32 %v8296_v19, %v3944_v50  ;;  %5417 = vrcp.f32 %v2967_v20  ;;  %v2981_v16 = vunpack.c.h.bf16 %v2567_v42 }
 0x345   : > { %v5414_v13 = vpop.eup %5413  ;;  %v3259_v60 = vunpack.c.l.bf16 %v2959_v37  ;;  %v9059_v57 = vunpack.c.l.bf16 %v9058_v55  ;;  %v3260_v54 = vunpack.c.h.bf16 %v2959_v37  ;;  %v9060_v41 = vunpack.c.h.bf16 %v9058_v55  ;;  %v3948_v0 = vpop.f32.mrf.mxu2  ;;  %v9065_v37 = vld [vmem:[#allocation68_spill] sm:$0xff] }
 0x346   : > { %v5416_v23 = vpop.eup %5415  ;;  %v2951_v34 = vmul.f32 %v5412_v1, %v8786_v2  ;;  %v2963_v12 = vmul.f32 %v5414_v13, %v8784_v29  ;;  %v4703_v7 = vpack.c.bf16 %v4035_v25, %v4033_v14  ;;  %5419 = vrcp.f32 %v2968_v32 }
 0x347   : > { %v3383_v36 = vmul.f32 %v3255_v39, %v9059_v57  ;;  %v3384_v17 = vmul.f32 %v3256_v53, %v9060_v41  ;;  %v3387_v19 = vmul.f32 %v3259_v60, %v3131_v18  ;;  %v3388_v62 = vmul.f32 %v3260_v54, %v3132_v40 }
 0x348   : > { %v2965_v52 = vmul.f32 %v5416_v23, %v8786_v2  ;;  %v2982_v48 = vunpack.c.l.bf16 %v2567_v42  ;;  %v2952_v8 = vpack.c.bf16 %v2949_v44, %v2951_v34  ;;  %4774 = vst [vmem:[%s8115_s28 + $0x28] sm:$0xff] %v4703_v7   ;;  %v3771_v47 = vadd.f32 %v8341_v22, %v3770_v51  ;;  %v4037_v42 = vpop.f32.mrf.mxu3  ;;  %v3772_v44 = vpop.f32.mrf.mxu0 }
 0x349   : > { %5421 = vrcp.f32 %v2981_v16  ;;  %v2566_v18 = vpack.c.bf16 %v9062_v10, %v9061_v27  ;;  %v3459_v50 = vpack.c.bf16 %v3387_v19, %v3383_v36  ;;  %v3460_v35 = vpack.c.bf16 %v3388_v62, %v3384_v17  ;;  %v9069_v27 = vld [vmem:[#allocation41_spill] sm:$0xff] }
 0x34a   : > { %v2966_v40 = vpack.c.bf16 %v2963_v12, %v2965_v52  ;;  %5423 = vrcp.f32 %v2982_v48  ;;  %v5418_v15 = vpop.eup %5417  ;;  %v3257_v31 = vunpack.c.l.bf16 %v2952_v8  ;;  %v3258_v26 = vunpack.c.h.bf16 %v2952_v8  ;;  %v3861_v12 = vpop.f32.mrf.mxu1 }
 0x34b   : > { %v2568_v43 = vpack.c.bf16 %v8027_v11, %v9063_v6  ;;  %v2974_v28 = vunpack.c.h.bf16 %v2566_v18  ;;  %3804 = vmatmul.bf16.gmra.mxu0 %v3459_v50  ;;  %3893 = vmatmul.bf16.gmra.mxu1 %v3460_v35  ;;  %v2970_v24 = vmul.f32 %v5418_v15, %v8784_v29  ;;  %v2975_v5 = vunpack.c.l.bf16 %v2566_v18 }
 0x34c   : > { %v3261_v56 = vunpack.c.l.bf16 %v2966_v40  ;;  %v3262_v9 = vunpack.c.h.bf16 %v2966_v40  ;;  %v5420_v20 = vpop.eup %5419  ;;  %v9064_v32 = vunpack.c.h.bf16 %v8092_v38  ;;  %v9066_v39 = vunpack.c.l.bf16 %v9065_v37  ;;  %v9068_v38 = vld [vmem:[#allocation30_spill] sm:$0xff] }
 0x34d   : > { %5425 = vrcp.f32 %v2974_v28  ;;  %v2988_v11 = vunpack.c.h.bf16 %v2568_v43  ;;  %v2972_v1 = vmul.f32 %v5420_v20, %v8786_v2  ;;  %v9067_v16 = vunpack.c.h.bf16 %v9065_v37 }
 0x34e   : > { %v8351_v33 = vadd.f32 1.0, %v9064_v32  ;;  %v3385_v53 = vmul.f32 %v3257_v31, %v9066_v39  ;;  %v3389_v25 = vmul.f32 %v3261_v56, %v3133_v49  ;;  %v3390_v51 = vmul.f32 %v3262_v9, %v3134_v63 }
 0x34f   : > { %5427 = vrcp.f32 %v2975_v5  ;;  %v5422_v14 = vpop.eup %5421  ;;  %v3386_v13 = vmul.f32 %v3258_v26, %v9067_v16  ;;  %v3139_v60 = vunpack.c.l.bf16 %v9068_v38  ;;  %v2989_v55 = vunpack.c.l.bf16 %v2568_v43 }
 0x350   : > { %5429 = vrcp.f32 %v2988_v11  ;;  %v5424_v57 = vpop.eup %5423  ;;  %v3461_v36 = vpack.c.bf16 %v3389_v25, %v3385_v53  ;;  %v3860_v54 = vadd.f32 %v3859_v45, %v3771_v47  ;;  %v2973_v41 = vpack.c.bf16 %v2970_v24, %v2972_v1  ;;  %v4039_v43 = vpop.f32.mrf.mxu3  ;;  %v9072_v25 = vld [vmem:[#allocation31_spill] sm:$0xff] }
 0x351   : > { %v2984_v21 = vmul.f32 %v5422_v14, %v8784_v29  ;;  %v3462_v49 = vpack.c.bf16 %v3390_v51, %v3386_v13  ;;  %v2986_v63 = vmul.f32 %v5424_v57, %v8786_v2  ;;  %5431 = vrcp.f32 %v2989_v55 }
 0x352   : > { %v3773_v17 = vadd.f32 %v8341_v22, %v3772_v44  ;;  %v3263_v23 = vunpack.c.l.bf16 %v2973_v41  ;;  %v3264_v34 = vunpack.c.h.bf16 %v2973_v41  ;;  %v2569_v7 = vpack.c.bf16 %v8060_v58, %v8050_v4  ;;  %3982 = vmatmul.bf16.gmra.mxu2 %v3461_v36  ;;  %v3950_v58 = vpop.f32.mrf.mxu2  ;;  %v9073_v41 = vld [vmem:[#allocation71_spill] sm:$0xff] }
 0x353   : > { %v2571_v19 = vpack.c.bf16 %v8110_v59, %v8108_v30  ;;  %v5426_v62 = vpop.eup %5425  ;;  %4071 = vmatmul.bf16.gmra.mxu3 %v3462_v49  ;;  %v2987_v52 = vpack.c.bf16 %v2984_v21, %v2986_v63  ;;  %v3140_v45 = vunpack.c.h.bf16 %v9068_v38  ;;  %v3949_v48 = vadd.f32 %v3948_v0, %v3860_v54 }
 0x354   : > { %v3862_v8 = vadd.f32 %v3861_v12, %v3773_v17  ;;  %v9070_v10 = vunpack.c.l.bf16 %v9069_v27  ;;  %v9071_v50 = vunpack.c.h.bf16 %v9069_v27  ;;  %v2977_v4 = vmul.f32 %v5426_v62, %v8784_v29 }
 0x355   : > { %v5428_v47 = vpop.eup %5427  ;;  %v2995_v40 = vunpack.c.h.bf16 %v2569_v7  ;;  %v3267_v59 = vunpack.c.l.bf16 %v2987_v52  ;;  %v3268_v15 = vunpack.c.h.bf16 %v2987_v52  ;;  %v2996_v28 = vunpack.c.l.bf16 %v2569_v7 }
 0x356   : > { %v3391_v18 = vmul.f32 %v3263_v23, %v9070_v10  ;;  %v3392_v35 = vmul.f32 %v3264_v34, %v9071_v50  ;;  %v5430_v30 = vpop.eup %5429  ;;  %v2979_v31 = vmul.f32 %v5428_v47, %v8786_v2  ;;  %v3951_v26 = vadd.f32 %v3950_v58, %v3862_v8  ;;  %v9075_v58 = vld [vmem:[#allocation23_spill] sm:$0xff] }
 0x357   : > { %v2991_v6 = vmul.f32 %v5430_v30, %v8784_v29  ;;  %5433 = vrcp.f32 %v2995_v40  ;;  %v3009_v56 = vunpack.c.h.bf16 %v2571_v19  ;;  %v5432_v9 = vpop.eup %5431  ;;  %v3395_v24 = vmul.f32 %v3267_v59, %v3139_v60  ;;  %v3864_v47 = vpop.f32.mrf.mxu1  ;;  %v9076_v59 = vld [vmem:[#allocation24_spill] sm:$0xff] }
 0x358   : > { %v3396_v5 = vmul.f32 %v3268_v15, %v3140_v45  ;;  %v2980_v0 = vpack.c.bf16 %v2977_v4, %v2979_v31  ;;  %v4040_v20 = vadd.f32 %v4039_v43, %v3951_v26  ;;  %v2993_v32 = vmul.f32 %v5432_v9, %v8786_v2 }
 0x359   : > { %v4038_v37 = vadd.f32 %v4037_v42, %v3949_v48  ;;  %5435 = vrcp.f32 %v2996_v28  ;;  %v3010_v39 = vunpack.c.l.bf16 %v2571_v19  ;;  %v3463_v53 = vpack.c.bf16 %v3395_v24, %v3391_v18 }
 0x35a   : > { %v3464_v11 = vpack.c.bf16 %v3396_v5, %v3392_v35  ;;  %v3141_v51 = vunpack.c.l.bf16 %v9072_v25  ;;  %v3265_v1 = vunpack.c.l.bf16 %v2980_v0  ;;  %v2994_v44 = vpack.c.bf16 %v2991_v6, %v2993_v32 }
 0x35b   : > { %v4708_v14 = vpack.c.bf16 %v4040_v20, %v4038_v37  ;;  %5437 = vrcp.f32 %v3009_v56  ;;  %v2570_v16 = vpack.c.bf16 %v8068_v61, %v8066_v3  ;;  %v3142_v13 = vunpack.c.h.bf16 %v9072_v25  ;;  %3809 = vmatmul.bf16.gmra.mxu0 %v3463_v53 }
 0x35c   : > { %v3266_v38 = vunpack.c.h.bf16 %v2980_v0  ;;  %5439 = vrcp.f32 %v3010_v39  ;;  %v2572_v42 = vpack.c.bf16 %v8351_v33, %v8125_v46  ;;  %3898 = vmatmul.bf16.gmra.mxu1 %v3464_v11  ;;  %v3269_v55 = vunpack.c.l.bf16 %v2994_v44  ;;  %v3775_v33 = vpop.f32.mrf.mxu0 }
 0x35d   : > { %v5434_v60 = vpop.eup %5433  ;;  %v3270_v57 = vunpack.c.h.bf16 %v2994_v44  ;;  %4775 = vst [vmem:[%s8115_s28 + $0x30] sm:$0xff] %v4708_v14   ;;  %v3002_v36 = vunpack.c.h.bf16 %v2570_v16  ;;  %v3003_v54 = vunpack.c.l.bf16 %v2570_v16  ;;  %v3138_v21 = vunpack.c.h.bf16 %v9073_v41  ;;  %v9077_v16 = vld [vmem:[#allocation70_spill] sm:$0xff] }
 0x35e   : > { %v2998_v49 = vmul.f32 %v5434_v60, %v8784_v29  ;;  %v3016_v3 = vunpack.c.h.bf16 %v2572_v42  ;;  %v3017_v61 = vunpack.c.l.bf16 %v2572_v42  ;;  %v9074_v17 = vunpack.c.l.bf16 %v9073_v41 }
 0x35f   : > { %v5436_v63 = vpop.eup %5435  ;;  %v3397_v34 = vmul.f32 %v3269_v55, %v3141_v51  ;;  %v3398_v46 = vmul.f32 %v3270_v57, %v3142_v13  ;;  %5441 = vrcp.f32 %v3002_v36  ;;  %v3394_v12 = vmul.f32 %v3266_v38, %v3138_v21  ;;  %v3866_v57 = vpop.f32.mrf.mxu1  ;;  %v9078_v36 = vld [vmem:[#allocation35_spill] sm:$0xff] }
 0x360   : > { %v3393_v23 = vmul.f32 %v3265_v1, %v9074_v17  ;;  %v3000_v7 = vmul.f32 %v5436_v63, %v8786_v2  ;;  %5443 = vrcp.f32 %v3003_v54  ;;  %v3143_v40 = vunpack.c.l.bf16 %v9075_v58 }
 0x361   : > { %v5438_v19 = vpop.eup %5437  ;;  %5445 = vrcp.f32 %v3016_v3  ;;  %v3466_v45 = vpack.c.bf16 %v3398_v46, %v3394_v12  ;;  %v3144_v30 = vunpack.c.h.bf16 %v9075_v58  ;;  %v3147_v15 = vunpack.c.l.bf16 %v9076_v59 }
 0x362   : > { %v3465_v62 = vpack.c.bf16 %v3397_v34, %v3393_v23  ;;  %v5440_v52 = vpop.eup %5439  ;;  %v3001_v48 = vpack.c.bf16 %v2998_v49, %v3000_v7  ;;  %v3012_v8 = vmul.f32 %v5438_v19, %v8784_v29  ;;  %5447 = vrcp.f32 %v3017_v61 }
 0x363   : > { %v3014_v27 = vmul.f32 %v5440_v52, %v8786_v2  ;;  %4076 = vmatmul.bf16.gmra.mxu3 %v3466_v45  ;;  %v3148_v43 = vunpack.c.h.bf16 %v9076_v59  ;;  %v3776_v51 = vadd.f32 %v8341_v22, %v3775_v33  ;;  %v3149_v13 = vunpack.c.l.bf16 %v9077_v16 }
 0x364   : > { %3987 = vmatmul.bf16.gmra.mxu2 %v3465_v62  ;;  %v3271_v10 = vunpack.c.l.bf16 %v3001_v48  ;;  %v3272_v18 = vunpack.c.h.bf16 %v3001_v48  ;;  %v3777_v53 = vpop.f32.mrf.mxu0  ;;  %v3953_v11 = vpop.f32.mrf.mxu2  ;;  %v3150_v60 = vunpack.c.h.bf16 %v9077_v16  ;;  %v3145_v54 = vunpack.c.l.bf16 %v9078_v36 }
 0x365   : > { %v5442_v50 = vpop.eup %5441  ;;  %v3015_v35 = vpack.c.bf16 %v3012_v8, %v3014_v27  ;;  %v4042_v25 = vpop.f32.mrf.mxu3  ;;  %v3146_v41 = vunpack.c.h.bf16 %v9078_v36  ;;  %v3865_v21 = vadd.f32 %v3864_v47, %v3776_v51 }
 0x366   : > { %v5444_v4 = vpop.eup %5443  ;;  %v3005_v31 = vmul.f32 %v5442_v50, %v8784_v29  ;;  %v3399_v24 = vmul.f32 %v3271_v10, %v3143_v40  ;;  %v3400_v5 = vmul.f32 %v3272_v18, %v3144_v30 }
 0x367   : > { %v5446_v26 = vpop.eup %5445  ;;  %v3275_v6 = vunpack.c.l.bf16 %v3015_v35  ;;  %v3276_v28 = vunpack.c.h.bf16 %v3015_v35  ;;  %v3007_v56 = vmul.f32 %v5444_v4, %v8786_v2  ;;  %v3954_v17 = vadd.f32 %v3953_v11, %v3865_v21 }
 0x368   : > { %v5448_v9 = vpop.eup %5447  ;;  %v3019_v0 = vmul.f32 %v5446_v26, %v8784_v29 }
 0x369   : > { %v3403_v20 = vmul.f32 %v3275_v6, %v3147_v15  ;;  %v3404_v32 = vmul.f32 %v3276_v28, %v3148_v43  ;;  %v3008_v37 = vpack.c.bf16 %v3005_v31, %v3007_v56  ;;  %v3021_v39 = vmul.f32 %v5448_v9, %v8786_v2 }
 0x36a   : > { %v3778_v2 = vadd.f32 %v8341_v22, %v3777_v53  ;;  %v4043_v19 = vadd.f32 %v4042_v25, %v3954_v17 }
 0x36b   : > { %v3467_v1 = vpack.c.bf16 %v3403_v20, %v3399_v24  ;;  %v3468_v44 = vpack.c.bf16 %v3404_v32, %v3400_v5  ;;  %v3022_v14 = vpack.c.bf16 %v3019_v0, %v3021_v39  ;;  %v3273_v38 = vunpack.c.l.bf16 %v3008_v37 }
 0x36c   : > { %v3274_v42 = vunpack.c.h.bf16 %v3008_v37  ;;  %v3867_v23 = vadd.f32 %v3866_v57, %v3778_v2  ;;  %v3955_v33 = vpop.f32.mrf.mxu2 }
 0x36d   : > { %3814 = vmatmul.bf16.gmra.mxu0 %v3467_v1  ;;  %3903 = vmatmul.bf16.gmra.mxu1 %v3468_v44  ;;  %v3277_v29 = vunpack.c.l.bf16 %v3022_v14  ;;  %v3278_v55 = vunpack.c.h.bf16 %v3022_v14  ;;  %v3401_v61 = vmul.f32 %v3273_v38, %v3145_v54  ;;  %v4044_v7 = vpop.f32.mrf.mxu3 }
 0x36e   : > { %v3402_v63 = vmul.f32 %v3274_v42, %v3146_v41  ;;  %v3956_v12 = vadd.f32 %v3955_v33, %v3867_v23 }
 0x36f   : > { %v3405_v49 = vmul.f32 %v3277_v29, %v3149_v13  ;;  %v3406_v3 = vmul.f32 %v3278_v55, %v3150_v60 }
 0x370   : > { %v4045_v62 = vadd.f32 %v4044_v7, %v3956_v12  ;;  %v3780_v45 = vpop.f32.mrf.mxu0 }
 0x371   : > { %v3469_v34 = vpack.c.bf16 %v3405_v49, %v3401_v61  ;;  %v3470_v46 = vpack.c.bf16 %v3406_v3, %v3402_v63  ;;  %v3869_v48 = vpop.f32.mrf.mxu1  ;;  %v3781_v18 = vadd.f32 %v8341_v22, %v3780_v45 }
 0x372   : > { %v4713_v52 = vpack.c.bf16 %v4045_v62, %v4043_v19 }
 0x373   : > { %4081 = vmatmul.bf16.gmra.mxu3 %v3470_v46  ;;  %v3870_v58 = vadd.f32 %v3869_v48, %v3781_v18 }
 0x374   : > { %3992 = vmatmul.bf16.gmra.mxu2 %v3469_v34  ;;  %4776 = vst [vmem:[%s8115_s28 + $0x38] sm:$0xff] %v4713_v52  }
 0x378   : > { %v3782_v8 = vpop.f32.mrf.mxu0 }
 0x379   : > { %v3871_v47 = vpop.f32.mrf.mxu1  ;;  %v3783_v4 = vadd.f32 %v8341_v22, %v3782_v8 }
 0x37b   : > { %v3872_v30 = vadd.f32 %v3871_v47, %v3783_v4 }
 0x380   : > { %v3958_v27 = vpop.f32.mrf.mxu2 }
 0x381   : > { %v4047_v10 = vpop.f32.mrf.mxu3  ;;  %v3785_v50 = vpop.f32.mrf.mxu0  ;;  %v3959_v40 = vadd.f32 %v3958_v27, %v3870_v58 }
 0x382   : > { %v3874_v35 = vpop.f32.mrf.mxu1  ;;  %v3786_v5 = vadd.f32 %v8341_v22, %v3785_v50 }
 0x383   : > { %v4048_v43 = vadd.f32 %v4047_v10, %v3959_v40 }
 0x384   : > { %v3875_v37 = vadd.f32 %v3874_v35, %v3786_v5 }
 0x388   : > { %v3960_v59 = vpop.f32.mrf.mxu2 }
 0x389   : > { %v4049_v15 = vpop.f32.mrf.mxu3  ;;  %v3961_v31 = vadd.f32 %v3960_v59, %v3872_v30  ;;  %v3787_v26 = vpop.f32.mrf.mxu0 }
 0x38a   : > { %v3876_v6 = vpop.f32.mrf.mxu1  ;;  %v3788_v0 = vadd.f32 %v8341_v22, %v3787_v26 }
 0x38b   : > { %v4050_v28 = vadd.f32 %v4049_v15, %v3961_v31 }
 0x38c   : > { %v3877_v53 = vadd.f32 %v3876_v6, %v3788_v0 }
 0x38d   : > { %v4718_v56 = vpack.c.bf16 %v4050_v28, %v4048_v43 }
 0x38f   : > { %4777 = vst [vmem:[%s8115_s28 + $0x40] sm:$0xff] %v4718_v56  }
 0x391   : > { %v3963_v9 = vpop.f32.mrf.mxu2  ;;  %v4052_v24 = vpop.f32.mrf.mxu3 }
 0x392   : > { %v3964_v39 = vadd.f32 %v3963_v9, %v3875_v37 }
 0x394   : > { %v3790_v20 = vpop.f32.mrf.mxu0  ;;  %v3879_v32 = vpop.f32.mrf.mxu1  ;;  %v4053_v1 = vadd.f32 %v4052_v24, %v3964_v39 }
 0x395   : > { %v3791_v29 = vadd.f32 %v8341_v22, %v3790_v20 }
 0x397   : > { %v3880_v57 = vadd.f32 %v3879_v32, %v3791_v29 }
 0x399   : > { %v3965_v11 = vpop.f32.mrf.mxu2  ;;  %v4054_v25 = vpop.f32.mrf.mxu3 }
 0x39a   : > { %v3966_v51 = vadd.f32 %v3965_v11, %v3877_v53 }
 0x39c   : > { %v4055_v44 = vadd.f32 %v4054_v25, %v3966_v51  ;;  %v3792_v14 = vpop.f32.mrf.mxu0  ;;  %v3881_v16 = vpop.f32.mrf.mxu1 }
 0x39d   : > { %v3793_v60 = vadd.f32 %v8341_v22, %v3792_v14 }
 0x39e   : > { %v4723_v13 = vpack.c.bf16 %v4055_v44, %v4053_v1 }
 0x39f   : > { %v3882_v54 = vadd.f32 %v3881_v16, %v3793_v60 }
 0x3a0   : > { %4778 = vst [vmem:[%s8115_s28 + $0x48] sm:$0xff] %v4723_v13  }
 0x3a1   : > { %v3968_v38 = vpop.f32.mrf.mxu2 }
 0x3a2   : > { %v3969_v36 = vadd.f32 %v3968_v38, %v3880_v57 }
 0x3a3   : > { %v4057_v42 = vpop.f32.mrf.mxu3 }
 0x3a4   : > { %v4058_v3 = vadd.f32 %v4057_v42, %v3969_v36 }
 0x3a6   : > { %v3795_v55 = vpop.f32.mrf.mxu0  ;;  %v3884_v2 = vpop.f32.mrf.mxu1 }
 0x3a7   : > { %v3796_v33 = vadd.f32 %v8341_v22, %v3795_v55 }
 0x3a9   : > { %v3970_v41 = vpop.f32.mrf.mxu2  ;;  %v3885_v62 = vadd.f32 %v3884_v2, %v3796_v33 }
 0x3aa   : > { %v3971_v49 = vadd.f32 %v3970_v41, %v3882_v54 }
 0x3ab   : > { %v4059_v21 = vpop.f32.mrf.mxu3 }
 0x3ac   : > { %v4060_v61 = vadd.f32 %v4059_v21, %v3971_v49 }
 0x3ae   : > { %v3797_v63 = vpop.f32.mrf.mxu0  ;;  %v3886_v17 = vpop.f32.mrf.mxu1  ;;  %v4728_v23 = vpack.c.bf16 %v4060_v61, %v4058_v3 }
 0x3af   : > { %v3798_v12 = vadd.f32 %v8341_v22, %v3797_v63 }
 0x3b0   : > { %4779 = vst [vmem:[%s8115_s28 + $0x50] sm:$0xff] %v4728_v23  }
 0x3b1   : > { %v3887_v45 = vadd.f32 %v3886_v17, %v3798_v12 }
 0x3b2   : > { %v3973_v34 = vpop.f32.mrf.mxu2 }
 0x3b3   : > { %v4062_v46 = vpop.f32.mrf.mxu3  ;;  %v3974_v52 = vadd.f32 %v3973_v34, %v3885_v62 }
 0x3b5   : > { %v4063_v27 = vadd.f32 %v4062_v46, %v3974_v52 }
 0x3b7   : > { %v3800_v7 = vpop.f32.mrf.mxu0  ;;  %v3889_v19 = vpop.f32.mrf.mxu1 }
 0x3b8   : > { %v3801_v40 = vadd.f32 %v8341_v22, %v3800_v7 }
 0x3ba   : > { %v3975_v48 = vpop.f32.mrf.mxu2  ;;  %v3890_v31 = vadd.f32 %v3889_v19, %v3801_v40 }
 0x3bb   : > { %v4064_v8 = vpop.f32.mrf.mxu3  ;;  %v3976_v47 = vadd.f32 %v3975_v48, %v3887_v45 }
 0x3bd   : > { %v4065_v10 = vadd.f32 %v4064_v8, %v3976_v47 }
 0x3bf   : > { %v3802_v18 = vpop.f32.mrf.mxu0  ;;  %v3891_v50 = vpop.f32.mrf.mxu1  ;;  %v4733_v35 = vpack.c.bf16 %v4065_v10, %v4063_v27 }
 0x3c0   : > { %v3803_v30 = vadd.f32 %v8341_v22, %v3802_v18 }
 0x3c1   : > { %4780 = vst [vmem:[%s8115_s28 + $0x58] sm:$0xff] %v4733_v35  }
 0x3c2   : > { %v3892_v6 = vadd.f32 %v3891_v50, %v3803_v30 }
 0x3c5   : > { %v3978_v4 = vpop.f32.mrf.mxu2  ;;  %v4067_v58 = vpop.f32.mrf.mxu3 }
 0x3c6   : > { %v3979_v26 = vadd.f32 %v3978_v4, %v3890_v31 }
 0x3c8   : > { %v3805_v59 = vpop.f32.mrf.mxu0  ;;  %v3894_v15 = vpop.f32.mrf.mxu1  ;;  %v4068_v9 = vadd.f32 %v4067_v58, %v3979_v26 }
 0x3c9   : > { %v3806_v39 = vadd.f32 %v8341_v22, %v3805_v59 }
 0x3cb   : > { %v3895_v25 = vadd.f32 %v3894_v15, %v3806_v39 }
 0x3cd   : > { %v3980_v43 = vpop.f32.mrf.mxu2  ;;  %v4069_v28 = vpop.f32.mrf.mxu3 }
 0x3ce   : > { %v3981_v56 = vadd.f32 %v3980_v43, %v3892_v6 }
 0x3d0   : > { %v4070_v24 = vadd.f32 %v4069_v28, %v3981_v56  ;;  %v3807_v5 = vpop.f32.mrf.mxu0  ;;  %v3896_v20 = vpop.f32.mrf.mxu1 }
 0x3d1   : > { %v3808_v53 = vadd.f32 %v8341_v22, %v3807_v5 }
 0x3d2   : > { %v4738_v0 = vpack.c.bf16 %v4070_v24, %v4068_v9 }
 0x3d3   : > { %v3897_v1 = vadd.f32 %v3896_v20, %v3808_v53 }
 0x3d4   : > { %4781 = vst [vmem:[%s8115_s28 + $0x60] sm:$0xff] %v4738_v0  }
 0x3d5   : > { %v3983_v32 = vpop.f32.mrf.mxu2 }
 0x3d6   : > { %v4072_v37 = vpop.f32.mrf.mxu3  ;;  %v3984_v51 = vadd.f32 %v3983_v32, %v3895_v25 }
 0x3d8   : > { %v3810_v11 = vpop.f32.mrf.mxu0  ;;  %v4073_v38 = vadd.f32 %v4072_v37, %v3984_v51 }
 0x3d9   : > { %v3899_v44 = vpop.f32.mrf.mxu1  ;;  %v3811_v57 = vadd.f32 %v8341_v22, %v3810_v11 }
 0x3db   : > { %v3900_v41 = vadd.f32 %v3899_v44, %v3811_v57 }
 0x3dd   : > { %v3985_v14 = vpop.f32.mrf.mxu2 }
 0x3de   : > { %v4074_v16 = vpop.f32.mrf.mxu3  ;;  %v3986_v13 = vadd.f32 %v3985_v14, %v3897_v1 }
 0x3e0   : > { %v4075_v42 = vadd.f32 %v4074_v16, %v3986_v13  ;;  %v3812_v29 = vpop.f32.mrf.mxu0 }
 0x3e1   : > { %v3901_v36 = vpop.f32.mrf.mxu1  ;;  %v3813_v54 = vadd.f32 %v8341_v22, %v3812_v29 }
 0x3e2   : > { %v4743_v60 = vpack.c.bf16 %v4075_v42, %v4073_v38 }
 0x3e3   : > { %v3902_v3 = vadd.f32 %v3901_v36, %v3813_v54 }
 0x3e4   : > { %4782 = vst [vmem:[%s8115_s28 + $0x68] sm:$0xff] %v4743_v60  }
 0x3e6   : > { %v4077_v2 = vpop.f32.mrf.mxu3 }
 0x3e7   : > { %v3988_v55 = vpop.f32.mrf.mxu2 }
 0x3e8   : > { %v3989_v49 = vadd.f32 %v3988_v55, %v3900_v41 }
 0x3ea   : > { %v3815_v21 = vpop.f32.mrf.mxu0  ;;  %v4078_v23 = vadd.f32 %v4077_v2, %v3989_v49  ;;  %v3904_v46 = vpop.f32.mrf.mxu1 }
 0x3eb   : > { %v3816_v62 = vadd.f32 %v8341_v22, %v3815_v21 }
 0x3ed   : > { %v3905_v45 = vadd.f32 %v3904_v46, %v3816_v62 }
 0x3ee   : > { %v4079_v63 = vpop.f32.mrf.mxu3 }
 0x3ef   : > { %v3990_v61 = vpop.f32.mrf.mxu2 }
 0x3f0   : > { %v3991_v17 = vadd.f32 %v3990_v61, %v3902_v3 }
 0x3f2   : > { %v4080_v34 = vadd.f32 %v4079_v63, %v3991_v17  ;;  %v3817_v12 = vpop.f32.mrf.mxu0  ;;  %v3906_v48 = vpop.f32.mrf.mxu1 }
 0x3f3   : > { %v3818_v52 = vadd.f32 %v8341_v22, %v3817_v12 }
 0x3f4   : > { %v4748_v33 = vpack.c.bf16 %v4080_v34, %v4078_v23 }
 0x3f5   : > { %v3907_v47 = vadd.f32 %v3906_v48, %v3818_v52 }
 0x3f6   : > { %4783 = vst [vmem:[%s8115_s28 + $0x70] sm:$0xff] %v4748_v33   ;;  %v4082_v19 = vpop.f32.mrf.mxu3 }
 0x3f7   : > { %v3993_v7 = vpop.f32.mrf.mxu2 }
 0x3f8   : > { %v3994_v8 = vadd.f32 %v3993_v7, %v3905_v45 }
 0x3fa   : > { %v4083_v50 = vadd.f32 %v4082_v19, %v3994_v8 }
 0x3fe   : > { %v4084_v18 = vpop.f32.mrf.mxu3 }
 0x3ff   : > { %v3995_v27 = vpop.f32.mrf.mxu2 }
 0x400   : > { %v3996_v10 = vadd.f32 %v3995_v27, %v3907_v47 }
 0x402   : > { %v4085_v35 = vadd.f32 %v4084_v18, %v3996_v10 }
 0x404   : > { %v4753_v22 = vpack.c.bf16 %v4085_v35, %v4083_v50 }
 0x406   : > { %4784 = vst [vmem:[%s8115_s28 + $0x78] sm:$0xff] %v4753_v22  }
 0x407   : > { %5597 = shalt.err (!%p5594_p10)
}
 0x408   : > { %s5655_s17 = smov 64   ;;  %s5656_s28 = smov 4  }
 0x409   : > { %4799 = dma.vmem_to_hbm [thread:$0]  (%p5772_p3), %s4165_s14, 2048, %s4167_s15, %s4152_s22, %s5655_s17, %s5655_s17, %s5656_s28  }
 0x40a PF: > { %s4181_s23 = sand.u32 1, %s5632_s18   ;;  %p9079_p12 = scmp.ge.s32.totalorder %s5644_s21, 2 }
 0x40b   : > { %s4182_s26 = scalar_lea.sflag [#allocation4], %s4181_s23 }
 0x40c   : > { %p4816_p13 = pnand %p9079_p12, %p5722_p6 }
 0x40e   : > { %p4817_p0 = pneg %p4816_p13 }
 0x410   : > { %5627 = dma.done.wait (%p4817_p0), %s4182_s26, 2048  }
 0x411   : > { %5629 = vsyncadd (%p4817_p0), %s4182_s26, 4294965248  ;;  %p20_p5 = scmp.ge.s32.totalorder %s5759_s30, 4   ;;  %s9080_s18 = smov %s5636_s19 }
 0x412   : > { %s9081_s19 = smov %s5640_s20  ;;  %s9082_s20 = smov %s5768_s9 }
 0x413   : > { %s9083_s21 = smov %s5759_s30  ;;  %22 = sbr.rel (!%p20_p5) target bundleno = 7 (0x7), region = 97 }
 0x418   :  { %4188 = vsyncpa [#allocation3], 1 }
 0x419   :  { %4190 = vsyncpa [#allocation3 + $0x1], 1 }
 0x41a   :  { %4191 = vsyncpa [#allocation6], 1 }
 0x41b   :  { %4192 = vsyncpa [#allocation9], 1 }
 0x41c   :  { %4193 = vsyncpa [#allocation4], 1 }
 0x41d   :  { %4195 = vsyncpa [#allocation4 + $0x1], 1 }

</bundles_post_ra>
